<compile_context>
chip_gen: v7x
topology: tpu7x:2x2x1
jax: 0.10.0
libtpu: 0.0.40
codegen_flags: <defaults>
</compile_context>

<pallas_src>
import functools

import jax
import jax.numpy as jnp
from jax.experimental import pallas as pl
from jax.experimental.pallas import tpu as pltpu

MIDDLE = 0.5                      # Binary.__init__ hardcodes self.middle = 0.5
_LANES_WIDE = 1024                # lane-dense slab width (8 vregs) -> wide unmasked vst
_LANES_MIN = 128                  # minimum lane width (1 vreg)
_FAST_PATH_MAX_ELEMS = 256 * 1024 # below this, a fused jnp.where beats pallas_call


def _binary_kernel(x_ref, o_ref):
    # zero_index = x < 0.5 -> 0 ; complement -> 1  (NaN -> 1, matching torch)
    zero_idx = x_ref[...] < MIDDLE
    o_ref[...] = (~zero_idx).astype(o_ref.dtype)


def _cdiv(a, b):
    return -(-a // b)


def _round_up(a, b):
    return _cdiv(a, b) * b


@functools.lru_cache(maxsize=1)
def _tpu_config():
    """Per-generation block-byte target, VMEM limit, and even-grid preference."""
    try:
        kind = jax.devices()[0].device_kind.lower()
    except Exception:  # pragma: no cover - unknown backend, stay conservative
        kind = ""
    if "v7" in kind:
        # 64 MiB physical VMEM, 3.2 TB/s HBM, 2 TCs: big blocks + raised limit.
        return {"target_bytes": 8 << 20, "vmem_limit": 48 << 20, "even_grid": True}
    if "v6" in kind:
        # 4 MiB blocks -> 16 MiB resident with in+out double-buffering,
        # still under the 32 MiB default scoped VMEM.
        return {"target_bytes": 4 << 20, "vmem_limit": None, "even_grid": False}
    # v5e (16 MiB default scoped VMEM) and unknown chips: 2 MiB blocks.
    return {"target_bytes": 2 << 20, "vmem_limit": None, "even_grid": False}


def _run_slab(slab):
    rows, lanes = slab.shape
    dtype = slab.dtype
    itemsize = jnp.dtype(dtype).itemsize
    cfg = _tpu_config()

    # Sublane multiple: 8 for 4-byte, 16 for 2-byte, 32 for 1-byte dtypes.
    sub_mult = max(8, 32 // itemsize)
    total_bytes = rows * lanes * itemsize

    if total_bytes <= cfg["target_bytes"]:
        block_rows = rows  # full-extent block: always a legal block shape
    else:
        # Size blocks by bytes so every (lanes, dtype) combination gets a
        # block near the target, not a fixed row count.
        block_rows = max(
            sub_mult,
            (cfg["target_bytes"] // (lanes * itemsize)) // sub_mult * sub_mult,
        )
    grid_n = _cdiv(rows, block_rows)

    # v7x: even number of grid steps so ("parallel",) splits evenly over 2 TCs.
    if cfg["even_grid"] and grid_n > 1 and grid_n % 2 == 1:
        block_rows = max(sub_mult, _round_up(_cdiv(rows, grid_n + 1), sub_mult))
        grid_n = _cdiv(rows, block_rows)

    compiler_kwargs = {"dimension_semantics": ("parallel",)}
    if cfg["vmem_limit"] is not None:
        compiler_kwargs["vmem_limit_bytes"] = cfg["vmem_limit"]

    return pl.pallas_call(
        _binary_kernel,
        out_shape=jax.ShapeDtypeStruct((rows, lanes), dtype),
        grid_spec=pltpu.PrefetchScalarGridSpec(
            num_scalar_prefetch=0,
            grid=(grid_n,),
            in_specs=[pl.BlockSpec((block_rows, lanes), lambda i: (i, 0))],
            out_specs=pl.BlockSpec((block_rows, lanes), lambda i: (i, 0)),
        ),
        compiler_params=pltpu.CompilerParams(**compiler_kwargs),
        cost_estimate=pl.CostEstimate(
            flops=rows * lanes, transcendentals=0, bytes_accessed=2 * total_bytes),
    )(slab)


def binary(x, middle=0.5):
    """Pallas equivalent of Binary.forward.

    NOTE: exactly like the PyTorch module (whose __init__ hardcodes
    self.middle = 0.5), the `middle` argument is IGNORED; the threshold
    is always 0.5.
    """
    if x is None:
        return None
    del middle  # matches the reference: __init__ ignores the constructor arg

    orig_shape = x.shape
    n = x.size
    if n == 0:
        return x

    # Tiny tensors: the pallas_call launch overhead (several us) dwarfs the
    # <1 us of HBM traffic; let XLA fuse a where into neighbors instead.
    if n <= _FAST_PATH_MAX_ELEMS:
        return jnp.where(x < MIDDLE, 0, 1).astype(x.dtype)

    # Pick the widest lane-dense slab width that divides n exactly, so the
    # reshape is a free contiguous relayout: no pad, no slice, no extra HBM pass.
    if n % _LANES_WIDE == 0:
        lanes = _LANES_WIDE
    elif n % _LANES_MIN == 0:
        lanes = _LANES_MIN
    else:
        lanes = None

    if lanes is not None:
        slab = x.reshape(n // lanes, lanes)
        return _run_slab(slab).reshape(orig_shape)

    # Fallback (size not a multiple of 128): minimal pad to one (8,128)-tile
    # multiple, then slice the tail off. Rare for real activation tensors.
    padded = _round_up(n, _LANES_MIN * 8)
    flat = jnp.pad(jnp.ravel(x), (0, padded - n))
    slab = flat.reshape(padded // _LANES_MIN, _LANES_MIN)
    out = _run_slab(slab)
    return out.reshape(-1)[:n].reshape(orig_shape)


if __name__ == "__main__":
    key = jax.random.PRNGKey(0)

    def _ref(v):
        # Independent reference: 0 where v < 0.5, else 1 (NaN -> 1, like torch).
        return jnp.where(v < MIDDLE, 0, 1).astype(v.dtype)

    k0, k1, k2, k3, k4 = jax.random.split(key, 5)

    # Small NCHW activation (2*4*16*16 = 2048 elems): fused fast path.
    x0 = jax.random.uniform(k0, (2, 4, 16, 16), dtype=jnp.float32)
    y0 = jax.block_until_ready(binary(x0))
    assert y0.shape == x0.shape and y0.dtype == x0.dtype
    assert bool(jnp.all(y0 == _ref(x0)))

    # 1024-lane slab with a ragged last block (multi-block on v5e/v6e),
    # including NaNs which must map to 1 like the PyTorch module.
    x1 = jax.random.uniform(k1, (1040, 1024), dtype=jnp.float32)
    x1 = x1.at[3, 7].set(jnp.nan).at[1039, 1023].set(jnp.nan)
    y1 = jax.block_until_ready(binary(x1))
    assert bool(jnp.all(y1 == _ref(x1)))
    assert float(y1[3, 7]) == 1.0 and float(y1[1039, 1023]) == 1.0

    # Bigger slab: multi-block on every generation (4096x1024 f32 = 16 MiB).
    x2 = jax.random.uniform(k2, (4096, 1024), dtype=jnp.float32)
    y2 = jax.block_until_ready(binary(x2))
    assert bool(jnp.all(y2 == _ref(x2)))

    # 128-lane path (327,808 elems: divisible by 128 but not by 1024).
    x3 = jax.random.uniform(k3, (2561, 128), dtype=jnp.float32)
    y3 = jax.block_until_ready(binary(x3))
    assert bool(jnp.all(y3 == _ref(x3)))

    # bf16 slab: exercises byte-based block sizing and the 16-row sublane multiple.
    x4 = jax.random.uniform(k4, (1024, 1024), dtype=jnp.float32).astype(jnp.bfloat16)
    y4 = jax.block_until_ready(binary(x4))
    assert y4.dtype == jnp.bfloat16
    assert bool(jnp.all(y4 == _ref(x4)))

    # Fallback path (large, size not divisible by 128).
    x5 = jax.random.uniform(jax.random.PRNGKey(1), (513, 517), dtype=jnp.float32)
    y5 = jax.block_until_ready(binary(x5))
    assert y5.shape == x5.shape
    assert bool(jnp.all(y5 == _ref(x5)))

    print("KERNEL_OK")
</pallas_src>

<mosaic_0001>
module attributes {stable_mosaic.version = 11 : i64} {
  func.func @_binary_kernel(%arg0: i32, %arg1: memref<512x1024xf32, #tpu.memory_space<vmem>>, %arg2: memref<512x1024xf32, #tpu.memory_space<vmem>>) attributes {dimension_semantics = [#tpu.dimension_semantics<parallel>], iteration_bounds = array<i64: 3>, scalar_prefetch = 0 : i64, scratch_operands = 0 : i64, tpu.core_type = #tpu.core_type<tc>, window_params = [{transform_indices = @transform_0, window_bounds = array<i64: 512, 1024>}, {transform_indices = @transform_1, window_bounds = array<i64: 512, 1024>}]} {
    %c0 = arith.constant 0 : index
    %c0_0 = arith.constant 0 : index
    %0 = vector.load %arg1[%c0, %c0_0] : memref<512x1024xf32, #tpu.memory_space<vmem>>, vector<512x1024xf32>
    %cst = arith.constant 5.000000e-01 : f32
    %1 = vector.broadcast %cst : f32 to vector<512x1024xf32>
    %2 = arith.cmpf olt, %0, %1 : vector<512x1024xf32>
    %cst_1 = arith.constant dense<true> : vector<512x1024xi1>
    %3 = arith.xori %2, %cst_1 : vector<512x1024xi1>
    %4 = arith.extui %3 : vector<512x1024xi1> to vector<512x1024xi32>
    %5 = arith.sitofp %4 : vector<512x1024xi32> to vector<512x1024xf32>
    %c0_2 = arith.constant 0 : index
    %c0_3 = arith.constant 0 : index
    %6 = vector.load %arg2[%c0_2, %c0_3] : memref<512x1024xf32, #tpu.memory_space<vmem>>, vector<512x1024xf32>
    tpu.vector_store %arg2[%c0_2, %c0_3], %5 {strides = array<i32>} : memref<512x1024xf32, #tpu.memory_space<vmem>>, vector<512x1024xf32>,
    return
  }
  func.func @transform_0(%arg0: i32) -> (i32, i32) {
    %c0_i32 = arith.constant 0 : i32
    %c0_i32_0 = arith.constant 0 : i32
    return %arg0, %c0_i32 : i32, i32
  }
  func.func @transform_1(%arg0: i32) -> (i32, i32) {
    %c0_i32 = arith.constant 0 : i32
    %c0_i32_0 = arith.constant 0 : i32
    return %arg0, %c0_i32 : i32, i32
  }
}

</mosaic_0001>

<bundles_post_ra>
// kernel: tpu_custom_call.1
= control target key start
LH: loop header
LB: loop body
LE: loop exit
PB: predicated region body
PF: predicated region fallthrough
CT: control target
= control target key end

     0   :  { %6 = vsyncpa [#allocation3], 0  ;;  %s6248_s0 = inlined_call_operand.hbm [shape: f32[1040,1024], index: 0, kind: input, shape index: {}]   ;;  %s6249_s1 = inlined_call_operand.hbm [shape: f32[1040,1024], index: 1, kind: output, shape index: {}]  }
   0x1   :  { %8 = vsyncpa [#allocation3 + $0x1], 0 }
   0x2   :  { %9 = vsyncpa [#allocation4], 0 }
   0x3   :  { %11 = vsyncpa [#allocation4 + $0x1], 0  ;;  %s4025_s6 = smov 0   ;;  %s4027_s7 = smov 0  }
   0x4   :  { %s4029_s8 = smov 0   ;;  %s4031_s9 = smov 0  }
   0x5 LB: > { %s4046_s10 = sadd.s32 4294967295, %s4005_s9   ;;  %s3322_s11 = sadd.s32 4294967294, %s4005_s9   ;;  %s4005_s9 = sphi %s4031_s9, %s6257_s9   ;;  %s4001_s8 = sphi %s4029_s8, %s6256_s8   ;;  %s3997_s7 = sphi %s4027_s7, %s6255_s7   ;;  %s3993_s6 = sphi %s4025_s6, %s6254_s6  }
   0x6   : > { %s4050_s12 = sadd.s32 1, %s4005_s9   ;;  %s24_s13 = sadd.s32 1, %s4001_s8 }
   0x7   : > { %s21_s14 = ssub.s32 %s4005_s9, %s4050_s12  ;;  %p31_p0 = scmp.ne.s32.totalorder %s4001_s8, %s3997_s7 }
   0x8   : > { %p22_p1 = scmp.eq.s32.totalorder %s21_s14, 0  ;;  %p32_p2 = scmp.eq.s32.totalorder %s4005_s9, 0 }
   0x9   : > { %p37_p3 = scmp.ne.s32.totalorder %s3997_s7, %s3993_s6  ;;  %p38_p4 = scmp.eq.s32.totalorder %s4046_s10, 0 }
   0xa   : > { %s4062_s15 = scalar_select %p22_p1, %s4001_s8, %s24_s13  }
   0xb   : > { %p33_p5 = por %p32_p2, %p31_p0  ;;  %p4064_p6 = por %p38_p4, %p37_p3 }
   0xc   : > { %p61_p7 = scmp.eq.s32.totalorder %s4046_s10, 2  ;;  %p67_p8 = scmp.eq.s32.totalorder %s3322_s11, 2 }
   0xd   : > { %p3324_p11 = scmp.ge.s32.totalorder %s4005_s9, 3 }
   0xe   : > { %p4069_p9 = por %p61_p7, %p31_p0  ;;  %p4073_p10 = por %p67_p8, %p37_p3 }
   0xf   : > { %83 = sbr.rel (%p3324_p11) target bundleno = 57 (0x39), region = 16 }
  0x10   : > { %s6252_s18 = scalar_select %p4073_p10, 1, 0 }
  0x16   : > { %86 = sbr.rel (!%p33_p5) target bundleno = 57 (0x39), region = 20  ;;  %s87_s19 = sand.u32 (%p33_p5), 1, %s4001_s8  }
  0x17   : > { %s3326_s20 = sshll.u32 (%p33_p5), %s4005_s9, 6  ;;  %s3325_s21 = sshll.u32 (%p33_p5), %s87_s19, 12 }
  0x18   : > { %s93_s22 = ssub.s32 (%p33_p5), 130, %s3326_s20  ;;  %s4083_s25 = scalar_lea.sflag (%p33_p5), [#allocation3], %s87_s19 }
  0x19   : > { %p94_p12 = scmp.lt.s32.totalorder (%p33_p5), %s93_s22, 64  ;;  %s91_s26 = scalar_lea.vmem (%p33_p5), [#allocation2], %s3325_s21 }
  0x1d   : > { %s6259_s22 = smov (!%p94_p12, %s93_s22), 64 }
  0x1e   : > { %s4080_s23 = sshll.u32 %s6259_s22, 10 }
  0x1f   : > { %s99_s24 = ssub.s32 65536, %s4080_s23 }
  0x20   : > { %100 = vsyncadd %s4083_s25, %s99_s24  ;;  %p3329_p13 = scmp.ne.s32.totalorder %s4080_s23, 0  ;;  %s3862_s27 = sshll.u32 %s4005_s9, 16 }
  0x21   : > { %s4091_s30 = scalar_lea.hbm %s6248_s0, %s3862_s27  ;;  %s106_s2 = sshll.u32 %s91_s26, 4  ;;  %s4093_s2 = int_to_ptr.vmem [resolvable:$true] %s106_s2 }
  0x22   : > { %s3911_s3 = scalar_lea.hbm %s4091_s30, %s4080_s23  ;;  %s3915_s11 = scalar_lea.hbm %s6248_s0, 133120 }
  0x23   : > { %p3912_p0 = scmp.ne.s32.totalorder %s4091_s30, %s3911_s3  ;;  %p3916_p3 = scmp.lt.u32.totalorder %s4091_s30, %s6248_s0 }
  0x24   : > { %p3917_p4 = scmp.lt.u32.totalorder %s3915_s11, %s3911_s3  ;;  %p3919_p7 = scmp.lt.u32.totalorder %s3911_s3, %s4091_s30 }
  0x25   : > { %p3913_p1 = pnand %p3912_p0, %p3329_p13 }
  0x26   : > { %p3918_p5 = por %p3917_p4, %p3916_p3 }
  0x27   : > { %p3914_p2 = pneg %p3913_p1 }
  0x28   : > { %p3920_p8 = por %p3919_p7, %p3918_p5 }
  0x2a   : > { %p3921_p11 = pnand %p3920_p8, %p3914_p2 }
  0x2c   : > { %3924 = shalt.err (!%p3921_p11)
}
  0x2d   : > { %s3925_s19 = scalar_lea.vmem %s4093_s2, %s4080_s23  ;;  %s4007_s20 = smov [#allocation2]  }
  0x2e   : > { %p3926_p12 = scmp.ne.s32.totalorder %s4093_s2, %s3925_s19  ;;  %s3929_s21 = sshll.u32 %s4007_s20, 4  ;;  %s3930_s21 = int_to_ptr.vmem [resolvable:$false] %s3929_s21 }
  0x2f   : > { %s3931_s22 = scalar_lea.vmem %s3930_s21, 131072  ;;  %p3932_p10 = scmp.lt.s32.totalorder %s4093_s2, %s3930_s21 }
  0x30   : > { %p3927_p0 = pnand %p3926_p12, %p3329_p13  ;;  %p3933_p3 = scmp.lt.s32.totalorder %s3931_s22, %s3925_s19 }
  0x32   : > { %p3928_p1 = pneg %p3927_p0  ;;  %p3934_p4 = por %p3933_p3, %p3932_p10 }
  0x34   : > { %p3935_p5 = pnand %p3934_p4, %p3928_p1 }
  0x36   : > { %3938 = shalt.err (!%p3935_p5)
}
  0x37   : > { %s4008_s24 = smov 1024   ;;  %s4009_s26 = smov 64  }
  0x38   : > { %112 = dma.hbm_to_vmem [thread:$0]  (%p3329_p13), %s4091_s30, %s4080_s23, %s4093_s2, %s4083_s25, %s4008_s24, %s4008_s24, %s4009_s26  }
  0x39 PF: > { %p3334_p2 = scmp.ge.s32.totalorder %s4005_s9, 1  ;;  %p114_p7 = scmp.lt.s32.totalorder %s4005_s9, 4 }
  0x3b   : > { %p115_p8 = pnand %p3334_p2, %p114_p7 }
  0x3c   : > { %s4123_s27 = sand.u32 (!%p115_p8), 1, %s3997_s7  }
  0x3d   : > { %118 = sbr.rel (%p115_p8) target bundleno = 613 (0x265), region = 24  ;;  %s3335_s28 = sshll.u32 (!%p115_p8), %s4123_s27, 12 }
  0x3e   : > { %s121_s29 = scalar_lea.sflag (!%p115_p8), [#allocation3], %s4123_s27  ;;  %s4127_s3 = scalar_lea.vmem (!%p115_p8), [#allocation2], %s3335_s28 }
  0x44   : > { %3984 = dma.done.wait (%p4064_p6), %s121_s29, 65536  }
  0x45   : > { %3986 = vsyncadd (%p4064_p6), %s121_s29, 4294901760  ;;  %v155_v0 = vld [vmem:[%s4127_s3] sm:$0xff]  ;;  %v156_v1 = vld [vmem:[%s4127_s3 + $0x8] sm:$0xff]  ;;  %vm4010_vm3 = vmmov 1   ;;  %v4011_v7 = vmov 0.0   ;;  %s4144_s16 = scalar_lea.vmem [#allocation5], %s3335_s28 }
  0x46   : > { %v157_v2 = vld [vmem:[%s4127_s3 + $0x10] sm:$0xff]  ;;  %vm667_vm0 = vcmp.lt.f32.partialorder %v155_v0, 0.5  ;;  %vm668_vm1 = vcmp.lt.f32.partialorder %v156_v1, 0.5  ;;  %v158_v3 = vld [vmem:[%s4127_s3 + $0x18] sm:$0xff]  ;;  %v159_v4 = vld [vmem:[%s4127_s3 + $0x20] sm:$0xff]  ;;  %s3228_s23 = scalar_lea.sflag [#allocation4], %s4123_s27 }
  0x47   : > { %vm669_vm2 = vcmp.lt.f32.partialorder %v157_v2, 0.5  ;;  %v160_v5 = vld [vmem:[%s4127_s3 + $0x28] sm:$0xff]  ;;  %vm1179_vm4 = vmxor %vm667_vm0, %vm4010_vm3  ;;  %vm670_vm5 = vcmp.lt.f32.partialorder %v158_v3, 0.5  ;;  %v161_v6 = vld [vmem:[%s4127_s3 + $0x30] sm:$0xff]  ;;  %vm671_vm7 = vcmp.lt.f32.partialorder %v159_v4, 0.5  ;;  %s3850_s25 = sshll.u32 (%p4069_p9), %s4046_s10, 6 }
  0x48   : > { %v3337_v8 = vsel %vm1179_vm4, 1.0, %v4011_v7  ;;  %vm1180_vm6 = vmxor %vm668_vm1, %vm4010_vm3  ;;  %v162_v9 = vld [vmem:[%s4127_s3 + $0x38] sm:$0xff]  ;;  %vm672_vm9 = vcmp.lt.f32.partialorder %v160_v5, 0.5  ;;  %v163_v11 = vld [vmem:[%s4127_s3 + $0x40] sm:$0xff]  ;;  %vm673_vm11 = vcmp.lt.f32.partialorder %v161_v6, 0.5  ;;  %s3236_s30 = ssub.s32 (%p4069_p9), 130, %s3850_s25 }
  0x49   : > { %2715 = vst [vmem:[%s4144_s16] sm:$0xff] %v3337_v8  ;;  %v3338_v10 = vsel %vm1180_vm6, 1.0, %v4011_v7  ;;  %vm1181_vm8 = vmxor %vm669_vm2, %vm4010_vm3  ;;  %v164_v13 = vld [vmem:[%s4127_s3 + $0x48] sm:$0xff]  ;;  %vm674_vm13 = vcmp.lt.f32.partialorder %v162_v9, 0.5  ;;  %v165_v15 = vld [vmem:[%s4127_s3 + $0x50] sm:$0xff]  ;;  %vm675_vm15 = vcmp.lt.f32.partialorder %v163_v11, 0.5  ;;  %p3237_p6 = scmp.lt.s32.totalorder (%p4069_p9), %s3236_s30, 64 }
  0x4a   : > { %2716 = vst [vmem:[%s4144_s16 + $0x8] sm:$0xff] %v3338_v10  ;;  %v3339_v12 = vsel %vm1181_vm8, 1.0, %v4011_v7  ;;  %vm1182_vm10 = vmxor %vm670_vm5, %vm4010_vm3  ;;  %v166_v17 = vld [vmem:[%s4127_s3 + $0x58] sm:$0xff]  ;;  %vm676_vm1 = vcmp.lt.f32.partialorder %v164_v13, 0.5  ;;  %v167_v19 = vld [vmem:[%s4127_s3 + $0x60] sm:$0xff]  ;;  %vm677_vm4 = vcmp.lt.f32.partialorder %v165_v15, 0.5 }
  0x4b   : > { %2717 = vst [vmem:[%s4144_s16 + $0x10] sm:$0xff] %v3339_v12  ;;  %v3340_v14 = vsel %vm1182_vm10, 1.0, %v4011_v7  ;;  %vm1183_vm12 = vmxor %vm671_vm7, %vm4010_vm3  ;;  %v168_v21 = vld [vmem:[%s4127_s3 + $0x68] sm:$0xff]  ;;  %vm678_vm6 = vcmp.lt.f32.partialorder %v166_v17, 0.5  ;;  %v169_v23 = vld [vmem:[%s4127_s3 + $0x70] sm:$0xff]  ;;  %vm679_vm8 = vcmp.lt.f32.partialorder %v167_v19, 0.5 }
  0x4c   : > { %2718 = vst [vmem:[%s4144_s16 + $0x18] sm:$0xff] %v3340_v14  ;;  %v3341_v16 = vsel %vm1183_vm12, 1.0, %v4011_v7  ;;  %vm1184_vm14 = vmxor %vm672_vm9, %vm4010_vm3  ;;  %v170_v25 = vld [vmem:[%s4127_s3 + $0x78] sm:$0xff]  ;;  %vm680_vm10 = vcmp.lt.f32.partialorder %v168_v21, 0.5  ;;  %v171_v27 = vld [vmem:[%s4127_s3 + $0x80] sm:$0xff]  ;;  %vm681_vm12 = vcmp.lt.f32.partialorder %v169_v23, 0.5 }
  0x4d   : > { %2719 = vst [vmem:[%s4144_s16 + $0x20] sm:$0xff] %v3341_v16  ;;  %v3342_v18 = vsel %vm1184_vm14, 1.0, %v4011_v7  ;;  %vm1185_vm0 = vmxor %vm673_vm11, %vm4010_vm3  ;;  %v172_v29 = vld [vmem:[%s4127_s3 + $0x88] sm:$0xff]  ;;  %vm682_vm14 = vcmp.lt.f32.partialorder %v170_v25, 0.5  ;;  %v173_v31 = vld [vmem:[%s4127_s3 + $0x90] sm:$0xff] }
  0x4e   : > { %2720 = vst [vmem:[%s4144_s16 + $0x28] sm:$0xff] %v3342_v18  ;;  %v3343_v20 = vsel %vm1185_vm0, 1.0, %v4011_v7  ;;  %vm1186_vm2 = vmxor %vm674_vm13, %vm4010_vm3  ;;  %vm683_vm0 = vcmp.lt.f32.partialorder %v171_v27, 0.5  ;;  %v174_v33 = vld [vmem:[%s4127_s3 + $0x98] sm:$0xff]  ;;  %v175_v35 = vld [vmem:[%s4127_s3 + $0xa0] sm:$0xff] }
  0x4f   : > { %2721 = vst [vmem:[%s4144_s16 + $0x30] sm:$0xff] %v3343_v20  ;;  %v3344_v22 = vsel %vm1186_vm2, 1.0, %v4011_v7  ;;  %vm1187_vm5 = vmxor %vm675_vm15, %vm4010_vm3  ;;  %vm684_vm2 = vcmp.lt.f32.partialorder %v172_v29, 0.5  ;;  %v176_v37 = vld [vmem:[%s4127_s3 + $0xa8] sm:$0xff]  ;;  %v177_v39 = vld [vmem:[%s4127_s3 + $0xb0] sm:$0xff] }
  0x50   : > { %2722 = vst [vmem:[%s4144_s16 + $0x38] sm:$0xff] %v3344_v22  ;;  %v3345_v24 = vsel %vm1187_vm5, 1.0, %v4011_v7  ;;  %vm1188_vm7 = vmxor %vm676_vm1, %vm4010_vm3  ;;  %vm685_vm5 = vcmp.lt.f32.partialorder %v173_v31, 0.5  ;;  %v178_v41 = vld [vmem:[%s4127_s3 + $0xb8] sm:$0xff]  ;;  %v179_v43 = vld [vmem:[%s4127_s3 + $0xc0] sm:$0xff] }
  0x51   : > { %2723 = vst [vmem:[%s4144_s16 + $0x40] sm:$0xff] %v3345_v24  ;;  %v3346_v26 = vsel %vm1188_vm7, 1.0, %v4011_v7  ;;  %vm1189_vm9 = vmxor %vm677_vm4, %vm4010_vm3  ;;  %vm686_vm7 = vcmp.lt.f32.partialorder %v174_v33, 0.5  ;;  %v180_v45 = vld [vmem:[%s4127_s3 + $0xc8] sm:$0xff]  ;;  %v181_v47 = vld [vmem:[%s4127_s3 + $0xd0] sm:$0xff] }
  0x52   : > { %2724 = vst [vmem:[%s4144_s16 + $0x48] sm:$0xff] %v3346_v26  ;;  %v3347_v28 = vsel %vm1189_vm9, 1.0, %v4011_v7  ;;  %vm1190_vm11 = vmxor %vm678_vm6, %vm4010_vm3  ;;  %vm687_vm9 = vcmp.lt.f32.partialorder %v175_v35, 0.5  ;;  %v182_v49 = vld [vmem:[%s4127_s3 + $0xd8] sm:$0xff]  ;;  %v183_v51 = vld [vmem:[%s4127_s3 + $0xe0] sm:$0xff] }
  0x53   : > { %2725 = vst [vmem:[%s4144_s16 + $0x50] sm:$0xff] %v3347_v28  ;;  %v3348_v30 = vsel %vm1190_vm11, 1.0, %v4011_v7  ;;  %vm1191_vm13 = vmxor %vm679_vm8, %vm4010_vm3  ;;  %vm688_vm11 = vcmp.lt.f32.partialorder %v176_v37, 0.5  ;;  %v184_v53 = vld [vmem:[%s4127_s3 + $0xe8] sm:$0xff]  ;;  %v185_v55 = vld [vmem:[%s4127_s3 + $0xf0] sm:$0xff] }
  0x54   : > { %2726 = vst [vmem:[%s4144_s16 + $0x58] sm:$0xff] %v3348_v30  ;;  %v3349_v32 = vsel %vm1191_vm13, 1.0, %v4011_v7  ;;  %vm1192_vm15 = vmxor %vm680_vm10, %vm4010_vm3  ;;  %vm689_vm13 = vcmp.lt.f32.partialorder %v177_v39, 0.5  ;;  %v186_v57 = vld [vmem:[%s4127_s3 + $0xf8] sm:$0xff]  ;;  %v187_v59 = vld [vmem:[%s4127_s3 + $0x100] sm:$0xff] }
  0x55   : > { %2727 = vst [vmem:[%s4144_s16 + $0x60] sm:$0xff] %v3349_v32  ;;  %v3350_v34 = vsel %vm1192_vm15, 1.0, %v4011_v7  ;;  %vm1193_vm1 = vmxor %vm681_vm12, %vm4010_vm3  ;;  %vm690_vm15 = vcmp.lt.f32.partialorder %v178_v41, 0.5  ;;  %v188_v61 = vld [vmem:[%s4127_s3 + $0x108] sm:$0xff]  ;;  %v189_v63 = vld [vmem:[%s4127_s3 + $0x110] sm:$0xff] }
  0x56   : > { %2728 = vst [vmem:[%s4144_s16 + $0x68] sm:$0xff] %v3350_v34  ;;  %v3351_v36 = vsel %vm1193_vm1, 1.0, %v4011_v7  ;;  %vm1194_vm4 = vmxor %vm682_vm14, %vm4010_vm3  ;;  %vm691_vm1 = vcmp.lt.f32.partialorder %v179_v43, 0.5  ;;  %v190_v1 = vld [vmem:[%s4127_s3 + $0x118] sm:$0xff]  ;;  %v191_v3 = vld [vmem:[%s4127_s3 + $0x120] sm:$0xff] }
  0x57   : > { %2729 = vst [vmem:[%s4144_s16 + $0x70] sm:$0xff] %v3351_v36  ;;  %v3352_v38 = vsel %vm1194_vm4, 1.0, %v4011_v7  ;;  %vm1195_vm6 = vmxor %vm683_vm0, %vm4010_vm3  ;;  %vm692_vm4 = vcmp.lt.f32.partialorder %v180_v45, 0.5  ;;  %v192_v5 = vld [vmem:[%s4127_s3 + $0x128] sm:$0xff]  ;;  %v193_v8 = vld [vmem:[%s4127_s3 + $0x130] sm:$0xff] }
  0x58   : > { %2730 = vst [vmem:[%s4144_s16 + $0x78] sm:$0xff] %v3352_v38  ;;  %v3353_v40 = vsel %vm1195_vm6, 1.0, %v4011_v7  ;;  %vm1196_vm8 = vmxor %vm684_vm2, %vm4010_vm3  ;;  %vm693_vm6 = vcmp.lt.f32.partialorder %v181_v47, 0.5  ;;  %v194_v10 = vld [vmem:[%s4127_s3 + $0x138] sm:$0xff]  ;;  %v195_v12 = vld [vmem:[%s4127_s3 + $0x140] sm:$0xff] }
  0x59   : > { %2731 = vst [vmem:[%s4144_s16 + $0x80] sm:$0xff] %v3353_v40  ;;  %v3354_v42 = vsel %vm1196_vm8, 1.0, %v4011_v7  ;;  %vm1197_vm10 = vmxor %vm685_vm5, %vm4010_vm3  ;;  %vm694_vm8 = vcmp.lt.f32.partialorder %v182_v49, 0.5  ;;  %v196_v14 = vld [vmem:[%s4127_s3 + $0x148] sm:$0xff]  ;;  %v197_v16 = vld [vmem:[%s4127_s3 + $0x150] sm:$0xff] }
  0x5a   : > { %2732 = vst [vmem:[%s4144_s16 + $0x88] sm:$0xff] %v3354_v42  ;;  %v3355_v44 = vsel %vm1197_vm10, 1.0, %v4011_v7  ;;  %vm1198_vm12 = vmxor %vm686_vm7, %vm4010_vm3  ;;  %vm695_vm10 = vcmp.lt.f32.partialorder %v183_v51, 0.5  ;;  %v198_v18 = vld [vmem:[%s4127_s3 + $0x158] sm:$0xff]  ;;  %v199_v20 = vld [vmem:[%s4127_s3 + $0x160] sm:$0xff] }
  0x5b   : > { %2733 = vst [vmem:[%s4144_s16 + $0x90] sm:$0xff] %v3355_v44  ;;  %v3356_v46 = vsel %vm1198_vm12, 1.0, %v4011_v7  ;;  %vm1199_vm14 = vmxor %vm687_vm9, %vm4010_vm3  ;;  %vm696_vm12 = vcmp.lt.f32.partialorder %v184_v53, 0.5  ;;  %v200_v22 = vld [vmem:[%s4127_s3 + $0x168] sm:$0xff]  ;;  %v201_v24 = vld [vmem:[%s4127_s3 + $0x170] sm:$0xff] }
  0x5c   : > { %2734 = vst [vmem:[%s4144_s16 + $0x98] sm:$0xff] %v3356_v46  ;;  %v3357_v48 = vsel %vm1199_vm14, 1.0, %v4011_v7  ;;  %vm1200_vm0 = vmxor %vm688_vm11, %vm4010_vm3  ;;  %vm697_vm14 = vcmp.lt.f32.partialorder %v185_v55, 0.5  ;;  %v202_v26 = vld [vmem:[%s4127_s3 + $0x178] sm:$0xff]  ;;  %v203_v28 = vld [vmem:[%s4127_s3 + $0x180] sm:$0xff] }
  0x5d   : > { %2735 = vst [vmem:[%s4144_s16 + $0xa0] sm:$0xff] %v3357_v48  ;;  %v3358_v50 = vsel %vm1200_vm0, 1.0, %v4011_v7  ;;  %vm1201_vm2 = vmxor %vm689_vm13, %vm4010_vm3  ;;  %vm698_vm0 = vcmp.lt.f32.partialorder %v186_v57, 0.5  ;;  %v204_v30 = vld [vmem:[%s4127_s3 + $0x188] sm:$0xff]  ;;  %v205_v32 = vld [vmem:[%s4127_s3 + $0x190] sm:$0xff] }
  0x5e   : > { %2736 = vst [vmem:[%s4144_s16 + $0xa8] sm:$0xff] %v3358_v50  ;;  %v3359_v52 = vsel %vm1201_vm2, 1.0, %v4011_v7  ;;  %vm1202_vm5 = vmxor %vm690_vm15, %vm4010_vm3  ;;  %vm699_vm2 = vcmp.lt.f32.partialorder %v187_v59, 0.5  ;;  %v206_v34 = vld [vmem:[%s4127_s3 + $0x198] sm:$0xff]  ;;  %v207_v36 = vld [vmem:[%s4127_s3 + $0x1a0] sm:$0xff] }
  0x5f   : > { %2737 = vst [vmem:[%s4144_s16 + $0xb0] sm:$0xff] %v3359_v52  ;;  %v3360_v54 = vsel %vm1202_vm5, 1.0, %v4011_v7  ;;  %vm1203_vm7 = vmxor %vm691_vm1, %vm4010_vm3  ;;  %vm700_vm5 = vcmp.lt.f32.partialorder %v188_v61, 0.5  ;;  %v208_v38 = vld [vmem:[%s4127_s3 + $0x1a8] sm:$0xff]  ;;  %v209_v40 = vld [vmem:[%s4127_s3 + $0x1b0] sm:$0xff] }
  0x60   : > { %2738 = vst [vmem:[%s4144_s16 + $0xb8] sm:$0xff] %v3360_v54  ;;  %v3361_v56 = vsel %vm1203_vm7, 1.0, %v4011_v7  ;;  %vm1204_vm9 = vmxor %vm692_vm4, %vm4010_vm3  ;;  %vm701_vm7 = vcmp.lt.f32.partialorder %v189_v63, 0.5  ;;  %v210_v42 = vld [vmem:[%s4127_s3 + $0x1b8] sm:$0xff]  ;;  %v211_v44 = vld [vmem:[%s4127_s3 + $0x1c0] sm:$0xff] }
  0x61   : > { %2739 = vst [vmem:[%s4144_s16 + $0xc0] sm:$0xff] %v3361_v56  ;;  %v3362_v58 = vsel %vm1204_vm9, 1.0, %v4011_v7  ;;  %vm1205_vm11 = vmxor %vm693_vm6, %vm4010_vm3  ;;  %vm702_vm9 = vcmp.lt.f32.partialorder %v190_v1, 0.5  ;;  %v212_v46 = vld [vmem:[%s4127_s3 + $0x1c8] sm:$0xff]  ;;  %v213_v48 = vld [vmem:[%s4127_s3 + $0x1d0] sm:$0xff] }
  0x62   : > { %2740 = vst [vmem:[%s4144_s16 + $0xc8] sm:$0xff] %v3362_v58  ;;  %v3363_v60 = vsel %vm1205_vm11, 1.0, %v4011_v7  ;;  %vm1206_vm13 = vmxor %vm694_vm8, %vm4010_vm3  ;;  %vm703_vm11 = vcmp.lt.f32.partialorder %v191_v3, 0.5  ;;  %v214_v50 = vld [vmem:[%s4127_s3 + $0x1d8] sm:$0xff]  ;;  %v215_v52 = vld [vmem:[%s4127_s3 + $0x1e0] sm:$0xff] }
  0x63   : > { %2741 = vst [vmem:[%s4144_s16 + $0xd0] sm:$0xff] %v3363_v60  ;;  %v3364_v62 = vsel %vm1206_vm13, 1.0, %v4011_v7  ;;  %vm1207_vm15 = vmxor %vm695_vm10, %vm4010_vm3  ;;  %vm704_vm13 = vcmp.lt.f32.partialorder %v192_v5, 0.5  ;;  %v216_v54 = vld [vmem:[%s4127_s3 + $0x1e8] sm:$0xff]  ;;  %v217_v56 = vld [vmem:[%s4127_s3 + $0x1f0] sm:$0xff] }
  0x64   : > { %2742 = vst [vmem:[%s4144_s16 + $0xd8] sm:$0xff] %v3364_v62  ;;  %v3365_v0 = vsel %vm1207_vm15, 1.0, %v4011_v7  ;;  %vm1208_vm1 = vmxor %vm696_vm12, %vm4010_vm3  ;;  %vm705_vm15 = vcmp.lt.f32.partialorder %v193_v8, 0.5  ;;  %v218_v58 = vld [vmem:[%s4127_s3 + $0x1f8] sm:$0xff]  ;;  %v219_v60 = vld [vmem:[%s4127_s3 + $0x200] sm:$0xff] }
  0x65   : > { %2743 = vst [vmem:[%s4144_s16 + $0xe0] sm:$0xff] %v3365_v0  ;;  %v3366_v2 = vsel %vm1208_vm1, 1.0, %v4011_v7  ;;  %vm1209_vm4 = vmxor %vm697_vm14, %vm4010_vm3  ;;  %vm706_vm1 = vcmp.lt.f32.partialorder %v194_v10, 0.5  ;;  %v220_v62 = vld [vmem:[%s4127_s3 + $0x208] sm:$0xff]  ;;  %v221_v0 = vld [vmem:[%s4127_s3 + $0x210] sm:$0xff] }
  0x66   : > { %2744 = vst [vmem:[%s4144_s16 + $0xe8] sm:$0xff] %v3366_v2  ;;  %v3367_v4 = vsel %vm1209_vm4, 1.0, %v4011_v7  ;;  %vm1210_vm6 = vmxor %vm698_vm0, %vm4010_vm3  ;;  %vm707_vm4 = vcmp.lt.f32.partialorder %v195_v12, 0.5  ;;  %v222_v2 = vld [vmem:[%s4127_s3 + $0x218] sm:$0xff] }
  0x67   : > { %2745 = vst [vmem:[%s4144_s16 + $0xf0] sm:$0xff] %v3367_v4  ;;  %v3368_v6 = vsel %vm1210_vm6, 1.0, %v4011_v7  ;;  %vm1211_vm8 = vmxor %vm699_vm2, %vm4010_vm3  ;;  %vm708_vm6 = vcmp.lt.f32.partialorder %v196_v14, 0.5  ;;  %v223_v4 = vld [vmem:[%s4127_s3 + $0x220] sm:$0xff] }
  0x68   : > { %2746 = vst [vmem:[%s4144_s16 + $0xf8] sm:$0xff] %v3368_v6  ;;  %v3369_v9 = vsel %vm1211_vm8, 1.0, %v4011_v7  ;;  %vm1212_vm10 = vmxor %vm700_vm5, %vm4010_vm3  ;;  %vm709_vm8 = vcmp.lt.f32.partialorder %v197_v16, 0.5  ;;  %v224_v6 = vld [vmem:[%s4127_s3 + $0x228] sm:$0xff] }
  0x69   : > { %2747 = vst [vmem:[%s4144_s16 + $0x100] sm:$0xff] %v3369_v9  ;;  %v3370_v11 = vsel %vm1212_vm10, 1.0, %v4011_v7  ;;  %vm1213_vm12 = vmxor %vm701_vm7, %vm4010_vm3  ;;  %vm710_vm10 = vcmp.lt.f32.partialorder %v198_v18, 0.5  ;;  %v225_v9 = vld [vmem:[%s4127_s3 + $0x230] sm:$0xff] }
  0x6a   : > { %2748 = vst [vmem:[%s4144_s16 + $0x108] sm:$0xff] %v3370_v11  ;;  %v3371_v13 = vsel %vm1213_vm12, 1.0, %v4011_v7  ;;  %vm1214_vm14 = vmxor %vm702_vm9, %vm4010_vm3  ;;  %vm711_vm12 = vcmp.lt.f32.partialorder %v199_v20, 0.5  ;;  %v226_v11 = vld [vmem:[%s4127_s3 + $0x238] sm:$0xff] }
  0x6b   : > { %2749 = vst [vmem:[%s4144_s16 + $0x110] sm:$0xff] %v3371_v13  ;;  %v3372_v15 = vsel %vm1214_vm14, 1.0, %v4011_v7  ;;  %vm1215_vm0 = vmxor %vm703_vm11, %vm4010_vm3  ;;  %vm712_vm14 = vcmp.lt.f32.partialorder %v200_v22, 0.5  ;;  %v227_v13 = vld [vmem:[%s4127_s3 + $0x240] sm:$0xff] }
  0x6c   : > { %2750 = vst [vmem:[%s4144_s16 + $0x118] sm:$0xff] %v3372_v15  ;;  %v3373_v17 = vsel %vm1215_vm0, 1.0, %v4011_v7  ;;  %vm1216_vm2 = vmxor %vm704_vm13, %vm4010_vm3  ;;  %vm713_vm0 = vcmp.lt.f32.partialorder %v201_v24, 0.5  ;;  %v228_v15 = vld [vmem:[%s4127_s3 + $0x248] sm:$0xff] }
  0x6d   : > { %2751 = vst [vmem:[%s4144_s16 + $0x120] sm:$0xff] %v3373_v17  ;;  %v3374_v19 = vsel %vm1216_vm2, 1.0, %v4011_v7  ;;  %vm1217_vm5 = vmxor %vm705_vm15, %vm4010_vm3  ;;  %vm714_vm2 = vcmp.lt.f32.partialorder %v202_v26, 0.5  ;;  %v229_v17 = vld [vmem:[%s4127_s3 + $0x250] sm:$0xff] }
  0x6e   : > { %2752 = vst [vmem:[%s4144_s16 + $0x128] sm:$0xff] %v3374_v19  ;;  %v3375_v21 = vsel %vm1217_vm5, 1.0, %v4011_v7  ;;  %vm1218_vm7 = vmxor %vm706_vm1, %vm4010_vm3  ;;  %vm715_vm5 = vcmp.lt.f32.partialorder %v203_v28, 0.5  ;;  %v230_v19 = vld [vmem:[%s4127_s3 + $0x258] sm:$0xff] }
  0x6f   : > { %2753 = vst [vmem:[%s4144_s16 + $0x130] sm:$0xff] %v3375_v21  ;;  %v3376_v23 = vsel %vm1218_vm7, 1.0, %v4011_v7  ;;  %vm1219_vm9 = vmxor %vm707_vm4, %vm4010_vm3  ;;  %vm716_vm7 = vcmp.lt.f32.partialorder %v204_v30, 0.5  ;;  %v231_v21 = vld [vmem:[%s4127_s3 + $0x260] sm:$0xff] }
  0x70   : > { %2754 = vst [vmem:[%s4144_s16 + $0x138] sm:$0xff] %v3376_v23  ;;  %v3377_v25 = vsel %vm1219_vm9, 1.0, %v4011_v7  ;;  %vm1220_vm11 = vmxor %vm708_vm6, %vm4010_vm3  ;;  %vm717_vm9 = vcmp.lt.f32.partialorder %v205_v32, 0.5  ;;  %v232_v23 = vld [vmem:[%s4127_s3 + $0x268] sm:$0xff] }
  0x71   : > { %2755 = vst [vmem:[%s4144_s16 + $0x140] sm:$0xff] %v3377_v25  ;;  %v3378_v27 = vsel %vm1220_vm11, 1.0, %v4011_v7  ;;  %vm1221_vm13 = vmxor %vm709_vm8, %vm4010_vm3  ;;  %vm718_vm11 = vcmp.lt.f32.partialorder %v206_v34, 0.5  ;;  %v233_v25 = vld [vmem:[%s4127_s3 + $0x270] sm:$0xff] }
  0x72   : > { %2756 = vst [vmem:[%s4144_s16 + $0x148] sm:$0xff] %v3378_v27  ;;  %v3379_v29 = vsel %vm1221_vm13, 1.0, %v4011_v7  ;;  %vm1222_vm15 = vmxor %vm710_vm10, %vm4010_vm3  ;;  %vm719_vm13 = vcmp.lt.f32.partialorder %v207_v36, 0.5  ;;  %v234_v27 = vld [vmem:[%s4127_s3 + $0x278] sm:$0xff] }
  0x73   : > { %2757 = vst [vmem:[%s4144_s16 + $0x150] sm:$0xff] %v3379_v29  ;;  %v3380_v31 = vsel %vm1222_vm15, 1.0, %v4011_v7  ;;  %vm1223_vm1 = vmxor %vm711_vm12, %vm4010_vm3  ;;  %vm720_vm15 = vcmp.lt.f32.partialorder %v208_v38, 0.5  ;;  %v235_v29 = vld [vmem:[%s4127_s3 + $0x280] sm:$0xff] }
  0x74   : > { %2758 = vst [vmem:[%s4144_s16 + $0x158] sm:$0xff] %v3380_v31  ;;  %v3381_v33 = vsel %vm1223_vm1, 1.0, %v4011_v7  ;;  %vm1224_vm4 = vmxor %vm712_vm14, %vm4010_vm3  ;;  %vm721_vm1 = vcmp.lt.f32.partialorder %v209_v40, 0.5  ;;  %v236_v31 = vld [vmem:[%s4127_s3 + $0x288] sm:$0xff] }
  0x75   : > { %2759 = vst [vmem:[%s4144_s16 + $0x160] sm:$0xff] %v3381_v33  ;;  %v3382_v35 = vsel %vm1224_vm4, 1.0, %v4011_v7  ;;  %vm1225_vm6 = vmxor %vm713_vm0, %vm4010_vm3  ;;  %vm722_vm4 = vcmp.lt.f32.partialorder %v210_v42, 0.5  ;;  %v237_v33 = vld [vmem:[%s4127_s3 + $0x290] sm:$0xff] }
  0x76   : > { %2760 = vst [vmem:[%s4144_s16 + $0x168] sm:$0xff] %v3382_v35  ;;  %v3383_v37 = vsel %vm1225_vm6, 1.0, %v4011_v7  ;;  %vm1226_vm8 = vmxor %vm714_vm2, %vm4010_vm3  ;;  %vm723_vm6 = vcmp.lt.f32.partialorder %v211_v44, 0.5  ;;  %v238_v35 = vld [vmem:[%s4127_s3 + $0x298] sm:$0xff] }
  0x77   : > { %2761 = vst [vmem:[%s4144_s16 + $0x170] sm:$0xff] %v3383_v37  ;;  %v3384_v39 = vsel %vm1226_vm8, 1.0, %v4011_v7  ;;  %vm1227_vm10 = vmxor %vm715_vm5, %vm4010_vm3  ;;  %vm724_vm8 = vcmp.lt.f32.partialorder %v212_v46, 0.5  ;;  %v239_v37 = vld [vmem:[%s4127_s3 + $0x2a0] sm:$0xff] }
  0x78   : > { %2762 = vst [vmem:[%s4144_s16 + $0x178] sm:$0xff] %v3384_v39  ;;  %v3385_v41 = vsel %vm1227_vm10, 1.0, %v4011_v7  ;;  %vm1228_vm12 = vmxor %vm716_vm7, %vm4010_vm3  ;;  %vm725_vm10 = vcmp.lt.f32.partialorder %v213_v48, 0.5  ;;  %v240_v39 = vld [vmem:[%s4127_s3 + $0x2a8] sm:$0xff] }
  0x79   : > { %2763 = vst [vmem:[%s4144_s16 + $0x180] sm:$0xff] %v3385_v41  ;;  %v3386_v43 = vsel %vm1228_vm12, 1.0, %v4011_v7  ;;  %vm1229_vm14 = vmxor %vm717_vm9, %vm4010_vm3  ;;  %vm726_vm12 = vcmp.lt.f32.partialorder %v214_v50, 0.5  ;;  %v241_v41 = vld [vmem:[%s4127_s3 + $0x2b0] sm:$0xff] }
  0x7a   : > { %2764 = vst [vmem:[%s4144_s16 + $0x188] sm:$0xff] %v3386_v43  ;;  %v3387_v45 = vsel %vm1229_vm14, 1.0, %v4011_v7  ;;  %vm1230_vm0 = vmxor %vm718_vm11, %vm4010_vm3  ;;  %vm727_vm14 = vcmp.lt.f32.partialorder %v215_v52, 0.5  ;;  %v242_v43 = vld [vmem:[%s4127_s3 + $0x2b8] sm:$0xff] }
  0x7b   : > { %2765 = vst [vmem:[%s4144_s16 + $0x190] sm:$0xff] %v3387_v45  ;;  %v3388_v47 = vsel %vm1230_vm0, 1.0, %v4011_v7  ;;  %vm1231_vm2 = vmxor %vm719_vm13, %vm4010_vm3  ;;  %vm728_vm0 = vcmp.lt.f32.partialorder %v216_v54, 0.5  ;;  %v243_v45 = vld [vmem:[%s4127_s3 + $0x2c0] sm:$0xff] }
  0x7c   : > { %2766 = vst [vmem:[%s4144_s16 + $0x198] sm:$0xff] %v3388_v47  ;;  %v3389_v49 = vsel %vm1231_vm2, 1.0, %v4011_v7  ;;  %vm1232_vm5 = vmxor %vm720_vm15, %vm4010_vm3  ;;  %vm729_vm2 = vcmp.lt.f32.partialorder %v217_v56, 0.5  ;;  %v244_v47 = vld [vmem:[%s4127_s3 + $0x2c8] sm:$0xff] }
  0x7d   : > { %2767 = vst [vmem:[%s4144_s16 + $0x1a0] sm:$0xff] %v3389_v49  ;;  %v3390_v51 = vsel %vm1232_vm5, 1.0, %v4011_v7  ;;  %vm1233_vm7 = vmxor %vm721_vm1, %vm4010_vm3  ;;  %vm730_vm5 = vcmp.lt.f32.partialorder %v218_v58, 0.5  ;;  %v245_v49 = vld [vmem:[%s4127_s3 + $0x2d0] sm:$0xff] }
  0x7e   : > { %2768 = vst [vmem:[%s4144_s16 + $0x1a8] sm:$0xff] %v3390_v51  ;;  %v3391_v53 = vsel %vm1233_vm7, 1.0, %v4011_v7  ;;  %vm1234_vm9 = vmxor %vm722_vm4, %vm4010_vm3  ;;  %vm731_vm7 = vcmp.lt.f32.partialorder %v219_v60, 0.5  ;;  %v246_v51 = vld [vmem:[%s4127_s3 + $0x2d8] sm:$0xff] }
  0x7f   : > { %2769 = vst [vmem:[%s4144_s16 + $0x1b0] sm:$0xff] %v3391_v53  ;;  %v3392_v55 = vsel %vm1234_vm9, 1.0, %v4011_v7  ;;  %vm1235_vm11 = vmxor %vm723_vm6, %vm4010_vm3  ;;  %vm732_vm9 = vcmp.lt.f32.partialorder %v220_v62, 0.5  ;;  %v247_v53 = vld [vmem:[%s4127_s3 + $0x2e0] sm:$0xff] }
  0x80   : > { %2770 = vst [vmem:[%s4144_s16 + $0x1b8] sm:$0xff] %v3392_v55  ;;  %v3393_v57 = vsel %vm1235_vm11, 1.0, %v4011_v7  ;;  %vm1236_vm13 = vmxor %vm724_vm8, %vm4010_vm3  ;;  %vm733_vm11 = vcmp.lt.f32.partialorder %v221_v0, 0.5  ;;  %v248_v55 = vld [vmem:[%s4127_s3 + $0x2e8] sm:$0xff] }
  0x81   : > { %2771 = vst [vmem:[%s4144_s16 + $0x1c0] sm:$0xff] %v3393_v57  ;;  %v3394_v59 = vsel %vm1236_vm13, 1.0, %v4011_v7  ;;  %vm1237_vm15 = vmxor %vm725_vm10, %vm4010_vm3  ;;  %vm734_vm13 = vcmp.lt.f32.partialorder %v222_v2, 0.5  ;;  %v249_v57 = vld [vmem:[%s4127_s3 + $0x2f0] sm:$0xff] }
  0x82   : > { %2772 = vst [vmem:[%s4144_s16 + $0x1c8] sm:$0xff] %v3394_v59  ;;  %v3395_v61 = vsel %vm1237_vm15, 1.0, %v4011_v7  ;;  %vm1238_vm1 = vmxor %vm726_vm12, %vm4010_vm3  ;;  %vm735_vm15 = vcmp.lt.f32.partialorder %v223_v4, 0.5  ;;  %v250_v59 = vld [vmem:[%s4127_s3 + $0x2f8] sm:$0xff] }
  0x83   : > { %2773 = vst [vmem:[%s4144_s16 + $0x1d0] sm:$0xff] %v3395_v61  ;;  %v3396_v63 = vsel %vm1238_vm1, 1.0, %v4011_v7  ;;  %vm1239_vm4 = vmxor %vm727_vm14, %vm4010_vm3  ;;  %vm736_vm1 = vcmp.lt.f32.partialorder %v224_v6, 0.5  ;;  %v251_v61 = vld [vmem:[%s4127_s3 + $0x300] sm:$0xff] }
  0x84   : > { %2774 = vst [vmem:[%s4144_s16 + $0x1d8] sm:$0xff] %v3396_v63  ;;  %v3397_v1 = vsel %vm1239_vm4, 1.0, %v4011_v7  ;;  %vm1240_vm6 = vmxor %vm728_vm0, %vm4010_vm3  ;;  %vm737_vm4 = vcmp.lt.f32.partialorder %v225_v9, 0.5  ;;  %v252_v63 = vld [vmem:[%s4127_s3 + $0x308] sm:$0xff] }
  0x85   : > { %2775 = vst [vmem:[%s4144_s16 + $0x1e0] sm:$0xff] %v3397_v1  ;;  %v3398_v3 = vsel %vm1240_vm6, 1.0, %v4011_v7  ;;  %vm1241_vm8 = vmxor %vm729_vm2, %vm4010_vm3  ;;  %vm738_vm6 = vcmp.lt.f32.partialorder %v226_v11, 0.5  ;;  %v253_v1 = vld [vmem:[%s4127_s3 + $0x310] sm:$0xff] }
  0x86   : > { %2776 = vst [vmem:[%s4144_s16 + $0x1e8] sm:$0xff] %v3398_v3  ;;  %v3399_v5 = vsel %vm1241_vm8, 1.0, %v4011_v7  ;;  %vm1242_vm10 = vmxor %vm730_vm5, %vm4010_vm3  ;;  %vm739_vm8 = vcmp.lt.f32.partialorder %v227_v13, 0.5  ;;  %v254_v3 = vld [vmem:[%s4127_s3 + $0x318] sm:$0xff] }
  0x87   : > { %2777 = vst [vmem:[%s4144_s16 + $0x1f0] sm:$0xff] %v3399_v5  ;;  %v3400_v8 = vsel %vm1242_vm10, 1.0, %v4011_v7  ;;  %vm1243_vm12 = vmxor %vm731_vm7, %vm4010_vm3  ;;  %vm740_vm10 = vcmp.lt.f32.partialorder %v228_v15, 0.5  ;;  %v255_v5 = vld [vmem:[%s4127_s3 + $0x320] sm:$0xff] }
  0x88   : > { %2778 = vst [vmem:[%s4144_s16 + $0x1f8] sm:$0xff] %v3400_v8  ;;  %v3401_v10 = vsel %vm1243_vm12, 1.0, %v4011_v7  ;;  %vm1244_vm14 = vmxor %vm732_vm9, %vm4010_vm3  ;;  %vm741_vm12 = vcmp.lt.f32.partialorder %v229_v17, 0.5  ;;  %v256_v8 = vld [vmem:[%s4127_s3 + $0x328] sm:$0xff] }
  0x89   : > { %2779 = vst [vmem:[%s4144_s16 + $0x200] sm:$0xff] %v3401_v10  ;;  %v3402_v12 = vsel %vm1244_vm14, 1.0, %v4011_v7  ;;  %vm1245_vm0 = vmxor %vm733_vm11, %vm4010_vm3  ;;  %vm742_vm14 = vcmp.lt.f32.partialorder %v230_v19, 0.5  ;;  %v257_v10 = vld [vmem:[%s4127_s3 + $0x330] sm:$0xff] }
  0x8a   : > { %2780 = vst [vmem:[%s4144_s16 + $0x208] sm:$0xff] %v3402_v12  ;;  %v3403_v14 = vsel %vm1245_vm0, 1.0, %v4011_v7  ;;  %vm1246_vm2 = vmxor %vm734_vm13, %vm4010_vm3  ;;  %vm743_vm0 = vcmp.lt.f32.partialorder %v231_v21, 0.5  ;;  %v258_v12 = vld [vmem:[%s4127_s3 + $0x338] sm:$0xff] }
  0x8b   : > { %2781 = vst [vmem:[%s4144_s16 + $0x210] sm:$0xff] %v3403_v14  ;;  %v3404_v16 = vsel %vm1246_vm2, 1.0, %v4011_v7  ;;  %vm1247_vm5 = vmxor %vm735_vm15, %vm4010_vm3  ;;  %vm744_vm2 = vcmp.lt.f32.partialorder %v232_v23, 0.5  ;;  %v259_v14 = vld [vmem:[%s4127_s3 + $0x340] sm:$0xff] }
  0x8c   : > { %2782 = vst [vmem:[%s4144_s16 + $0x218] sm:$0xff] %v3404_v16  ;;  %v3405_v18 = vsel %vm1247_vm5, 1.0, %v4011_v7  ;;  %vm1248_vm7 = vmxor %vm736_vm1, %vm4010_vm3  ;;  %vm745_vm5 = vcmp.lt.f32.partialorder %v233_v25, 0.5  ;;  %v260_v16 = vld [vmem:[%s4127_s3 + $0x348] sm:$0xff] }
  0x8d   : > { %2783 = vst [vmem:[%s4144_s16 + $0x220] sm:$0xff] %v3405_v18  ;;  %v3406_v20 = vsel %vm1248_vm7, 1.0, %v4011_v7  ;;  %vm1249_vm9 = vmxor %vm737_vm4, %vm4010_vm3  ;;  %vm746_vm7 = vcmp.lt.f32.partialorder %v234_v27, 0.5  ;;  %v261_v18 = vld [vmem:[%s4127_s3 + $0x350] sm:$0xff] }
  0x8e   : > { %2784 = vst [vmem:[%s4144_s16 + $0x228] sm:$0xff] %v3406_v20  ;;  %v3407_v22 = vsel %vm1249_vm9, 1.0, %v4011_v7  ;;  %vm1250_vm11 = vmxor %vm738_vm6, %vm4010_vm3  ;;  %vm747_vm9 = vcmp.lt.f32.partialorder %v235_v29, 0.5  ;;  %v262_v20 = vld [vmem:[%s4127_s3 + $0x358] sm:$0xff] }
  0x8f   : > { %2785 = vst [vmem:[%s4144_s16 + $0x230] sm:$0xff] %v3407_v22  ;;  %v3408_v24 = vsel %vm1250_vm11, 1.0, %v4011_v7  ;;  %vm1251_vm13 = vmxor %vm739_vm8, %vm4010_vm3  ;;  %vm748_vm11 = vcmp.lt.f32.partialorder %v236_v31, 0.5  ;;  %v263_v22 = vld [vmem:[%s4127_s3 + $0x360] sm:$0xff] }
  0x90   : > { %2786 = vst [vmem:[%s4144_s16 + $0x238] sm:$0xff] %v3408_v24  ;;  %v3409_v26 = vsel %vm1251_vm13, 1.0, %v4011_v7  ;;  %vm1252_vm15 = vmxor %vm740_vm10, %vm4010_vm3  ;;  %vm749_vm13 = vcmp.lt.f32.partialorder %v237_v33, 0.5  ;;  %v264_v24 = vld [vmem:[%s4127_s3 + $0x368] sm:$0xff] }
  0x91   : > { %2787 = vst [vmem:[%s4144_s16 + $0x240] sm:$0xff] %v3409_v26  ;;  %v3410_v28 = vsel %vm1252_vm15, 1.0, %v4011_v7  ;;  %vm1253_vm1 = vmxor %vm741_vm12, %vm4010_vm3  ;;  %vm750_vm15 = vcmp.lt.f32.partialorder %v238_v35, 0.5  ;;  %v265_v26 = vld [vmem:[%s4127_s3 + $0x370] sm:$0xff] }
  0x92   : > { %2788 = vst [vmem:[%s4144_s16 + $0x248] sm:$0xff] %v3410_v28  ;;  %v3411_v30 = vsel %vm1253_vm1, 1.0, %v4011_v7  ;;  %vm1254_vm4 = vmxor %vm742_vm14, %vm4010_vm3  ;;  %vm751_vm1 = vcmp.lt.f32.partialorder %v239_v37, 0.5  ;;  %v266_v28 = vld [vmem:[%s4127_s3 + $0x378] sm:$0xff] }
  0x93   : > { %2789 = vst [vmem:[%s4144_s16 + $0x250] sm:$0xff] %v3411_v30  ;;  %v3412_v32 = vsel %vm1254_vm4, 1.0, %v4011_v7  ;;  %vm1255_vm6 = vmxor %vm743_vm0, %vm4010_vm3  ;;  %vm752_vm4 = vcmp.lt.f32.partialorder %v240_v39, 0.5  ;;  %v267_v30 = vld [vmem:[%s4127_s3 + $0x380] sm:$0xff] }
  0x94   : > { %2790 = vst [vmem:[%s4144_s16 + $0x258] sm:$0xff] %v3412_v32  ;;  %v3413_v34 = vsel %vm1255_vm6, 1.0, %v4011_v7  ;;  %vm1256_vm8 = vmxor %vm744_vm2, %vm4010_vm3  ;;  %vm753_vm6 = vcmp.lt.f32.partialorder %v241_v41, 0.5  ;;  %v268_v32 = vld [vmem:[%s4127_s3 + $0x388] sm:$0xff] }
  0x95   : > { %2791 = vst [vmem:[%s4144_s16 + $0x260] sm:$0xff] %v3413_v34  ;;  %v3414_v36 = vsel %vm1256_vm8, 1.0, %v4011_v7  ;;  %vm1257_vm10 = vmxor %vm745_vm5, %vm4010_vm3  ;;  %vm754_vm8 = vcmp.lt.f32.partialorder %v242_v43, 0.5  ;;  %v269_v34 = vld [vmem:[%s4127_s3 + $0x390] sm:$0xff] }
  0x96   : > { %2792 = vst [vmem:[%s4144_s16 + $0x268] sm:$0xff] %v3414_v36  ;;  %v3415_v38 = vsel %vm1257_vm10, 1.0, %v4011_v7  ;;  %vm1258_vm12 = vmxor %vm746_vm7, %vm4010_vm3  ;;  %vm755_vm10 = vcmp.lt.f32.partialorder %v243_v45, 0.5  ;;  %v270_v36 = vld [vmem:[%s4127_s3 + $0x398] sm:$0xff] }
  0x97   : > { %2793 = vst [vmem:[%s4144_s16 + $0x270] sm:$0xff] %v3415_v38  ;;  %v3416_v40 = vsel %vm1258_vm12, 1.0, %v4011_v7  ;;  %vm1259_vm14 = vmxor %vm747_vm9, %vm4010_vm3  ;;  %vm756_vm12 = vcmp.lt.f32.partialorder %v244_v47, 0.5  ;;  %v271_v38 = vld [vmem:[%s4127_s3 + $0x3a0] sm:$0xff] }
  0x98   : > { %2794 = vst [vmem:[%s4144_s16 + $0x278] sm:$0xff] %v3416_v40  ;;  %v3417_v42 = vsel %vm1259_vm14, 1.0, %v4011_v7  ;;  %vm1260_vm0 = vmxor %vm748_vm11, %vm4010_vm3  ;;  %vm757_vm14 = vcmp.lt.f32.partialorder %v245_v49, 0.5  ;;  %v272_v40 = vld [vmem:[%s4127_s3 + $0x3a8] sm:$0xff] }
  0x99   : > { %2795 = vst [vmem:[%s4144_s16 + $0x280] sm:$0xff] %v3417_v42  ;;  %v3418_v44 = vsel %vm1260_vm0, 1.0, %v4011_v7  ;;  %vm1261_vm2 = vmxor %vm749_vm13, %vm4010_vm3  ;;  %vm758_vm0 = vcmp.lt.f32.partialorder %v246_v51, 0.5  ;;  %v273_v42 = vld [vmem:[%s4127_s3 + $0x3b0] sm:$0xff] }
  0x9a   : > { %2796 = vst [vmem:[%s4144_s16 + $0x288] sm:$0xff] %v3418_v44  ;;  %v3419_v46 = vsel %vm1261_vm2, 1.0, %v4011_v7  ;;  %vm1262_vm5 = vmxor %vm750_vm15, %vm4010_vm3  ;;  %vm759_vm2 = vcmp.lt.f32.partialorder %v247_v53, 0.5  ;;  %v274_v44 = vld [vmem:[%s4127_s3 + $0x3b8] sm:$0xff] }
  0x9b   : > { %2797 = vst [vmem:[%s4144_s16 + $0x290] sm:$0xff] %v3419_v46  ;;  %v3420_v48 = vsel %vm1262_vm5, 1.0, %v4011_v7  ;;  %vm1263_vm7 = vmxor %vm751_vm1, %vm4010_vm3  ;;  %vm760_vm5 = vcmp.lt.f32.partialorder %v248_v55, 0.5  ;;  %v275_v46 = vld [vmem:[%s4127_s3 + $0x3c0] sm:$0xff] }
  0x9c   : > { %2798 = vst [vmem:[%s4144_s16 + $0x298] sm:$0xff] %v3420_v48  ;;  %v3421_v50 = vsel %vm1263_vm7, 1.0, %v4011_v7  ;;  %vm1264_vm9 = vmxor %vm752_vm4, %vm4010_vm3  ;;  %vm761_vm7 = vcmp.lt.f32.partialorder %v249_v57, 0.5  ;;  %v276_v48 = vld [vmem:[%s4127_s3 + $0x3c8] sm:$0xff] }
  0x9d   : > { %2799 = vst [vmem:[%s4144_s16 + $0x2a0] sm:$0xff] %v3421_v50  ;;  %v3422_v52 = vsel %vm1264_vm9, 1.0, %v4011_v7  ;;  %vm1265_vm11 = vmxor %vm753_vm6, %vm4010_vm3  ;;  %vm762_vm9 = vcmp.lt.f32.partialorder %v250_v59, 0.5  ;;  %v277_v50 = vld [vmem:[%s4127_s3 + $0x3d0] sm:$0xff] }
  0x9e   : > { %2800 = vst [vmem:[%s4144_s16 + $0x2a8] sm:$0xff] %v3422_v52  ;;  %v3423_v54 = vsel %vm1265_vm11, 1.0, %v4011_v7  ;;  %vm1266_vm13 = vmxor %vm754_vm8, %vm4010_vm3  ;;  %vm763_vm11 = vcmp.lt.f32.partialorder %v251_v61, 0.5  ;;  %v278_v52 = vld [vmem:[%s4127_s3 + $0x3d8] sm:$0xff] }
  0x9f   : > { %2801 = vst [vmem:[%s4144_s16 + $0x2b0] sm:$0xff] %v3423_v54  ;;  %v3424_v56 = vsel %vm1266_vm13, 1.0, %v4011_v7  ;;  %vm1267_vm15 = vmxor %vm755_vm10, %vm4010_vm3  ;;  %vm764_vm13 = vcmp.lt.f32.partialorder %v252_v63, 0.5  ;;  %v279_v54 = vld [vmem:[%s4127_s3 + $0x3e0] sm:$0xff] }
  0xa0   : > { %2802 = vst [vmem:[%s4144_s16 + $0x2b8] sm:$0xff] %v3424_v56  ;;  %v3425_v58 = vsel %vm1267_vm15, 1.0, %v4011_v7  ;;  %vm1268_vm1 = vmxor %vm756_vm12, %vm4010_vm3  ;;  %vm765_vm15 = vcmp.lt.f32.partialorder %v253_v1, 0.5  ;;  %v280_v56 = vld [vmem:[%s4127_s3 + $0x3e8] sm:$0xff] }
  0xa1   : > { %2803 = vst [vmem:[%s4144_s16 + $0x2c0] sm:$0xff] %v3425_v58  ;;  %v3426_v60 = vsel %vm1268_vm1, 1.0, %v4011_v7  ;;  %vm1269_vm4 = vmxor %vm757_vm14, %vm4010_vm3  ;;  %vm766_vm1 = vcmp.lt.f32.partialorder %v254_v3, 0.5  ;;  %v281_v58 = vld [vmem:[%s4127_s3 + $0x3f0] sm:$0xff] }
  0xa2   : > { %2804 = vst [vmem:[%s4144_s16 + $0x2c8] sm:$0xff] %v3426_v60  ;;  %v3427_v62 = vsel %vm1269_vm4, 1.0, %v4011_v7  ;;  %vm1270_vm6 = vmxor %vm758_vm0, %vm4010_vm3  ;;  %vm767_vm4 = vcmp.lt.f32.partialorder %v255_v5, 0.5  ;;  %v282_v60 = vld [vmem:[%s4127_s3 + $0x3f8] sm:$0xff] }
  0xa3   : > { %2805 = vst [vmem:[%s4144_s16 + $0x2d0] sm:$0xff] %v3427_v62  ;;  %v3428_v0 = vsel %vm1270_vm6, 1.0, %v4011_v7  ;;  %vm1271_vm8 = vmxor %vm759_vm2, %vm4010_vm3  ;;  %vm768_vm6 = vcmp.lt.f32.partialorder %v256_v8, 0.5  ;;  %v283_v62 = vld [vmem:[%s4127_s3 + $0x400] sm:$0xff] }
  0xa4   : > { %2806 = vst [vmem:[%s4144_s16 + $0x2d8] sm:$0xff] %v3428_v0  ;;  %v3429_v2 = vsel %vm1271_vm8, 1.0, %v4011_v7  ;;  %vm1272_vm10 = vmxor %vm760_vm5, %vm4010_vm3  ;;  %vm769_vm8 = vcmp.lt.f32.partialorder %v257_v10, 0.5  ;;  %v284_v0 = vld [vmem:[%s4127_s3 + $0x408] sm:$0xff] }
  0xa5   : > { %2807 = vst [vmem:[%s4144_s16 + $0x2e0] sm:$0xff] %v3429_v2  ;;  %v3430_v4 = vsel %vm1272_vm10, 1.0, %v4011_v7  ;;  %vm1273_vm12 = vmxor %vm761_vm7, %vm4010_vm3  ;;  %vm770_vm10 = vcmp.lt.f32.partialorder %v258_v12, 0.5  ;;  %v285_v2 = vld [vmem:[%s4127_s3 + $0x410] sm:$0xff] }
  0xa6   : > { %2808 = vst [vmem:[%s4144_s16 + $0x2e8] sm:$0xff] %v3430_v4  ;;  %v3431_v6 = vsel %vm1273_vm12, 1.0, %v4011_v7  ;;  %vm1274_vm14 = vmxor %vm762_vm9, %vm4010_vm3  ;;  %vm771_vm12 = vcmp.lt.f32.partialorder %v259_v14, 0.5  ;;  %v286_v4 = vld [vmem:[%s4127_s3 + $0x418] sm:$0xff] }
  0xa7   : > { %2809 = vst [vmem:[%s4144_s16 + $0x2f0] sm:$0xff] %v3431_v6  ;;  %v3432_v9 = vsel %vm1274_vm14, 1.0, %v4011_v7  ;;  %vm1275_vm0 = vmxor %vm763_vm11, %vm4010_vm3  ;;  %vm772_vm14 = vcmp.lt.f32.partialorder %v260_v16, 0.5  ;;  %v287_v6 = vld [vmem:[%s4127_s3 + $0x420] sm:$0xff] }
  0xa8   : > { %2810 = vst [vmem:[%s4144_s16 + $0x2f8] sm:$0xff] %v3432_v9  ;;  %v3433_v11 = vsel %vm1275_vm0, 1.0, %v4011_v7  ;;  %vm1276_vm2 = vmxor %vm764_vm13, %vm4010_vm3  ;;  %vm773_vm0 = vcmp.lt.f32.partialorder %v261_v18, 0.5  ;;  %v288_v9 = vld [vmem:[%s4127_s3 + $0x428] sm:$0xff] }
  0xa9   : > { %2811 = vst [vmem:[%s4144_s16 + $0x300] sm:$0xff] %v3433_v11  ;;  %v3434_v13 = vsel %vm1276_vm2, 1.0, %v4011_v7  ;;  %vm1277_vm5 = vmxor %vm765_vm15, %vm4010_vm3  ;;  %vm774_vm2 = vcmp.lt.f32.partialorder %v262_v20, 0.5  ;;  %v289_v11 = vld [vmem:[%s4127_s3 + $0x430] sm:$0xff] }
  0xaa   : > { %2812 = vst [vmem:[%s4144_s16 + $0x308] sm:$0xff] %v3434_v13  ;;  %v3435_v15 = vsel %vm1277_vm5, 1.0, %v4011_v7  ;;  %vm1278_vm7 = vmxor %vm766_vm1, %vm4010_vm3  ;;  %vm775_vm5 = vcmp.lt.f32.partialorder %v263_v22, 0.5  ;;  %v290_v13 = vld [vmem:[%s4127_s3 + $0x438] sm:$0xff] }
  0xab   : > { %2813 = vst [vmem:[%s4144_s16 + $0x310] sm:$0xff] %v3435_v15  ;;  %v3436_v17 = vsel %vm1278_vm7, 1.0, %v4011_v7  ;;  %vm1279_vm9 = vmxor %vm767_vm4, %vm4010_vm3  ;;  %vm776_vm7 = vcmp.lt.f32.partialorder %v264_v24, 0.5  ;;  %v291_v15 = vld [vmem:[%s4127_s3 + $0x440] sm:$0xff] }
  0xac   : > { %2814 = vst [vmem:[%s4144_s16 + $0x318] sm:$0xff] %v3436_v17  ;;  %v3437_v19 = vsel %vm1279_vm9, 1.0, %v4011_v7  ;;  %vm1280_vm11 = vmxor %vm768_vm6, %vm4010_vm3  ;;  %vm777_vm9 = vcmp.lt.f32.partialorder %v265_v26, 0.5  ;;  %v292_v17 = vld [vmem:[%s4127_s3 + $0x448] sm:$0xff] }
  0xad   : > { %2815 = vst [vmem:[%s4144_s16 + $0x320] sm:$0xff] %v3437_v19  ;;  %v3438_v21 = vsel %vm1280_vm11, 1.0, %v4011_v7  ;;  %vm1281_vm13 = vmxor %vm769_vm8, %vm4010_vm3  ;;  %vm778_vm11 = vcmp.lt.f32.partialorder %v266_v28, 0.5  ;;  %v293_v19 = vld [vmem:[%s4127_s3 + $0x450] sm:$0xff] }
  0xae   : > { %2816 = vst [vmem:[%s4144_s16 + $0x328] sm:$0xff] %v3438_v21  ;;  %v3439_v23 = vsel %vm1281_vm13, 1.0, %v4011_v7  ;;  %vm1282_vm15 = vmxor %vm770_vm10, %vm4010_vm3  ;;  %vm779_vm13 = vcmp.lt.f32.partialorder %v267_v30, 0.5  ;;  %v294_v21 = vld [vmem:[%s4127_s3 + $0x458] sm:$0xff] }
  0xaf   : > { %2817 = vst [vmem:[%s4144_s16 + $0x330] sm:$0xff] %v3439_v23  ;;  %v3440_v25 = vsel %vm1282_vm15, 1.0, %v4011_v7  ;;  %vm1283_vm1 = vmxor %vm771_vm12, %vm4010_vm3  ;;  %vm780_vm15 = vcmp.lt.f32.partialorder %v268_v32, 0.5  ;;  %v295_v23 = vld [vmem:[%s4127_s3 + $0x460] sm:$0xff] }
  0xb0   : > { %2818 = vst [vmem:[%s4144_s16 + $0x338] sm:$0xff] %v3440_v25  ;;  %v3441_v27 = vsel %vm1283_vm1, 1.0, %v4011_v7  ;;  %vm1284_vm4 = vmxor %vm772_vm14, %vm4010_vm3  ;;  %vm781_vm1 = vcmp.lt.f32.partialorder %v269_v34, 0.5  ;;  %v296_v25 = vld [vmem:[%s4127_s3 + $0x468] sm:$0xff] }
  0xb1   : > { %2819 = vst [vmem:[%s4144_s16 + $0x340] sm:$0xff] %v3441_v27  ;;  %v3442_v29 = vsel %vm1284_vm4, 1.0, %v4011_v7  ;;  %vm1285_vm6 = vmxor %vm773_vm0, %vm4010_vm3  ;;  %vm782_vm4 = vcmp.lt.f32.partialorder %v270_v36, 0.5  ;;  %v297_v27 = vld [vmem:[%s4127_s3 + $0x470] sm:$0xff] }
  0xb2   : > { %2820 = vst [vmem:[%s4144_s16 + $0x348] sm:$0xff] %v3442_v29  ;;  %v3443_v31 = vsel %vm1285_vm6, 1.0, %v4011_v7  ;;  %vm1286_vm8 = vmxor %vm774_vm2, %vm4010_vm3  ;;  %vm783_vm6 = vcmp.lt.f32.partialorder %v271_v38, 0.5  ;;  %v298_v29 = vld [vmem:[%s4127_s3 + $0x478] sm:$0xff] }
  0xb3   : > { %2821 = vst [vmem:[%s4144_s16 + $0x350] sm:$0xff] %v3443_v31  ;;  %v3444_v33 = vsel %vm1286_vm8, 1.0, %v4011_v7  ;;  %vm1287_vm10 = vmxor %vm775_vm5, %vm4010_vm3  ;;  %vm784_vm8 = vcmp.lt.f32.partialorder %v272_v40, 0.5  ;;  %v299_v31 = vld [vmem:[%s4127_s3 + $0x480] sm:$0xff] }
  0xb4   : > { %2822 = vst [vmem:[%s4144_s16 + $0x358] sm:$0xff] %v3444_v33  ;;  %v3445_v35 = vsel %vm1287_vm10, 1.0, %v4011_v7  ;;  %vm1288_vm12 = vmxor %vm776_vm7, %vm4010_vm3  ;;  %vm785_vm10 = vcmp.lt.f32.partialorder %v273_v42, 0.5  ;;  %v300_v33 = vld [vmem:[%s4127_s3 + $0x488] sm:$0xff] }
  0xb5   : > { %2823 = vst [vmem:[%s4144_s16 + $0x360] sm:$0xff] %v3445_v35  ;;  %v3446_v37 = vsel %vm1288_vm12, 1.0, %v4011_v7  ;;  %vm1289_vm14 = vmxor %vm777_vm9, %vm4010_vm3  ;;  %vm786_vm12 = vcmp.lt.f32.partialorder %v274_v44, 0.5  ;;  %v301_v35 = vld [vmem:[%s4127_s3 + $0x490] sm:$0xff] }
  0xb6   : > { %2824 = vst [vmem:[%s4144_s16 + $0x368] sm:$0xff] %v3446_v37  ;;  %v3447_v39 = vsel %vm1289_vm14, 1.0, %v4011_v7  ;;  %vm1290_vm0 = vmxor %vm778_vm11, %vm4010_vm3  ;;  %vm787_vm14 = vcmp.lt.f32.partialorder %v275_v46, 0.5  ;;  %v302_v37 = vld [vmem:[%s4127_s3 + $0x498] sm:$0xff] }
  0xb7   : > { %2825 = vst [vmem:[%s4144_s16 + $0x370] sm:$0xff] %v3447_v39  ;;  %v3448_v41 = vsel %vm1290_vm0, 1.0, %v4011_v7  ;;  %vm1291_vm2 = vmxor %vm779_vm13, %vm4010_vm3  ;;  %vm788_vm0 = vcmp.lt.f32.partialorder %v276_v48, 0.5  ;;  %v303_v39 = vld [vmem:[%s4127_s3 + $0x4a0] sm:$0xff] }
  0xb8   : > { %2826 = vst [vmem:[%s4144_s16 + $0x378] sm:$0xff] %v3448_v41  ;;  %v3449_v43 = vsel %vm1291_vm2, 1.0, %v4011_v7  ;;  %vm1292_vm5 = vmxor %vm780_vm15, %vm4010_vm3  ;;  %vm789_vm2 = vcmp.lt.f32.partialorder %v277_v50, 0.5  ;;  %v304_v41 = vld [vmem:[%s4127_s3 + $0x4a8] sm:$0xff] }
  0xb9   : > { %2827 = vst [vmem:[%s4144_s16 + $0x380] sm:$0xff] %v3449_v43  ;;  %v3450_v45 = vsel %vm1292_vm5, 1.0, %v4011_v7  ;;  %vm1293_vm7 = vmxor %vm781_vm1, %vm4010_vm3  ;;  %vm790_vm5 = vcmp.lt.f32.partialorder %v278_v52, 0.5  ;;  %v305_v43 = vld [vmem:[%s4127_s3 + $0x4b0] sm:$0xff] }
  0xba   : > { %2828 = vst [vmem:[%s4144_s16 + $0x388] sm:$0xff] %v3450_v45  ;;  %v3451_v47 = vsel %vm1293_vm7, 1.0, %v4011_v7  ;;  %vm1294_vm9 = vmxor %vm782_vm4, %vm4010_vm3  ;;  %vm791_vm7 = vcmp.lt.f32.partialorder %v279_v54, 0.5  ;;  %v306_v45 = vld [vmem:[%s4127_s3 + $0x4b8] sm:$0xff] }
  0xbb   : > { %2829 = vst [vmem:[%s4144_s16 + $0x390] sm:$0xff] %v3451_v47  ;;  %v3452_v49 = vsel %vm1294_vm9, 1.0, %v4011_v7  ;;  %vm1295_vm11 = vmxor %vm783_vm6, %vm4010_vm3  ;;  %vm792_vm9 = vcmp.lt.f32.partialorder %v280_v56, 0.5  ;;  %v307_v47 = vld [vmem:[%s4127_s3 + $0x4c0] sm:$0xff] }
  0xbc   : > { %2830 = vst [vmem:[%s4144_s16 + $0x398] sm:$0xff] %v3452_v49  ;;  %v3453_v51 = vsel %vm1295_vm11, 1.0, %v4011_v7  ;;  %vm1296_vm13 = vmxor %vm784_vm8, %vm4010_vm3  ;;  %vm793_vm11 = vcmp.lt.f32.partialorder %v281_v58, 0.5  ;;  %v308_v49 = vld [vmem:[%s4127_s3 + $0x4c8] sm:$0xff] }
  0xbd   : > { %2831 = vst [vmem:[%s4144_s16 + $0x3a0] sm:$0xff] %v3453_v51  ;;  %v3454_v53 = vsel %vm1296_vm13, 1.0, %v4011_v7  ;;  %vm1297_vm15 = vmxor %vm785_vm10, %vm4010_vm3  ;;  %vm794_vm13 = vcmp.lt.f32.partialorder %v282_v60, 0.5  ;;  %v309_v51 = vld [vmem:[%s4127_s3 + $0x4d0] sm:$0xff] }
  0xbe   : > { %2832 = vst [vmem:[%s4144_s16 + $0x3a8] sm:$0xff] %v3454_v53  ;;  %v3455_v55 = vsel %vm1297_vm15, 1.0, %v4011_v7  ;;  %vm1298_vm1 = vmxor %vm786_vm12, %vm4010_vm3  ;;  %vm795_vm15 = vcmp.lt.f32.partialorder %v283_v62, 0.5  ;;  %v310_v53 = vld [vmem:[%s4127_s3 + $0x4d8] sm:$0xff] }
  0xbf   : > { %2833 = vst [vmem:[%s4144_s16 + $0x3b0] sm:$0xff] %v3455_v55  ;;  %v3456_v57 = vsel %vm1298_vm1, 1.0, %v4011_v7  ;;  %vm1299_vm4 = vmxor %vm787_vm14, %vm4010_vm3  ;;  %vm796_vm1 = vcmp.lt.f32.partialorder %v284_v0, 0.5  ;;  %v311_v55 = vld [vmem:[%s4127_s3 + $0x4e0] sm:$0xff] }
  0xc0   : > { %2834 = vst [vmem:[%s4144_s16 + $0x3b8] sm:$0xff] %v3456_v57  ;;  %v3457_v59 = vsel %vm1299_vm4, 1.0, %v4011_v7  ;;  %vm1300_vm6 = vmxor %vm788_vm0, %vm4010_vm3  ;;  %vm797_vm4 = vcmp.lt.f32.partialorder %v285_v2, 0.5  ;;  %v312_v57 = vld [vmem:[%s4127_s3 + $0x4e8] sm:$0xff] }
  0xc1   : > { %2835 = vst [vmem:[%s4144_s16 + $0x3c0] sm:$0xff] %v3457_v59  ;;  %v3458_v61 = vsel %vm1300_vm6, 1.0, %v4011_v7  ;;  %vm1301_vm8 = vmxor %vm789_vm2, %vm4010_vm3  ;;  %vm798_vm6 = vcmp.lt.f32.partialorder %v286_v4, 0.5  ;;  %v313_v59 = vld [vmem:[%s4127_s3 + $0x4f0] sm:$0xff] }
  0xc2   : > { %2836 = vst [vmem:[%s4144_s16 + $0x3c8] sm:$0xff] %v3458_v61  ;;  %v3459_v63 = vsel %vm1301_vm8, 1.0, %v4011_v7  ;;  %vm1302_vm10 = vmxor %vm790_vm5, %vm4010_vm3  ;;  %vm799_vm8 = vcmp.lt.f32.partialorder %v287_v6, 0.5  ;;  %v314_v61 = vld [vmem:[%s4127_s3 + $0x4f8] sm:$0xff] }
  0xc3   : > { %2837 = vst [vmem:[%s4144_s16 + $0x3d0] sm:$0xff] %v3459_v63  ;;  %v3460_v1 = vsel %vm1302_vm10, 1.0, %v4011_v7  ;;  %vm1303_vm12 = vmxor %vm791_vm7, %vm4010_vm3  ;;  %vm800_vm10 = vcmp.lt.f32.partialorder %v288_v9, 0.5  ;;  %v315_v63 = vld [vmem:[%s4127_s3 + $0x500] sm:$0xff] }
  0xc4   : > { %2838 = vst [vmem:[%s4144_s16 + $0x3d8] sm:$0xff] %v3460_v1  ;;  %v3461_v3 = vsel %vm1303_vm12, 1.0, %v4011_v7  ;;  %vm1304_vm14 = vmxor %vm792_vm9, %vm4010_vm3  ;;  %vm801_vm12 = vcmp.lt.f32.partialorder %v289_v11, 0.5  ;;  %v316_v1 = vld [vmem:[%s4127_s3 + $0x508] sm:$0xff] }
  0xc5   : > { %2839 = vst [vmem:[%s4144_s16 + $0x3e0] sm:$0xff] %v3461_v3  ;;  %v3462_v5 = vsel %vm1304_vm14, 1.0, %v4011_v7  ;;  %vm1305_vm0 = vmxor %vm793_vm11, %vm4010_vm3  ;;  %vm802_vm14 = vcmp.lt.f32.partialorder %v290_v13, 0.5  ;;  %v317_v3 = vld [vmem:[%s4127_s3 + $0x510] sm:$0xff] }
  0xc6   : > { %2840 = vst [vmem:[%s4144_s16 + $0x3e8] sm:$0xff] %v3462_v5  ;;  %v3463_v8 = vsel %vm1305_vm0, 1.0, %v4011_v7  ;;  %vm1306_vm2 = vmxor %vm794_vm13, %vm4010_vm3  ;;  %vm803_vm0 = vcmp.lt.f32.partialorder %v291_v15, 0.5  ;;  %v318_v5 = vld [vmem:[%s4127_s3 + $0x518] sm:$0xff] }
  0xc7   : > { %2841 = vst [vmem:[%s4144_s16 + $0x3f0] sm:$0xff] %v3463_v8  ;;  %v3464_v10 = vsel %vm1306_vm2, 1.0, %v4011_v7  ;;  %vm1307_vm5 = vmxor %vm795_vm15, %vm4010_vm3  ;;  %vm804_vm2 = vcmp.lt.f32.partialorder %v292_v17, 0.5  ;;  %v319_v8 = vld [vmem:[%s4127_s3 + $0x520] sm:$0xff] }
  0xc8   : > { %2842 = vst [vmem:[%s4144_s16 + $0x3f8] sm:$0xff] %v3464_v10  ;;  %v3465_v12 = vsel %vm1307_vm5, 1.0, %v4011_v7  ;;  %vm1308_vm7 = vmxor %vm796_vm1, %vm4010_vm3  ;;  %vm805_vm5 = vcmp.lt.f32.partialorder %v293_v19, 0.5  ;;  %v320_v10 = vld [vmem:[%s4127_s3 + $0x528] sm:$0xff] }
  0xc9   : > { %2843 = vst [vmem:[%s4144_s16 + $0x400] sm:$0xff] %v3465_v12  ;;  %v3466_v14 = vsel %vm1308_vm7, 1.0, %v4011_v7  ;;  %vm1309_vm9 = vmxor %vm797_vm4, %vm4010_vm3  ;;  %vm806_vm7 = vcmp.lt.f32.partialorder %v294_v21, 0.5  ;;  %v321_v12 = vld [vmem:[%s4127_s3 + $0x530] sm:$0xff] }
  0xca   : > { %2844 = vst [vmem:[%s4144_s16 + $0x408] sm:$0xff] %v3466_v14  ;;  %v3467_v16 = vsel %vm1309_vm9, 1.0, %v4011_v7  ;;  %vm1310_vm11 = vmxor %vm798_vm6, %vm4010_vm3  ;;  %vm807_vm9 = vcmp.lt.f32.partialorder %v295_v23, 0.5  ;;  %v322_v14 = vld [vmem:[%s4127_s3 + $0x538] sm:$0xff] }
  0xcb   : > { %2845 = vst [vmem:[%s4144_s16 + $0x410] sm:$0xff] %v3467_v16  ;;  %v3468_v18 = vsel %vm1310_vm11, 1.0, %v4011_v7  ;;  %vm1311_vm13 = vmxor %vm799_vm8, %vm4010_vm3  ;;  %vm808_vm11 = vcmp.lt.f32.partialorder %v296_v25, 0.5  ;;  %v323_v16 = vld [vmem:[%s4127_s3 + $0x540] sm:$0xff] }
  0xcc   : > { %2846 = vst [vmem:[%s4144_s16 + $0x418] sm:$0xff] %v3468_v18  ;;  %v3469_v20 = vsel %vm1311_vm13, 1.0, %v4011_v7  ;;  %vm1312_vm15 = vmxor %vm800_vm10, %vm4010_vm3  ;;  %vm809_vm13 = vcmp.lt.f32.partialorder %v297_v27, 0.5  ;;  %v324_v18 = vld [vmem:[%s4127_s3 + $0x548] sm:$0xff] }
  0xcd   : > { %2847 = vst [vmem:[%s4144_s16 + $0x420] sm:$0xff] %v3469_v20  ;;  %v3470_v22 = vsel %vm1312_vm15, 1.0, %v4011_v7  ;;  %vm1313_vm1 = vmxor %vm801_vm12, %vm4010_vm3  ;;  %vm810_vm15 = vcmp.lt.f32.partialorder %v298_v29, 0.5  ;;  %v325_v20 = vld [vmem:[%s4127_s3 + $0x550] sm:$0xff] }
  0xce   : > { %2848 = vst [vmem:[%s4144_s16 + $0x428] sm:$0xff] %v3470_v22  ;;  %v3471_v24 = vsel %vm1313_vm1, 1.0, %v4011_v7  ;;  %vm1314_vm4 = vmxor %vm802_vm14, %vm4010_vm3  ;;  %vm811_vm1 = vcmp.lt.f32.partialorder %v299_v31, 0.5  ;;  %v326_v22 = vld [vmem:[%s4127_s3 + $0x558] sm:$0xff] }
  0xcf   : > { %2849 = vst [vmem:[%s4144_s16 + $0x430] sm:$0xff] %v3471_v24  ;;  %v3472_v26 = vsel %vm1314_vm4, 1.0, %v4011_v7  ;;  %vm1315_vm6 = vmxor %vm803_vm0, %vm4010_vm3  ;;  %vm812_vm4 = vcmp.lt.f32.partialorder %v300_v33, 0.5  ;;  %v327_v24 = vld [vmem:[%s4127_s3 + $0x560] sm:$0xff] }
  0xd0   : > { %2850 = vst [vmem:[%s4144_s16 + $0x438] sm:$0xff] %v3472_v26  ;;  %v3473_v28 = vsel %vm1315_vm6, 1.0, %v4011_v7  ;;  %vm1316_vm8 = vmxor %vm804_vm2, %vm4010_vm3  ;;  %vm813_vm6 = vcmp.lt.f32.partialorder %v301_v35, 0.5  ;;  %v328_v26 = vld [vmem:[%s4127_s3 + $0x568] sm:$0xff] }
  0xd1   : > { %2851 = vst [vmem:[%s4144_s16 + $0x440] sm:$0xff] %v3473_v28  ;;  %v3474_v30 = vsel %vm1316_vm8, 1.0, %v4011_v7  ;;  %vm1317_vm10 = vmxor %vm805_vm5, %vm4010_vm3  ;;  %vm814_vm8 = vcmp.lt.f32.partialorder %v302_v37, 0.5  ;;  %v329_v28 = vld [vmem:[%s4127_s3 + $0x570] sm:$0xff] }
  0xd2   : > { %2852 = vst [vmem:[%s4144_s16 + $0x448] sm:$0xff] %v3474_v30  ;;  %v3475_v32 = vsel %vm1317_vm10, 1.0, %v4011_v7  ;;  %vm1318_vm12 = vmxor %vm806_vm7, %vm4010_vm3  ;;  %vm815_vm10 = vcmp.lt.f32.partialorder %v303_v39, 0.5  ;;  %v330_v30 = vld [vmem:[%s4127_s3 + $0x578] sm:$0xff] }
  0xd3   : > { %2853 = vst [vmem:[%s4144_s16 + $0x450] sm:$0xff] %v3475_v32  ;;  %v3476_v34 = vsel %vm1318_vm12, 1.0, %v4011_v7  ;;  %vm1319_vm14 = vmxor %vm807_vm9, %vm4010_vm3  ;;  %vm816_vm12 = vcmp.lt.f32.partialorder %v304_v41, 0.5  ;;  %v331_v32 = vld [vmem:[%s4127_s3 + $0x580] sm:$0xff] }
  0xd4   : > { %2854 = vst [vmem:[%s4144_s16 + $0x458] sm:$0xff] %v3476_v34  ;;  %v3477_v36 = vsel %vm1319_vm14, 1.0, %v4011_v7  ;;  %vm1320_vm0 = vmxor %vm808_vm11, %vm4010_vm3  ;;  %vm817_vm14 = vcmp.lt.f32.partialorder %v305_v43, 0.5  ;;  %v332_v34 = vld [vmem:[%s4127_s3 + $0x588] sm:$0xff] }
  0xd5   : > { %2855 = vst [vmem:[%s4144_s16 + $0x460] sm:$0xff] %v3477_v36  ;;  %v3478_v38 = vsel %vm1320_vm0, 1.0, %v4011_v7  ;;  %vm1321_vm2 = vmxor %vm809_vm13, %vm4010_vm3  ;;  %vm818_vm0 = vcmp.lt.f32.partialorder %v306_v45, 0.5  ;;  %v333_v36 = vld [vmem:[%s4127_s3 + $0x590] sm:$0xff] }
  0xd6   : > { %2856 = vst [vmem:[%s4144_s16 + $0x468] sm:$0xff] %v3478_v38  ;;  %v3479_v40 = vsel %vm1321_vm2, 1.0, %v4011_v7  ;;  %vm1322_vm5 = vmxor %vm810_vm15, %vm4010_vm3  ;;  %vm819_vm2 = vcmp.lt.f32.partialorder %v307_v47, 0.5  ;;  %v334_v38 = vld [vmem:[%s4127_s3 + $0x598] sm:$0xff] }
  0xd7   : > { %2857 = vst [vmem:[%s4144_s16 + $0x470] sm:$0xff] %v3479_v40  ;;  %v3480_v42 = vsel %vm1322_vm5, 1.0, %v4011_v7  ;;  %vm1323_vm7 = vmxor %vm811_vm1, %vm4010_vm3  ;;  %vm820_vm5 = vcmp.lt.f32.partialorder %v308_v49, 0.5  ;;  %v335_v40 = vld [vmem:[%s4127_s3 + $0x5a0] sm:$0xff] }
  0xd8   : > { %2858 = vst [vmem:[%s4144_s16 + $0x478] sm:$0xff] %v3480_v42  ;;  %v3481_v44 = vsel %vm1323_vm7, 1.0, %v4011_v7  ;;  %vm1324_vm9 = vmxor %vm812_vm4, %vm4010_vm3  ;;  %vm821_vm7 = vcmp.lt.f32.partialorder %v309_v51, 0.5  ;;  %v336_v42 = vld [vmem:[%s4127_s3 + $0x5a8] sm:$0xff] }
  0xd9   : > { %2859 = vst [vmem:[%s4144_s16 + $0x480] sm:$0xff] %v3481_v44  ;;  %v3482_v46 = vsel %vm1324_vm9, 1.0, %v4011_v7  ;;  %vm1325_vm11 = vmxor %vm813_vm6, %vm4010_vm3  ;;  %vm822_vm9 = vcmp.lt.f32.partialorder %v310_v53, 0.5  ;;  %v337_v44 = vld [vmem:[%s4127_s3 + $0x5b0] sm:$0xff] }
  0xda   : > { %2860 = vst [vmem:[%s4144_s16 + $0x488] sm:$0xff] %v3482_v46  ;;  %v3483_v48 = vsel %vm1325_vm11, 1.0, %v4011_v7  ;;  %vm1326_vm13 = vmxor %vm814_vm8, %vm4010_vm3  ;;  %vm823_vm11 = vcmp.lt.f32.partialorder %v311_v55, 0.5  ;;  %v338_v46 = vld [vmem:[%s4127_s3 + $0x5b8] sm:$0xff] }
  0xdb   : > { %2861 = vst [vmem:[%s4144_s16 + $0x490] sm:$0xff] %v3483_v48  ;;  %v3484_v50 = vsel %vm1326_vm13, 1.0, %v4011_v7  ;;  %vm1327_vm15 = vmxor %vm815_vm10, %vm4010_vm3  ;;  %vm824_vm13 = vcmp.lt.f32.partialorder %v312_v57, 0.5  ;;  %v339_v48 = vld [vmem:[%s4127_s3 + $0x5c0] sm:$0xff] }
  0xdc   : > { %2862 = vst [vmem:[%s4144_s16 + $0x498] sm:$0xff] %v3484_v50  ;;  %v3485_v52 = vsel %vm1327_vm15, 1.0, %v4011_v7  ;;  %vm1328_vm1 = vmxor %vm816_vm12, %vm4010_vm3  ;;  %vm825_vm15 = vcmp.lt.f32.partialorder %v313_v59, 0.5  ;;  %v340_v50 = vld [vmem:[%s4127_s3 + $0x5c8] sm:$0xff] }
  0xdd   : > { %2863 = vst [vmem:[%s4144_s16 + $0x4a0] sm:$0xff] %v3485_v52  ;;  %v3486_v54 = vsel %vm1328_vm1, 1.0, %v4011_v7  ;;  %vm1329_vm4 = vmxor %vm817_vm14, %vm4010_vm3  ;;  %vm826_vm1 = vcmp.lt.f32.partialorder %v314_v61, 0.5  ;;  %v341_v52 = vld [vmem:[%s4127_s3 + $0x5d0] sm:$0xff] }
  0xde   : > { %2864 = vst [vmem:[%s4144_s16 + $0x4a8] sm:$0xff] %v3486_v54  ;;  %v3487_v56 = vsel %vm1329_vm4, 1.0, %v4011_v7  ;;  %vm1330_vm6 = vmxor %vm818_vm0, %vm4010_vm3  ;;  %vm827_vm4 = vcmp.lt.f32.partialorder %v315_v63, 0.5  ;;  %v342_v54 = vld [vmem:[%s4127_s3 + $0x5d8] sm:$0xff] }
  0xdf   : > { %2865 = vst [vmem:[%s4144_s16 + $0x4b0] sm:$0xff] %v3487_v56  ;;  %v3488_v58 = vsel %vm1330_vm6, 1.0, %v4011_v7  ;;  %vm1331_vm8 = vmxor %vm819_vm2, %vm4010_vm3  ;;  %vm828_vm6 = vcmp.lt.f32.partialorder %v316_v1, 0.5  ;;  %v343_v56 = vld [vmem:[%s4127_s3 + $0x5e0] sm:$0xff] }
  0xe0   : > { %2866 = vst [vmem:[%s4144_s16 + $0x4b8] sm:$0xff] %v3488_v58  ;;  %v3489_v60 = vsel %vm1331_vm8, 1.0, %v4011_v7  ;;  %vm1332_vm10 = vmxor %vm820_vm5, %vm4010_vm3  ;;  %vm829_vm8 = vcmp.lt.f32.partialorder %v317_v3, 0.5  ;;  %v344_v58 = vld [vmem:[%s4127_s3 + $0x5e8] sm:$0xff] }
  0xe1   : > { %2867 = vst [vmem:[%s4144_s16 + $0x4c0] sm:$0xff] %v3489_v60  ;;  %v3490_v62 = vsel %vm1332_vm10, 1.0, %v4011_v7  ;;  %vm1333_vm12 = vmxor %vm821_vm7, %vm4010_vm3  ;;  %vm830_vm10 = vcmp.lt.f32.partialorder %v318_v5, 0.5  ;;  %v345_v60 = vld [vmem:[%s4127_s3 + $0x5f0] sm:$0xff] }
  0xe2   : > { %2868 = vst [vmem:[%s4144_s16 + $0x4c8] sm:$0xff] %v3490_v62  ;;  %v3491_v0 = vsel %vm1333_vm12, 1.0, %v4011_v7  ;;  %vm1334_vm14 = vmxor %vm822_vm9, %vm4010_vm3  ;;  %vm831_vm12 = vcmp.lt.f32.partialorder %v319_v8, 0.5  ;;  %v346_v62 = vld [vmem:[%s4127_s3 + $0x5f8] sm:$0xff] }
  0xe3   : > { %2869 = vst [vmem:[%s4144_s16 + $0x4d0] sm:$0xff] %v3491_v0  ;;  %v3492_v2 = vsel %vm1334_vm14, 1.0, %v4011_v7  ;;  %vm1335_vm0 = vmxor %vm823_vm11, %vm4010_vm3  ;;  %vm832_vm14 = vcmp.lt.f32.partialorder %v320_v10, 0.5  ;;  %v347_v0 = vld [vmem:[%s4127_s3 + $0x600] sm:$0xff] }
  0xe4   : > { %2870 = vst [vmem:[%s4144_s16 + $0x4d8] sm:$0xff] %v3492_v2  ;;  %v3493_v4 = vsel %vm1335_vm0, 1.0, %v4011_v7  ;;  %vm1336_vm2 = vmxor %vm824_vm13, %vm4010_vm3  ;;  %vm833_vm0 = vcmp.lt.f32.partialorder %v321_v12, 0.5  ;;  %v348_v2 = vld [vmem:[%s4127_s3 + $0x608] sm:$0xff] }
  0xe5   : > { %2871 = vst [vmem:[%s4144_s16 + $0x4e0] sm:$0xff] %v3493_v4  ;;  %v3494_v6 = vsel %vm1336_vm2, 1.0, %v4011_v7  ;;  %vm1337_vm5 = vmxor %vm825_vm15, %vm4010_vm3  ;;  %vm834_vm2 = vcmp.lt.f32.partialorder %v322_v14, 0.5  ;;  %v349_v4 = vld [vmem:[%s4127_s3 + $0x610] sm:$0xff] }
  0xe6   : > { %2872 = vst [vmem:[%s4144_s16 + $0x4e8] sm:$0xff] %v3494_v6  ;;  %v3495_v9 = vsel %vm1337_vm5, 1.0, %v4011_v7  ;;  %vm1338_vm7 = vmxor %vm826_vm1, %vm4010_vm3  ;;  %vm835_vm5 = vcmp.lt.f32.partialorder %v323_v16, 0.5  ;;  %v350_v6 = vld [vmem:[%s4127_s3 + $0x618] sm:$0xff] }
  0xe7   : > { %2873 = vst [vmem:[%s4144_s16 + $0x4f0] sm:$0xff] %v3495_v9  ;;  %v3496_v11 = vsel %vm1338_vm7, 1.0, %v4011_v7  ;;  %vm1339_vm9 = vmxor %vm827_vm4, %vm4010_vm3  ;;  %vm836_vm7 = vcmp.lt.f32.partialorder %v324_v18, 0.5  ;;  %v351_v9 = vld [vmem:[%s4127_s3 + $0x620] sm:$0xff] }
  0xe8   : > { %2874 = vst [vmem:[%s4144_s16 + $0x4f8] sm:$0xff] %v3496_v11  ;;  %v3497_v13 = vsel %vm1339_vm9, 1.0, %v4011_v7  ;;  %vm1340_vm11 = vmxor %vm828_vm6, %vm4010_vm3  ;;  %vm837_vm9 = vcmp.lt.f32.partialorder %v325_v20, 0.5  ;;  %v352_v11 = vld [vmem:[%s4127_s3 + $0x628] sm:$0xff] }
  0xe9   : > { %2875 = vst [vmem:[%s4144_s16 + $0x500] sm:$0xff] %v3497_v13  ;;  %v3498_v15 = vsel %vm1340_vm11, 1.0, %v4011_v7  ;;  %vm1341_vm13 = vmxor %vm829_vm8, %vm4010_vm3  ;;  %vm838_vm11 = vcmp.lt.f32.partialorder %v326_v22, 0.5  ;;  %v353_v13 = vld [vmem:[%s4127_s3 + $0x630] sm:$0xff] }
  0xea   : > { %2876 = vst [vmem:[%s4144_s16 + $0x508] sm:$0xff] %v3498_v15  ;;  %v3499_v17 = vsel %vm1341_vm13, 1.0, %v4011_v7  ;;  %vm1342_vm15 = vmxor %vm830_vm10, %vm4010_vm3  ;;  %vm839_vm13 = vcmp.lt.f32.partialorder %v327_v24, 0.5  ;;  %v354_v15 = vld [vmem:[%s4127_s3 + $0x638] sm:$0xff] }
  0xeb   : > { %2877 = vst [vmem:[%s4144_s16 + $0x510] sm:$0xff] %v3499_v17  ;;  %v3500_v19 = vsel %vm1342_vm15, 1.0, %v4011_v7  ;;  %vm1343_vm1 = vmxor %vm831_vm12, %vm4010_vm3  ;;  %vm840_vm15 = vcmp.lt.f32.partialorder %v328_v26, 0.5  ;;  %v355_v17 = vld [vmem:[%s4127_s3 + $0x640] sm:$0xff] }
  0xec   : > { %2878 = vst [vmem:[%s4144_s16 + $0x518] sm:$0xff] %v3500_v19  ;;  %v3501_v21 = vsel %vm1343_vm1, 1.0, %v4011_v7  ;;  %vm1344_vm4 = vmxor %vm832_vm14, %vm4010_vm3  ;;  %vm841_vm1 = vcmp.lt.f32.partialorder %v329_v28, 0.5  ;;  %v356_v19 = vld [vmem:[%s4127_s3 + $0x648] sm:$0xff] }
  0xed   : > { %2879 = vst [vmem:[%s4144_s16 + $0x520] sm:$0xff] %v3501_v21  ;;  %v3502_v23 = vsel %vm1344_vm4, 1.0, %v4011_v7  ;;  %vm1345_vm6 = vmxor %vm833_vm0, %vm4010_vm3  ;;  %vm842_vm4 = vcmp.lt.f32.partialorder %v330_v30, 0.5  ;;  %v357_v21 = vld [vmem:[%s4127_s3 + $0x650] sm:$0xff] }
  0xee   : > { %2880 = vst [vmem:[%s4144_s16 + $0x528] sm:$0xff] %v3502_v23  ;;  %v3503_v25 = vsel %vm1345_vm6, 1.0, %v4011_v7  ;;  %vm1346_vm8 = vmxor %vm834_vm2, %vm4010_vm3  ;;  %vm843_vm6 = vcmp.lt.f32.partialorder %v331_v32, 0.5  ;;  %v358_v23 = vld [vmem:[%s4127_s3 + $0x658] sm:$0xff] }
  0xef   : > { %2881 = vst [vmem:[%s4144_s16 + $0x530] sm:$0xff] %v3503_v25  ;;  %v3504_v27 = vsel %vm1346_vm8, 1.0, %v4011_v7  ;;  %vm1347_vm10 = vmxor %vm835_vm5, %vm4010_vm3  ;;  %vm844_vm8 = vcmp.lt.f32.partialorder %v332_v34, 0.5  ;;  %v359_v25 = vld [vmem:[%s4127_s3 + $0x660] sm:$0xff] }
  0xf0   : > { %2882 = vst [vmem:[%s4144_s16 + $0x538] sm:$0xff] %v3504_v27  ;;  %v3505_v29 = vsel %vm1347_vm10, 1.0, %v4011_v7  ;;  %vm1348_vm12 = vmxor %vm836_vm7, %vm4010_vm3  ;;  %vm845_vm10 = vcmp.lt.f32.partialorder %v333_v36, 0.5  ;;  %v360_v27 = vld [vmem:[%s4127_s3 + $0x668] sm:$0xff] }
  0xf1   : > { %2883 = vst [vmem:[%s4144_s16 + $0x540] sm:$0xff] %v3505_v29  ;;  %v3506_v31 = vsel %vm1348_vm12, 1.0, %v4011_v7  ;;  %vm1349_vm14 = vmxor %vm837_vm9, %vm4010_vm3  ;;  %vm846_vm12 = vcmp.lt.f32.partialorder %v334_v38, 0.5  ;;  %v361_v29 = vld [vmem:[%s4127_s3 + $0x670] sm:$0xff] }
  0xf2   : > { %2884 = vst [vmem:[%s4144_s16 + $0x548] sm:$0xff] %v3506_v31  ;;  %v3507_v33 = vsel %vm1349_vm14, 1.0, %v4011_v7  ;;  %vm1350_vm0 = vmxor %vm838_vm11, %vm4010_vm3  ;;  %vm847_vm14 = vcmp.lt.f32.partialorder %v335_v40, 0.5  ;;  %v362_v31 = vld [vmem:[%s4127_s3 + $0x678] sm:$0xff] }
  0xf3   : > { %2885 = vst [vmem:[%s4144_s16 + $0x550] sm:$0xff] %v3507_v33  ;;  %v3508_v35 = vsel %vm1350_vm0, 1.0, %v4011_v7  ;;  %vm1351_vm2 = vmxor %vm839_vm13, %vm4010_vm3  ;;  %vm848_vm0 = vcmp.lt.f32.partialorder %v336_v42, 0.5  ;;  %v363_v33 = vld [vmem:[%s4127_s3 + $0x680] sm:$0xff] }
  0xf4   : > { %2886 = vst [vmem:[%s4144_s16 + $0x558] sm:$0xff] %v3508_v35  ;;  %v3509_v37 = vsel %vm1351_vm2, 1.0, %v4011_v7  ;;  %vm1352_vm5 = vmxor %vm840_vm15, %vm4010_vm3  ;;  %vm849_vm2 = vcmp.lt.f32.partialorder %v337_v44, 0.5  ;;  %v364_v35 = vld [vmem:[%s4127_s3 + $0x688] sm:$0xff] }
  0xf5   : > { %2887 = vst [vmem:[%s4144_s16 + $0x560] sm:$0xff] %v3509_v37  ;;  %v3510_v39 = vsel %vm1352_vm5, 1.0, %v4011_v7  ;;  %vm1353_vm7 = vmxor %vm841_vm1, %vm4010_vm3  ;;  %vm850_vm5 = vcmp.lt.f32.partialorder %v338_v46, 0.5  ;;  %v365_v37 = vld [vmem:[%s4127_s3 + $0x690] sm:$0xff] }
  0xf6   : > { %2888 = vst [vmem:[%s4144_s16 + $0x568] sm:$0xff] %v3510_v39  ;;  %v3511_v41 = vsel %vm1353_vm7, 1.0, %v4011_v7  ;;  %vm1354_vm9 = vmxor %vm842_vm4, %vm4010_vm3  ;;  %vm851_vm7 = vcmp.lt.f32.partialorder %v339_v48, 0.5  ;;  %v366_v39 = vld [vmem:[%s4127_s3 + $0x698] sm:$0xff] }
  0xf7   : > { %2889 = vst [vmem:[%s4144_s16 + $0x570] sm:$0xff] %v3511_v41  ;;  %v3512_v43 = vsel %vm1354_vm9, 1.0, %v4011_v7  ;;  %vm1355_vm11 = vmxor %vm843_vm6, %vm4010_vm3  ;;  %vm852_vm9 = vcmp.lt.f32.partialorder %v340_v50, 0.5  ;;  %v367_v41 = vld [vmem:[%s4127_s3 + $0x6a0] sm:$0xff] }
  0xf8   : > { %2890 = vst [vmem:[%s4144_s16 + $0x578] sm:$0xff] %v3512_v43  ;;  %v3513_v45 = vsel %vm1355_vm11, 1.0, %v4011_v7  ;;  %vm1356_vm13 = vmxor %vm844_vm8, %vm4010_vm3  ;;  %vm853_vm11 = vcmp.lt.f32.partialorder %v341_v52, 0.5  ;;  %v368_v43 = vld [vmem:[%s4127_s3 + $0x6a8] sm:$0xff] }
  0xf9   : > { %2891 = vst [vmem:[%s4144_s16 + $0x580] sm:$0xff] %v3513_v45  ;;  %v3514_v47 = vsel %vm1356_vm13, 1.0, %v4011_v7  ;;  %vm1357_vm15 = vmxor %vm845_vm10, %vm4010_vm3  ;;  %vm854_vm13 = vcmp.lt.f32.partialorder %v342_v54, 0.5  ;;  %v369_v45 = vld [vmem:[%s4127_s3 + $0x6b0] sm:$0xff] }
  0xfa   : > { %2892 = vst [vmem:[%s4144_s16 + $0x588] sm:$0xff] %v3514_v47  ;;  %v3515_v49 = vsel %vm1357_vm15, 1.0, %v4011_v7  ;;  %vm1358_vm1 = vmxor %vm846_vm12, %vm4010_vm3  ;;  %vm855_vm15 = vcmp.lt.f32.partialorder %v343_v56, 0.5  ;;  %v370_v47 = vld [vmem:[%s4127_s3 + $0x6b8] sm:$0xff] }
  0xfb   : > { %2893 = vst [vmem:[%s4144_s16 + $0x590] sm:$0xff] %v3515_v49  ;;  %v3516_v51 = vsel %vm1358_vm1, 1.0, %v4011_v7  ;;  %vm1359_vm4 = vmxor %vm847_vm14, %vm4010_vm3  ;;  %vm856_vm1 = vcmp.lt.f32.partialorder %v344_v58, 0.5  ;;  %v371_v49 = vld [vmem:[%s4127_s3 + $0x6c0] sm:$0xff] }
  0xfc   : > { %2894 = vst [vmem:[%s4144_s16 + $0x598] sm:$0xff] %v3516_v51  ;;  %v3517_v53 = vsel %vm1359_vm4, 1.0, %v4011_v7  ;;  %vm1360_vm6 = vmxor %vm848_vm0, %vm4010_vm3  ;;  %vm857_vm4 = vcmp.lt.f32.partialorder %v345_v60, 0.5  ;;  %v372_v51 = vld [vmem:[%s4127_s3 + $0x6c8] sm:$0xff] }
  0xfd   : > { %2895 = vst [vmem:[%s4144_s16 + $0x5a0] sm:$0xff] %v3517_v53  ;;  %v3518_v55 = vsel %vm1360_vm6, 1.0, %v4011_v7  ;;  %vm1361_vm8 = vmxor %vm849_vm2, %vm4010_vm3  ;;  %vm858_vm6 = vcmp.lt.f32.partialorder %v346_v62, 0.5  ;;  %v373_v53 = vld [vmem:[%s4127_s3 + $0x6d0] sm:$0xff] }
  0xfe   : > { %2896 = vst [vmem:[%s4144_s16 + $0x5a8] sm:$0xff] %v3518_v55  ;;  %v3519_v57 = vsel %vm1361_vm8, 1.0, %v4011_v7  ;;  %vm1362_vm10 = vmxor %vm850_vm5, %vm4010_vm3  ;;  %vm859_vm8 = vcmp.lt.f32.partialorder %v347_v0, 0.5  ;;  %v374_v55 = vld [vmem:[%s4127_s3 + $0x6d8] sm:$0xff] }
  0xff   : > { %2897 = vst [vmem:[%s4144_s16 + $0x5b0] sm:$0xff] %v3519_v57  ;;  %v3520_v59 = vsel %vm1362_vm10, 1.0, %v4011_v7  ;;  %vm1363_vm12 = vmxor %vm851_vm7, %vm4010_vm3  ;;  %vm860_vm10 = vcmp.lt.f32.partialorder %v348_v2, 0.5  ;;  %v375_v57 = vld [vmem:[%s4127_s3 + $0x6e0] sm:$0xff] }
 0x100   : > { %2898 = vst [vmem:[%s4144_s16 + $0x5b8] sm:$0xff] %v3520_v59  ;;  %v3521_v61 = vsel %vm1363_vm12, 1.0, %v4011_v7  ;;  %vm1364_vm14 = vmxor %vm852_vm9, %vm4010_vm3  ;;  %vm861_vm12 = vcmp.lt.f32.partialorder %v349_v4, 0.5  ;;  %v376_v59 = vld [vmem:[%s4127_s3 + $0x6e8] sm:$0xff] }
 0x101   : > { %2899 = vst [vmem:[%s4144_s16 + $0x5c0] sm:$0xff] %v3521_v61  ;;  %v3522_v63 = vsel %vm1364_vm14, 1.0, %v4011_v7  ;;  %vm1365_vm0 = vmxor %vm853_vm11, %vm4010_vm3  ;;  %vm862_vm14 = vcmp.lt.f32.partialorder %v350_v6, 0.5  ;;  %v377_v61 = vld [vmem:[%s4127_s3 + $0x6f0] sm:$0xff] }
 0x102   : > { %2900 = vst [vmem:[%s4144_s16 + $0x5c8] sm:$0xff] %v3522_v63  ;;  %v3523_v1 = vsel %vm1365_vm0, 1.0, %v4011_v7  ;;  %vm1366_vm2 = vmxor %vm854_vm13, %vm4010_vm3  ;;  %vm863_vm0 = vcmp.lt.f32.partialorder %v351_v9, 0.5  ;;  %v378_v63 = vld [vmem:[%s4127_s3 + $0x6f8] sm:$0xff] }
 0x103   : > { %2901 = vst [vmem:[%s4144_s16 + $0x5d0] sm:$0xff] %v3523_v1  ;;  %v3524_v3 = vsel %vm1366_vm2, 1.0, %v4011_v7  ;;  %vm1367_vm5 = vmxor %vm855_vm15, %vm4010_vm3  ;;  %vm864_vm2 = vcmp.lt.f32.partialorder %v352_v11, 0.5  ;;  %v379_v1 = vld [vmem:[%s4127_s3 + $0x700] sm:$0xff] }
 0x104   : > { %2902 = vst [vmem:[%s4144_s16 + $0x5d8] sm:$0xff] %v3524_v3  ;;  %v3525_v5 = vsel %vm1367_vm5, 1.0, %v4011_v7  ;;  %vm1368_vm7 = vmxor %vm856_vm1, %vm4010_vm3  ;;  %vm865_vm5 = vcmp.lt.f32.partialorder %v353_v13, 0.5  ;;  %v380_v3 = vld [vmem:[%s4127_s3 + $0x708] sm:$0xff] }
 0x105   : > { %2903 = vst [vmem:[%s4144_s16 + $0x5e0] sm:$0xff] %v3525_v5  ;;  %v3526_v8 = vsel %vm1368_vm7, 1.0, %v4011_v7  ;;  %vm1369_vm9 = vmxor %vm857_vm4, %vm4010_vm3  ;;  %vm866_vm7 = vcmp.lt.f32.partialorder %v354_v15, 0.5  ;;  %v381_v5 = vld [vmem:[%s4127_s3 + $0x710] sm:$0xff] }
 0x106   : > { %2904 = vst [vmem:[%s4144_s16 + $0x5e8] sm:$0xff] %v3526_v8  ;;  %v3527_v10 = vsel %vm1369_vm9, 1.0, %v4011_v7  ;;  %vm1370_vm11 = vmxor %vm858_vm6, %vm4010_vm3  ;;  %vm867_vm9 = vcmp.lt.f32.partialorder %v355_v17, 0.5  ;;  %v382_v8 = vld [vmem:[%s4127_s3 + $0x718] sm:$0xff] }
 0x107   : > { %2905 = vst [vmem:[%s4144_s16 + $0x5f0] sm:$0xff] %v3527_v10  ;;  %v3528_v12 = vsel %vm1370_vm11, 1.0, %v4011_v7  ;;  %vm1371_vm13 = vmxor %vm859_vm8, %vm4010_vm3  ;;  %vm868_vm11 = vcmp.lt.f32.partialorder %v356_v19, 0.5  ;;  %v383_v10 = vld [vmem:[%s4127_s3 + $0x720] sm:$0xff] }
 0x108   : > { %2906 = vst [vmem:[%s4144_s16 + $0x5f8] sm:$0xff] %v3528_v12  ;;  %v3529_v14 = vsel %vm1371_vm13, 1.0, %v4011_v7  ;;  %vm1372_vm15 = vmxor %vm860_vm10, %vm4010_vm3  ;;  %vm869_vm13 = vcmp.lt.f32.partialorder %v357_v21, 0.5  ;;  %v384_v12 = vld [vmem:[%s4127_s3 + $0x728] sm:$0xff] }
 0x109   : > { %2907 = vst [vmem:[%s4144_s16 + $0x600] sm:$0xff] %v3529_v14  ;;  %v3530_v16 = vsel %vm1372_vm15, 1.0, %v4011_v7  ;;  %vm1373_vm1 = vmxor %vm861_vm12, %vm4010_vm3  ;;  %vm870_vm15 = vcmp.lt.f32.partialorder %v358_v23, 0.5  ;;  %v385_v14 = vld [vmem:[%s4127_s3 + $0x730] sm:$0xff] }
 0x10a   : > { %2908 = vst [vmem:[%s4144_s16 + $0x608] sm:$0xff] %v3530_v16  ;;  %v3531_v18 = vsel %vm1373_vm1, 1.0, %v4011_v7  ;;  %vm1374_vm4 = vmxor %vm862_vm14, %vm4010_vm3  ;;  %vm871_vm1 = vcmp.lt.f32.partialorder %v359_v25, 0.5  ;;  %v386_v16 = vld [vmem:[%s4127_s3 + $0x738] sm:$0xff] }
 0x10b   : > { %2909 = vst [vmem:[%s4144_s16 + $0x610] sm:$0xff] %v3531_v18  ;;  %v3532_v20 = vsel %vm1374_vm4, 1.0, %v4011_v7  ;;  %vm1375_vm6 = vmxor %vm863_vm0, %vm4010_vm3  ;;  %vm872_vm4 = vcmp.lt.f32.partialorder %v360_v27, 0.5  ;;  %v387_v18 = vld [vmem:[%s4127_s3 + $0x740] sm:$0xff] }
 0x10c   : > { %2910 = vst [vmem:[%s4144_s16 + $0x618] sm:$0xff] %v3532_v20  ;;  %v3533_v22 = vsel %vm1375_vm6, 1.0, %v4011_v7  ;;  %vm1376_vm8 = vmxor %vm864_vm2, %vm4010_vm3  ;;  %vm873_vm6 = vcmp.lt.f32.partialorder %v361_v29, 0.5  ;;  %v388_v20 = vld [vmem:[%s4127_s3 + $0x748] sm:$0xff] }
 0x10d   : > { %2911 = vst [vmem:[%s4144_s16 + $0x620] sm:$0xff] %v3533_v22  ;;  %v3534_v24 = vsel %vm1376_vm8, 1.0, %v4011_v7  ;;  %vm1377_vm10 = vmxor %vm865_vm5, %vm4010_vm3  ;;  %vm874_vm8 = vcmp.lt.f32.partialorder %v362_v31, 0.5  ;;  %v389_v22 = vld [vmem:[%s4127_s3 + $0x750] sm:$0xff] }
 0x10e   : > { %2912 = vst [vmem:[%s4144_s16 + $0x628] sm:$0xff] %v3534_v24  ;;  %v3535_v26 = vsel %vm1377_vm10, 1.0, %v4011_v7  ;;  %vm1378_vm12 = vmxor %vm866_vm7, %vm4010_vm3  ;;  %vm875_vm10 = vcmp.lt.f32.partialorder %v363_v33, 0.5  ;;  %v390_v24 = vld [vmem:[%s4127_s3 + $0x758] sm:$0xff] }
 0x10f   : > { %2913 = vst [vmem:[%s4144_s16 + $0x630] sm:$0xff] %v3535_v26  ;;  %v3536_v28 = vsel %vm1378_vm12, 1.0, %v4011_v7  ;;  %vm1379_vm14 = vmxor %vm867_vm9, %vm4010_vm3  ;;  %vm876_vm12 = vcmp.lt.f32.partialorder %v364_v35, 0.5  ;;  %v391_v26 = vld [vmem:[%s4127_s3 + $0x760] sm:$0xff] }
 0x110   : > { %2914 = vst [vmem:[%s4144_s16 + $0x638] sm:$0xff] %v3536_v28  ;;  %v3537_v30 = vsel %vm1379_vm14, 1.0, %v4011_v7  ;;  %vm1380_vm0 = vmxor %vm868_vm11, %vm4010_vm3  ;;  %vm877_vm14 = vcmp.lt.f32.partialorder %v365_v37, 0.5  ;;  %v392_v28 = vld [vmem:[%s4127_s3 + $0x768] sm:$0xff] }
 0x111   : > { %2915 = vst [vmem:[%s4144_s16 + $0x640] sm:$0xff] %v3537_v30  ;;  %v3538_v32 = vsel %vm1380_vm0, 1.0, %v4011_v7  ;;  %vm1381_vm2 = vmxor %vm869_vm13, %vm4010_vm3  ;;  %vm878_vm0 = vcmp.lt.f32.partialorder %v366_v39, 0.5  ;;  %v393_v30 = vld [vmem:[%s4127_s3 + $0x770] sm:$0xff] }
 0x112   : > { %2916 = vst [vmem:[%s4144_s16 + $0x648] sm:$0xff] %v3538_v32  ;;  %v3539_v34 = vsel %vm1381_vm2, 1.0, %v4011_v7  ;;  %vm1382_vm5 = vmxor %vm870_vm15, %vm4010_vm3  ;;  %vm879_vm2 = vcmp.lt.f32.partialorder %v367_v41, 0.5  ;;  %v394_v32 = vld [vmem:[%s4127_s3 + $0x778] sm:$0xff] }
 0x113   : > { %2917 = vst [vmem:[%s4144_s16 + $0x650] sm:$0xff] %v3539_v34  ;;  %v3540_v36 = vsel %vm1382_vm5, 1.0, %v4011_v7  ;;  %vm1383_vm7 = vmxor %vm871_vm1, %vm4010_vm3  ;;  %vm880_vm5 = vcmp.lt.f32.partialorder %v368_v43, 0.5  ;;  %v395_v34 = vld [vmem:[%s4127_s3 + $0x780] sm:$0xff] }
 0x114   : > { %2918 = vst [vmem:[%s4144_s16 + $0x658] sm:$0xff] %v3540_v36  ;;  %v3541_v38 = vsel %vm1383_vm7, 1.0, %v4011_v7  ;;  %vm1384_vm9 = vmxor %vm872_vm4, %vm4010_vm3  ;;  %vm881_vm7 = vcmp.lt.f32.partialorder %v369_v45, 0.5  ;;  %v396_v36 = vld [vmem:[%s4127_s3 + $0x788] sm:$0xff] }
 0x115   : > { %2919 = vst [vmem:[%s4144_s16 + $0x660] sm:$0xff] %v3541_v38  ;;  %v3542_v40 = vsel %vm1384_vm9, 1.0, %v4011_v7  ;;  %vm1385_vm11 = vmxor %vm873_vm6, %vm4010_vm3  ;;  %vm882_vm9 = vcmp.lt.f32.partialorder %v370_v47, 0.5  ;;  %v397_v38 = vld [vmem:[%s4127_s3 + $0x790] sm:$0xff] }
 0x116   : > { %2920 = vst [vmem:[%s4144_s16 + $0x668] sm:$0xff] %v3542_v40  ;;  %v3543_v42 = vsel %vm1385_vm11, 1.0, %v4011_v7  ;;  %vm1386_vm13 = vmxor %vm874_vm8, %vm4010_vm3  ;;  %vm883_vm11 = vcmp.lt.f32.partialorder %v371_v49, 0.5  ;;  %v398_v40 = vld [vmem:[%s4127_s3 + $0x798] sm:$0xff] }
 0x117   : > { %2921 = vst [vmem:[%s4144_s16 + $0x670] sm:$0xff] %v3543_v42  ;;  %v3544_v44 = vsel %vm1386_vm13, 1.0, %v4011_v7  ;;  %vm1387_vm15 = vmxor %vm875_vm10, %vm4010_vm3  ;;  %vm884_vm13 = vcmp.lt.f32.partialorder %v372_v51, 0.5  ;;  %v399_v42 = vld [vmem:[%s4127_s3 + $0x7a0] sm:$0xff] }
 0x118   : > { %2922 = vst [vmem:[%s4144_s16 + $0x678] sm:$0xff] %v3544_v44  ;;  %v3545_v46 = vsel %vm1387_vm15, 1.0, %v4011_v7  ;;  %vm1388_vm1 = vmxor %vm876_vm12, %vm4010_vm3  ;;  %vm885_vm15 = vcmp.lt.f32.partialorder %v373_v53, 0.5  ;;  %v400_v44 = vld [vmem:[%s4127_s3 + $0x7a8] sm:$0xff] }
 0x119   : > { %2923 = vst [vmem:[%s4144_s16 + $0x680] sm:$0xff] %v3545_v46  ;;  %v3546_v48 = vsel %vm1388_vm1, 1.0, %v4011_v7  ;;  %vm1389_vm4 = vmxor %vm877_vm14, %vm4010_vm3  ;;  %vm886_vm1 = vcmp.lt.f32.partialorder %v374_v55, 0.5  ;;  %v401_v46 = vld [vmem:[%s4127_s3 + $0x7b0] sm:$0xff] }
 0x11a   : > { %2924 = vst [vmem:[%s4144_s16 + $0x688] sm:$0xff] %v3546_v48  ;;  %v3547_v50 = vsel %vm1389_vm4, 1.0, %v4011_v7  ;;  %vm1390_vm6 = vmxor %vm878_vm0, %vm4010_vm3  ;;  %vm887_vm4 = vcmp.lt.f32.partialorder %v375_v57, 0.5  ;;  %v402_v48 = vld [vmem:[%s4127_s3 + $0x7b8] sm:$0xff] }
 0x11b   : > { %2925 = vst [vmem:[%s4144_s16 + $0x690] sm:$0xff] %v3547_v50  ;;  %v3548_v52 = vsel %vm1390_vm6, 1.0, %v4011_v7  ;;  %vm1391_vm8 = vmxor %vm879_vm2, %vm4010_vm3  ;;  %vm888_vm6 = vcmp.lt.f32.partialorder %v376_v59, 0.5  ;;  %v403_v50 = vld [vmem:[%s4127_s3 + $0x7c0] sm:$0xff] }
 0x11c   : > { %2926 = vst [vmem:[%s4144_s16 + $0x698] sm:$0xff] %v3548_v52  ;;  %v3549_v54 = vsel %vm1391_vm8, 1.0, %v4011_v7  ;;  %vm1392_vm10 = vmxor %vm880_vm5, %vm4010_vm3  ;;  %vm889_vm8 = vcmp.lt.f32.partialorder %v377_v61, 0.5  ;;  %v404_v52 = vld [vmem:[%s4127_s3 + $0x7c8] sm:$0xff] }
 0x11d   : > { %2927 = vst [vmem:[%s4144_s16 + $0x6a0] sm:$0xff] %v3549_v54  ;;  %v3550_v56 = vsel %vm1392_vm10, 1.0, %v4011_v7  ;;  %vm1393_vm12 = vmxor %vm881_vm7, %vm4010_vm3  ;;  %vm890_vm10 = vcmp.lt.f32.partialorder %v378_v63, 0.5  ;;  %v405_v54 = vld [vmem:[%s4127_s3 + $0x7d0] sm:$0xff] }
 0x11e   : > { %2928 = vst [vmem:[%s4144_s16 + $0x6a8] sm:$0xff] %v3550_v56  ;;  %v3551_v58 = vsel %vm1393_vm12, 1.0, %v4011_v7  ;;  %vm1394_vm14 = vmxor %vm882_vm9, %vm4010_vm3  ;;  %vm891_vm12 = vcmp.lt.f32.partialorder %v379_v1, 0.5  ;;  %v406_v56 = vld [vmem:[%s4127_s3 + $0x7d8] sm:$0xff] }
 0x11f   : > { %2929 = vst [vmem:[%s4144_s16 + $0x6b0] sm:$0xff] %v3551_v58  ;;  %v3552_v60 = vsel %vm1394_vm14, 1.0, %v4011_v7  ;;  %vm1395_vm0 = vmxor %vm883_vm11, %vm4010_vm3  ;;  %vm892_vm14 = vcmp.lt.f32.partialorder %v380_v3, 0.5  ;;  %v407_v58 = vld [vmem:[%s4127_s3 + $0x7e0] sm:$0xff] }
 0x120   : > { %2930 = vst [vmem:[%s4144_s16 + $0x6b8] sm:$0xff] %v3552_v60  ;;  %v3553_v62 = vsel %vm1395_vm0, 1.0, %v4011_v7  ;;  %vm1396_vm2 = vmxor %vm884_vm13, %vm4010_vm3  ;;  %vm893_vm0 = vcmp.lt.f32.partialorder %v381_v5, 0.5  ;;  %v408_v60 = vld [vmem:[%s4127_s3 + $0x7e8] sm:$0xff] }
 0x121   : > { %2931 = vst [vmem:[%s4144_s16 + $0x6c0] sm:$0xff] %v3553_v62  ;;  %v3554_v0 = vsel %vm1396_vm2, 1.0, %v4011_v7  ;;  %vm1397_vm5 = vmxor %vm885_vm15, %vm4010_vm3  ;;  %vm894_vm2 = vcmp.lt.f32.partialorder %v382_v8, 0.5  ;;  %v409_v62 = vld [vmem:[%s4127_s3 + $0x7f0] sm:$0xff] }
 0x122   : > { %2932 = vst [vmem:[%s4144_s16 + $0x6c8] sm:$0xff] %v3554_v0  ;;  %v3555_v2 = vsel %vm1397_vm5, 1.0, %v4011_v7  ;;  %vm1398_vm7 = vmxor %vm886_vm1, %vm4010_vm3  ;;  %vm895_vm5 = vcmp.lt.f32.partialorder %v383_v10, 0.5  ;;  %v410_v0 = vld [vmem:[%s4127_s3 + $0x7f8] sm:$0xff] }
 0x123   : > { %2933 = vst [vmem:[%s4144_s16 + $0x6d0] sm:$0xff] %v3555_v2  ;;  %v3556_v4 = vsel %vm1398_vm7, 1.0, %v4011_v7  ;;  %vm1399_vm9 = vmxor %vm887_vm4, %vm4010_vm3  ;;  %vm896_vm7 = vcmp.lt.f32.partialorder %v384_v12, 0.5  ;;  %v411_v2 = vld [vmem:[%s4127_s3 + $0x800] sm:$0xff] }
 0x124   : > { %2934 = vst [vmem:[%s4144_s16 + $0x6d8] sm:$0xff] %v3556_v4  ;;  %v3557_v6 = vsel %vm1399_vm9, 1.0, %v4011_v7  ;;  %vm1400_vm11 = vmxor %vm888_vm6, %vm4010_vm3  ;;  %vm897_vm9 = vcmp.lt.f32.partialorder %v385_v14, 0.5  ;;  %v412_v4 = vld [vmem:[%s4127_s3 + $0x808] sm:$0xff] }
 0x125   : > { %2935 = vst [vmem:[%s4144_s16 + $0x6e0] sm:$0xff] %v3557_v6  ;;  %v3558_v9 = vsel %vm1400_vm11, 1.0, %v4011_v7  ;;  %vm1401_vm13 = vmxor %vm889_vm8, %vm4010_vm3  ;;  %vm898_vm11 = vcmp.lt.f32.partialorder %v386_v16, 0.5  ;;  %v413_v6 = vld [vmem:[%s4127_s3 + $0x810] sm:$0xff] }
 0x126   : > { %2936 = vst [vmem:[%s4144_s16 + $0x6e8] sm:$0xff] %v3558_v9  ;;  %v3559_v11 = vsel %vm1401_vm13, 1.0, %v4011_v7  ;;  %vm1402_vm15 = vmxor %vm890_vm10, %vm4010_vm3  ;;  %vm899_vm13 = vcmp.lt.f32.partialorder %v387_v18, 0.5  ;;  %v414_v9 = vld [vmem:[%s4127_s3 + $0x818] sm:$0xff] }
 0x127   : > { %2937 = vst [vmem:[%s4144_s16 + $0x6f0] sm:$0xff] %v3559_v11  ;;  %v3560_v13 = vsel %vm1402_vm15, 1.0, %v4011_v7  ;;  %vm1403_vm1 = vmxor %vm891_vm12, %vm4010_vm3  ;;  %vm900_vm15 = vcmp.lt.f32.partialorder %v388_v20, 0.5  ;;  %v415_v11 = vld [vmem:[%s4127_s3 + $0x820] sm:$0xff] }
 0x128   : > { %2938 = vst [vmem:[%s4144_s16 + $0x6f8] sm:$0xff] %v3560_v13  ;;  %v3561_v15 = vsel %vm1403_vm1, 1.0, %v4011_v7  ;;  %vm1404_vm4 = vmxor %vm892_vm14, %vm4010_vm3  ;;  %vm901_vm1 = vcmp.lt.f32.partialorder %v389_v22, 0.5  ;;  %v416_v13 = vld [vmem:[%s4127_s3 + $0x828] sm:$0xff] }
 0x129   : > { %2939 = vst [vmem:[%s4144_s16 + $0x700] sm:$0xff] %v3561_v15  ;;  %v3562_v17 = vsel %vm1404_vm4, 1.0, %v4011_v7  ;;  %vm1405_vm6 = vmxor %vm893_vm0, %vm4010_vm3  ;;  %vm902_vm4 = vcmp.lt.f32.partialorder %v390_v24, 0.5  ;;  %v417_v15 = vld [vmem:[%s4127_s3 + $0x830] sm:$0xff] }
 0x12a   : > { %2940 = vst [vmem:[%s4144_s16 + $0x708] sm:$0xff] %v3562_v17  ;;  %v3563_v19 = vsel %vm1405_vm6, 1.0, %v4011_v7  ;;  %vm1406_vm8 = vmxor %vm894_vm2, %vm4010_vm3  ;;  %vm903_vm6 = vcmp.lt.f32.partialorder %v391_v26, 0.5  ;;  %v418_v17 = vld [vmem:[%s4127_s3 + $0x838] sm:$0xff] }
 0x12b   : > { %2941 = vst [vmem:[%s4144_s16 + $0x710] sm:$0xff] %v3563_v19  ;;  %v3564_v21 = vsel %vm1406_vm8, 1.0, %v4011_v7  ;;  %vm1407_vm10 = vmxor %vm895_vm5, %vm4010_vm3  ;;  %vm904_vm8 = vcmp.lt.f32.partialorder %v392_v28, 0.5  ;;  %v419_v19 = vld [vmem:[%s4127_s3 + $0x840] sm:$0xff] }
 0x12c   : > { %2942 = vst [vmem:[%s4144_s16 + $0x718] sm:$0xff] %v3564_v21  ;;  %v3565_v23 = vsel %vm1407_vm10, 1.0, %v4011_v7  ;;  %vm1408_vm12 = vmxor %vm896_vm7, %vm4010_vm3  ;;  %vm905_vm10 = vcmp.lt.f32.partialorder %v393_v30, 0.5  ;;  %v420_v21 = vld [vmem:[%s4127_s3 + $0x848] sm:$0xff] }
 0x12d   : > { %2943 = vst [vmem:[%s4144_s16 + $0x720] sm:$0xff] %v3565_v23  ;;  %v3566_v25 = vsel %vm1408_vm12, 1.0, %v4011_v7  ;;  %vm1409_vm14 = vmxor %vm897_vm9, %vm4010_vm3  ;;  %vm906_vm12 = vcmp.lt.f32.partialorder %v394_v32, 0.5  ;;  %v421_v23 = vld [vmem:[%s4127_s3 + $0x850] sm:$0xff] }
 0x12e   : > { %2944 = vst [vmem:[%s4144_s16 + $0x728] sm:$0xff] %v3566_v25  ;;  %v3567_v27 = vsel %vm1409_vm14, 1.0, %v4011_v7  ;;  %vm1410_vm0 = vmxor %vm898_vm11, %vm4010_vm3  ;;  %vm907_vm14 = vcmp.lt.f32.partialorder %v395_v34, 0.5  ;;  %v422_v25 = vld [vmem:[%s4127_s3 + $0x858] sm:$0xff] }
 0x12f   : > { %2945 = vst [vmem:[%s4144_s16 + $0x730] sm:$0xff] %v3567_v27  ;;  %v3568_v29 = vsel %vm1410_vm0, 1.0, %v4011_v7  ;;  %vm1411_vm2 = vmxor %vm899_vm13, %vm4010_vm3  ;;  %vm908_vm0 = vcmp.lt.f32.partialorder %v396_v36, 0.5  ;;  %v423_v27 = vld [vmem:[%s4127_s3 + $0x860] sm:$0xff] }
 0x130   : > { %2946 = vst [vmem:[%s4144_s16 + $0x738] sm:$0xff] %v3568_v29  ;;  %v3569_v31 = vsel %vm1411_vm2, 1.0, %v4011_v7  ;;  %vm1412_vm5 = vmxor %vm900_vm15, %vm4010_vm3  ;;  %vm909_vm2 = vcmp.lt.f32.partialorder %v397_v38, 0.5  ;;  %v424_v29 = vld [vmem:[%s4127_s3 + $0x868] sm:$0xff] }
 0x131   : > { %2947 = vst [vmem:[%s4144_s16 + $0x740] sm:$0xff] %v3569_v31  ;;  %v3570_v33 = vsel %vm1412_vm5, 1.0, %v4011_v7  ;;  %vm1413_vm7 = vmxor %vm901_vm1, %vm4010_vm3  ;;  %vm910_vm5 = vcmp.lt.f32.partialorder %v398_v40, 0.5  ;;  %v425_v31 = vld [vmem:[%s4127_s3 + $0x870] sm:$0xff] }
 0x132   : > { %2948 = vst [vmem:[%s4144_s16 + $0x748] sm:$0xff] %v3570_v33  ;;  %v3571_v35 = vsel %vm1413_vm7, 1.0, %v4011_v7  ;;  %vm1414_vm9 = vmxor %vm902_vm4, %vm4010_vm3  ;;  %vm911_vm7 = vcmp.lt.f32.partialorder %v399_v42, 0.5  ;;  %v426_v33 = vld [vmem:[%s4127_s3 + $0x878] sm:$0xff] }
 0x133   : > { %2949 = vst [vmem:[%s4144_s16 + $0x750] sm:$0xff] %v3571_v35  ;;  %v3572_v37 = vsel %vm1414_vm9, 1.0, %v4011_v7  ;;  %vm1415_vm11 = vmxor %vm903_vm6, %vm4010_vm3  ;;  %vm912_vm9 = vcmp.lt.f32.partialorder %v400_v44, 0.5  ;;  %v427_v35 = vld [vmem:[%s4127_s3 + $0x880] sm:$0xff] }
 0x134   : > { %2950 = vst [vmem:[%s4144_s16 + $0x758] sm:$0xff] %v3572_v37  ;;  %v3573_v39 = vsel %vm1415_vm11, 1.0, %v4011_v7  ;;  %vm1416_vm13 = vmxor %vm904_vm8, %vm4010_vm3  ;;  %vm913_vm11 = vcmp.lt.f32.partialorder %v401_v46, 0.5  ;;  %v428_v37 = vld [vmem:[%s4127_s3 + $0x888] sm:$0xff] }
 0x135   : > { %2951 = vst [vmem:[%s4144_s16 + $0x760] sm:$0xff] %v3573_v39  ;;  %v3574_v41 = vsel %vm1416_vm13, 1.0, %v4011_v7  ;;  %vm1417_vm15 = vmxor %vm905_vm10, %vm4010_vm3  ;;  %vm914_vm13 = vcmp.lt.f32.partialorder %v402_v48, 0.5  ;;  %v429_v39 = vld [vmem:[%s4127_s3 + $0x890] sm:$0xff] }
 0x136   : > { %2952 = vst [vmem:[%s4144_s16 + $0x768] sm:$0xff] %v3574_v41  ;;  %v3575_v43 = vsel %vm1417_vm15, 1.0, %v4011_v7  ;;  %vm1418_vm1 = vmxor %vm906_vm12, %vm4010_vm3  ;;  %vm915_vm15 = vcmp.lt.f32.partialorder %v403_v50, 0.5  ;;  %v430_v41 = vld [vmem:[%s4127_s3 + $0x898] sm:$0xff] }
 0x137   : > { %2953 = vst [vmem:[%s4144_s16 + $0x770] sm:$0xff] %v3575_v43  ;;  %v3576_v45 = vsel %vm1418_vm1, 1.0, %v4011_v7  ;;  %vm1419_vm4 = vmxor %vm907_vm14, %vm4010_vm3  ;;  %vm916_vm1 = vcmp.lt.f32.partialorder %v404_v52, 0.5  ;;  %v431_v43 = vld [vmem:[%s4127_s3 + $0x8a0] sm:$0xff] }
 0x138   : > { %2954 = vst [vmem:[%s4144_s16 + $0x778] sm:$0xff] %v3576_v45  ;;  %v3577_v47 = vsel %vm1419_vm4, 1.0, %v4011_v7  ;;  %vm1420_vm6 = vmxor %vm908_vm0, %vm4010_vm3  ;;  %vm917_vm4 = vcmp.lt.f32.partialorder %v405_v54, 0.5  ;;  %v432_v45 = vld [vmem:[%s4127_s3 + $0x8a8] sm:$0xff] }
 0x139   : > { %2955 = vst [vmem:[%s4144_s16 + $0x780] sm:$0xff] %v3577_v47  ;;  %v3578_v49 = vsel %vm1420_vm6, 1.0, %v4011_v7  ;;  %vm1421_vm8 = vmxor %vm909_vm2, %vm4010_vm3  ;;  %vm918_vm6 = vcmp.lt.f32.partialorder %v406_v56, 0.5  ;;  %v433_v47 = vld [vmem:[%s4127_s3 + $0x8b0] sm:$0xff] }
 0x13a   : > { %2956 = vst [vmem:[%s4144_s16 + $0x788] sm:$0xff] %v3578_v49  ;;  %v3579_v51 = vsel %vm1421_vm8, 1.0, %v4011_v7  ;;  %vm1422_vm10 = vmxor %vm910_vm5, %vm4010_vm3  ;;  %vm919_vm8 = vcmp.lt.f32.partialorder %v407_v58, 0.5  ;;  %v434_v49 = vld [vmem:[%s4127_s3 + $0x8b8] sm:$0xff] }
 0x13b   : > { %2957 = vst [vmem:[%s4144_s16 + $0x790] sm:$0xff] %v3579_v51  ;;  %v3580_v53 = vsel %vm1422_vm10, 1.0, %v4011_v7  ;;  %vm1423_vm12 = vmxor %vm911_vm7, %vm4010_vm3  ;;  %vm920_vm10 = vcmp.lt.f32.partialorder %v408_v60, 0.5  ;;  %v435_v51 = vld [vmem:[%s4127_s3 + $0x8c0] sm:$0xff] }
 0x13c   : > { %2958 = vst [vmem:[%s4144_s16 + $0x798] sm:$0xff] %v3580_v53  ;;  %v3581_v55 = vsel %vm1423_vm12, 1.0, %v4011_v7  ;;  %vm1424_vm14 = vmxor %vm912_vm9, %vm4010_vm3  ;;  %vm921_vm12 = vcmp.lt.f32.partialorder %v409_v62, 0.5  ;;  %v436_v53 = vld [vmem:[%s4127_s3 + $0x8c8] sm:$0xff] }
 0x13d   : > { %2959 = vst [vmem:[%s4144_s16 + $0x7a0] sm:$0xff] %v3581_v55  ;;  %v3582_v57 = vsel %vm1424_vm14, 1.0, %v4011_v7  ;;  %vm1425_vm0 = vmxor %vm913_vm11, %vm4010_vm3  ;;  %vm922_vm14 = vcmp.lt.f32.partialorder %v410_v0, 0.5  ;;  %v437_v55 = vld [vmem:[%s4127_s3 + $0x8d0] sm:$0xff] }
 0x13e   : > { %2960 = vst [vmem:[%s4144_s16 + $0x7a8] sm:$0xff] %v3582_v57  ;;  %v3583_v59 = vsel %vm1425_vm0, 1.0, %v4011_v7  ;;  %vm1426_vm2 = vmxor %vm914_vm13, %vm4010_vm3  ;;  %vm923_vm0 = vcmp.lt.f32.partialorder %v411_v2, 0.5  ;;  %v438_v57 = vld [vmem:[%s4127_s3 + $0x8d8] sm:$0xff] }
 0x13f   : > { %2961 = vst [vmem:[%s4144_s16 + $0x7b0] sm:$0xff] %v3583_v59  ;;  %v3584_v61 = vsel %vm1426_vm2, 1.0, %v4011_v7  ;;  %vm1427_vm5 = vmxor %vm915_vm15, %vm4010_vm3  ;;  %vm924_vm2 = vcmp.lt.f32.partialorder %v412_v4, 0.5  ;;  %v439_v59 = vld [vmem:[%s4127_s3 + $0x8e0] sm:$0xff] }
 0x140   : > { %2962 = vst [vmem:[%s4144_s16 + $0x7b8] sm:$0xff] %v3584_v61  ;;  %v3585_v63 = vsel %vm1427_vm5, 1.0, %v4011_v7  ;;  %vm1428_vm7 = vmxor %vm916_vm1, %vm4010_vm3  ;;  %vm925_vm5 = vcmp.lt.f32.partialorder %v413_v6, 0.5  ;;  %v440_v61 = vld [vmem:[%s4127_s3 + $0x8e8] sm:$0xff] }
 0x141   : > { %2963 = vst [vmem:[%s4144_s16 + $0x7c0] sm:$0xff] %v3585_v63  ;;  %v3586_v1 = vsel %vm1428_vm7, 1.0, %v4011_v7  ;;  %vm1429_vm9 = vmxor %vm917_vm4, %vm4010_vm3  ;;  %vm926_vm7 = vcmp.lt.f32.partialorder %v414_v9, 0.5  ;;  %v441_v63 = vld [vmem:[%s4127_s3 + $0x8f0] sm:$0xff] }
 0x142   : > { %2964 = vst [vmem:[%s4144_s16 + $0x7c8] sm:$0xff] %v3586_v1  ;;  %v3587_v3 = vsel %vm1429_vm9, 1.0, %v4011_v7  ;;  %vm1430_vm11 = vmxor %vm918_vm6, %vm4010_vm3  ;;  %vm927_vm9 = vcmp.lt.f32.partialorder %v415_v11, 0.5  ;;  %v442_v1 = vld [vmem:[%s4127_s3 + $0x8f8] sm:$0xff] }
 0x143   : > { %2965 = vst [vmem:[%s4144_s16 + $0x7d0] sm:$0xff] %v3587_v3  ;;  %v3588_v5 = vsel %vm1430_vm11, 1.0, %v4011_v7  ;;  %vm1431_vm13 = vmxor %vm919_vm8, %vm4010_vm3  ;;  %vm928_vm11 = vcmp.lt.f32.partialorder %v416_v13, 0.5  ;;  %v443_v3 = vld [vmem:[%s4127_s3 + $0x900] sm:$0xff] }
 0x144   : > { %2966 = vst [vmem:[%s4144_s16 + $0x7d8] sm:$0xff] %v3588_v5  ;;  %v3589_v8 = vsel %vm1431_vm13, 1.0, %v4011_v7  ;;  %vm1432_vm15 = vmxor %vm920_vm10, %vm4010_vm3  ;;  %vm929_vm13 = vcmp.lt.f32.partialorder %v417_v15, 0.5  ;;  %v444_v5 = vld [vmem:[%s4127_s3 + $0x908] sm:$0xff] }
 0x145   : > { %2967 = vst [vmem:[%s4144_s16 + $0x7e0] sm:$0xff] %v3589_v8  ;;  %v3590_v10 = vsel %vm1432_vm15, 1.0, %v4011_v7  ;;  %vm1433_vm1 = vmxor %vm921_vm12, %vm4010_vm3  ;;  %vm930_vm15 = vcmp.lt.f32.partialorder %v418_v17, 0.5  ;;  %v445_v8 = vld [vmem:[%s4127_s3 + $0x910] sm:$0xff] }
 0x146   : > { %2968 = vst [vmem:[%s4144_s16 + $0x7e8] sm:$0xff] %v3590_v10  ;;  %v3591_v12 = vsel %vm1433_vm1, 1.0, %v4011_v7  ;;  %vm1434_vm4 = vmxor %vm922_vm14, %vm4010_vm3  ;;  %vm931_vm1 = vcmp.lt.f32.partialorder %v419_v19, 0.5  ;;  %v446_v10 = vld [vmem:[%s4127_s3 + $0x918] sm:$0xff] }
 0x147   : > { %2969 = vst [vmem:[%s4144_s16 + $0x7f0] sm:$0xff] %v3591_v12  ;;  %v3592_v14 = vsel %vm1434_vm4, 1.0, %v4011_v7  ;;  %vm1435_vm6 = vmxor %vm923_vm0, %vm4010_vm3  ;;  %vm932_vm4 = vcmp.lt.f32.partialorder %v420_v21, 0.5  ;;  %v447_v12 = vld [vmem:[%s4127_s3 + $0x920] sm:$0xff] }
 0x148   : > { %2970 = vst [vmem:[%s4144_s16 + $0x7f8] sm:$0xff] %v3592_v14  ;;  %v3593_v16 = vsel %vm1435_vm6, 1.0, %v4011_v7  ;;  %vm1436_vm8 = vmxor %vm924_vm2, %vm4010_vm3  ;;  %vm933_vm6 = vcmp.lt.f32.partialorder %v421_v23, 0.5  ;;  %v448_v14 = vld [vmem:[%s4127_s3 + $0x928] sm:$0xff] }
 0x149   : > { %2971 = vst [vmem:[%s4144_s16 + $0x800] sm:$0xff] %v3593_v16  ;;  %v3594_v18 = vsel %vm1436_vm8, 1.0, %v4011_v7  ;;  %vm1437_vm10 = vmxor %vm925_vm5, %vm4010_vm3  ;;  %vm934_vm8 = vcmp.lt.f32.partialorder %v422_v25, 0.5  ;;  %v449_v16 = vld [vmem:[%s4127_s3 + $0x930] sm:$0xff] }
 0x14a   : > { %2972 = vst [vmem:[%s4144_s16 + $0x808] sm:$0xff] %v3594_v18  ;;  %v3595_v20 = vsel %vm1437_vm10, 1.0, %v4011_v7  ;;  %vm1438_vm12 = vmxor %vm926_vm7, %vm4010_vm3  ;;  %vm935_vm10 = vcmp.lt.f32.partialorder %v423_v27, 0.5  ;;  %v450_v18 = vld [vmem:[%s4127_s3 + $0x938] sm:$0xff] }
 0x14b   : > { %2973 = vst [vmem:[%s4144_s16 + $0x810] sm:$0xff] %v3595_v20  ;;  %v3596_v22 = vsel %vm1438_vm12, 1.0, %v4011_v7  ;;  %vm1439_vm14 = vmxor %vm927_vm9, %vm4010_vm3  ;;  %vm936_vm12 = vcmp.lt.f32.partialorder %v424_v29, 0.5  ;;  %v451_v20 = vld [vmem:[%s4127_s3 + $0x940] sm:$0xff] }
 0x14c   : > { %2974 = vst [vmem:[%s4144_s16 + $0x818] sm:$0xff] %v3596_v22  ;;  %v3597_v24 = vsel %vm1439_vm14, 1.0, %v4011_v7  ;;  %vm1440_vm0 = vmxor %vm928_vm11, %vm4010_vm3  ;;  %vm937_vm14 = vcmp.lt.f32.partialorder %v425_v31, 0.5  ;;  %v452_v22 = vld [vmem:[%s4127_s3 + $0x948] sm:$0xff] }
 0x14d   : > { %2975 = vst [vmem:[%s4144_s16 + $0x820] sm:$0xff] %v3597_v24  ;;  %v3598_v26 = vsel %vm1440_vm0, 1.0, %v4011_v7  ;;  %vm1441_vm2 = vmxor %vm929_vm13, %vm4010_vm3  ;;  %vm938_vm0 = vcmp.lt.f32.partialorder %v426_v33, 0.5  ;;  %v453_v24 = vld [vmem:[%s4127_s3 + $0x950] sm:$0xff] }
 0x14e   : > { %2976 = vst [vmem:[%s4144_s16 + $0x828] sm:$0xff] %v3598_v26  ;;  %v3599_v28 = vsel %vm1441_vm2, 1.0, %v4011_v7  ;;  %vm1442_vm5 = vmxor %vm930_vm15, %vm4010_vm3  ;;  %vm939_vm2 = vcmp.lt.f32.partialorder %v427_v35, 0.5  ;;  %v454_v26 = vld [vmem:[%s4127_s3 + $0x958] sm:$0xff] }
 0x14f   : > { %2977 = vst [vmem:[%s4144_s16 + $0x830] sm:$0xff] %v3599_v28  ;;  %v3600_v30 = vsel %vm1442_vm5, 1.0, %v4011_v7  ;;  %vm1443_vm7 = vmxor %vm931_vm1, %vm4010_vm3  ;;  %vm940_vm5 = vcmp.lt.f32.partialorder %v428_v37, 0.5  ;;  %v455_v28 = vld [vmem:[%s4127_s3 + $0x960] sm:$0xff] }
 0x150   : > { %2978 = vst [vmem:[%s4144_s16 + $0x838] sm:$0xff] %v3600_v30  ;;  %v3601_v32 = vsel %vm1443_vm7, 1.0, %v4011_v7  ;;  %vm1444_vm9 = vmxor %vm932_vm4, %vm4010_vm3  ;;  %vm941_vm7 = vcmp.lt.f32.partialorder %v429_v39, 0.5  ;;  %v456_v30 = vld [vmem:[%s4127_s3 + $0x968] sm:$0xff] }
 0x151   : > { %2979 = vst [vmem:[%s4144_s16 + $0x840] sm:$0xff] %v3601_v32  ;;  %v3602_v34 = vsel %vm1444_vm9, 1.0, %v4011_v7  ;;  %vm1445_vm11 = vmxor %vm933_vm6, %vm4010_vm3  ;;  %vm942_vm9 = vcmp.lt.f32.partialorder %v430_v41, 0.5  ;;  %v457_v32 = vld [vmem:[%s4127_s3 + $0x970] sm:$0xff] }
 0x152   : > { %2980 = vst [vmem:[%s4144_s16 + $0x848] sm:$0xff] %v3602_v34  ;;  %v3603_v36 = vsel %vm1445_vm11, 1.0, %v4011_v7  ;;  %vm1446_vm13 = vmxor %vm934_vm8, %vm4010_vm3  ;;  %vm943_vm11 = vcmp.lt.f32.partialorder %v431_v43, 0.5  ;;  %v458_v34 = vld [vmem:[%s4127_s3 + $0x978] sm:$0xff] }
 0x153   : > { %2981 = vst [vmem:[%s4144_s16 + $0x850] sm:$0xff] %v3603_v36  ;;  %v3604_v38 = vsel %vm1446_vm13, 1.0, %v4011_v7  ;;  %vm1447_vm15 = vmxor %vm935_vm10, %vm4010_vm3  ;;  %vm944_vm13 = vcmp.lt.f32.partialorder %v432_v45, 0.5  ;;  %v459_v36 = vld [vmem:[%s4127_s3 + $0x980] sm:$0xff] }
 0x154   : > { %2982 = vst [vmem:[%s4144_s16 + $0x858] sm:$0xff] %v3604_v38  ;;  %v3605_v40 = vsel %vm1447_vm15, 1.0, %v4011_v7  ;;  %vm1448_vm1 = vmxor %vm936_vm12, %vm4010_vm3  ;;  %vm945_vm15 = vcmp.lt.f32.partialorder %v433_v47, 0.5  ;;  %v460_v38 = vld [vmem:[%s4127_s3 + $0x988] sm:$0xff] }
 0x155   : > { %2983 = vst [vmem:[%s4144_s16 + $0x860] sm:$0xff] %v3605_v40  ;;  %v3606_v42 = vsel %vm1448_vm1, 1.0, %v4011_v7  ;;  %vm1449_vm4 = vmxor %vm937_vm14, %vm4010_vm3  ;;  %vm946_vm1 = vcmp.lt.f32.partialorder %v434_v49, 0.5  ;;  %v461_v40 = vld [vmem:[%s4127_s3 + $0x990] sm:$0xff] }
 0x156   : > { %2984 = vst [vmem:[%s4144_s16 + $0x868] sm:$0xff] %v3606_v42  ;;  %v3607_v44 = vsel %vm1449_vm4, 1.0, %v4011_v7  ;;  %vm1450_vm6 = vmxor %vm938_vm0, %vm4010_vm3  ;;  %vm947_vm4 = vcmp.lt.f32.partialorder %v435_v51, 0.5  ;;  %v462_v42 = vld [vmem:[%s4127_s3 + $0x998] sm:$0xff] }
 0x157   : > { %2985 = vst [vmem:[%s4144_s16 + $0x870] sm:$0xff] %v3607_v44  ;;  %v3608_v46 = vsel %vm1450_vm6, 1.0, %v4011_v7  ;;  %vm1451_vm8 = vmxor %vm939_vm2, %vm4010_vm3  ;;  %vm948_vm6 = vcmp.lt.f32.partialorder %v436_v53, 0.5  ;;  %v463_v44 = vld [vmem:[%s4127_s3 + $0x9a0] sm:$0xff] }
 0x158   : > { %2986 = vst [vmem:[%s4144_s16 + $0x878] sm:$0xff] %v3608_v46  ;;  %v3609_v48 = vsel %vm1451_vm8, 1.0, %v4011_v7  ;;  %vm1452_vm10 = vmxor %vm940_vm5, %vm4010_vm3  ;;  %vm949_vm8 = vcmp.lt.f32.partialorder %v437_v55, 0.5  ;;  %v464_v46 = vld [vmem:[%s4127_s3 + $0x9a8] sm:$0xff] }
 0x159   : > { %2987 = vst [vmem:[%s4144_s16 + $0x880] sm:$0xff] %v3609_v48  ;;  %v3610_v50 = vsel %vm1452_vm10, 1.0, %v4011_v7  ;;  %vm1453_vm12 = vmxor %vm941_vm7, %vm4010_vm3  ;;  %vm950_vm10 = vcmp.lt.f32.partialorder %v438_v57, 0.5  ;;  %v465_v48 = vld [vmem:[%s4127_s3 + $0x9b0] sm:$0xff] }
 0x15a   : > { %2988 = vst [vmem:[%s4144_s16 + $0x888] sm:$0xff] %v3610_v50  ;;  %v3611_v52 = vsel %vm1453_vm12, 1.0, %v4011_v7  ;;  %vm1454_vm14 = vmxor %vm942_vm9, %vm4010_vm3  ;;  %vm951_vm12 = vcmp.lt.f32.partialorder %v439_v59, 0.5  ;;  %v466_v50 = vld [vmem:[%s4127_s3 + $0x9b8] sm:$0xff] }
 0x15b   : > { %2989 = vst [vmem:[%s4144_s16 + $0x890] sm:$0xff] %v3611_v52  ;;  %v3612_v54 = vsel %vm1454_vm14, 1.0, %v4011_v7  ;;  %vm1455_vm0 = vmxor %vm943_vm11, %vm4010_vm3  ;;  %vm952_vm14 = vcmp.lt.f32.partialorder %v440_v61, 0.5  ;;  %v467_v52 = vld [vmem:[%s4127_s3 + $0x9c0] sm:$0xff] }
 0x15c   : > { %2990 = vst [vmem:[%s4144_s16 + $0x898] sm:$0xff] %v3612_v54  ;;  %v3613_v56 = vsel %vm1455_vm0, 1.0, %v4011_v7  ;;  %vm1456_vm2 = vmxor %vm944_vm13, %vm4010_vm3  ;;  %vm953_vm0 = vcmp.lt.f32.partialorder %v441_v63, 0.5  ;;  %v468_v54 = vld [vmem:[%s4127_s3 + $0x9c8] sm:$0xff] }
 0x15d   : > { %2991 = vst [vmem:[%s4144_s16 + $0x8a0] sm:$0xff] %v3613_v56  ;;  %v3614_v58 = vsel %vm1456_vm2, 1.0, %v4011_v7  ;;  %vm1457_vm5 = vmxor %vm945_vm15, %vm4010_vm3  ;;  %vm954_vm2 = vcmp.lt.f32.partialorder %v442_v1, 0.5  ;;  %v469_v56 = vld [vmem:[%s4127_s3 + $0x9d0] sm:$0xff] }
 0x15e   : > { %2992 = vst [vmem:[%s4144_s16 + $0x8a8] sm:$0xff] %v3614_v58  ;;  %v3615_v60 = vsel %vm1457_vm5, 1.0, %v4011_v7  ;;  %vm1458_vm7 = vmxor %vm946_vm1, %vm4010_vm3  ;;  %vm955_vm5 = vcmp.lt.f32.partialorder %v443_v3, 0.5  ;;  %v470_v58 = vld [vmem:[%s4127_s3 + $0x9d8] sm:$0xff] }
 0x15f   : > { %2993 = vst [vmem:[%s4144_s16 + $0x8b0] sm:$0xff] %v3615_v60  ;;  %v3616_v62 = vsel %vm1458_vm7, 1.0, %v4011_v7  ;;  %vm1459_vm9 = vmxor %vm947_vm4, %vm4010_vm3  ;;  %vm956_vm7 = vcmp.lt.f32.partialorder %v444_v5, 0.5  ;;  %v471_v60 = vld [vmem:[%s4127_s3 + $0x9e0] sm:$0xff] }
 0x160   : > { %2994 = vst [vmem:[%s4144_s16 + $0x8b8] sm:$0xff] %v3616_v62  ;;  %v3617_v0 = vsel %vm1459_vm9, 1.0, %v4011_v7  ;;  %vm1460_vm11 = vmxor %vm948_vm6, %vm4010_vm3  ;;  %vm957_vm9 = vcmp.lt.f32.partialorder %v445_v8, 0.5  ;;  %v472_v62 = vld [vmem:[%s4127_s3 + $0x9e8] sm:$0xff] }
 0x161   : > { %2995 = vst [vmem:[%s4144_s16 + $0x8c0] sm:$0xff] %v3617_v0  ;;  %v3618_v2 = vsel %vm1460_vm11, 1.0, %v4011_v7  ;;  %vm1461_vm13 = vmxor %vm949_vm8, %vm4010_vm3  ;;  %vm958_vm11 = vcmp.lt.f32.partialorder %v446_v10, 0.5  ;;  %v473_v0 = vld [vmem:[%s4127_s3 + $0x9f0] sm:$0xff] }
 0x162   : > { %2996 = vst [vmem:[%s4144_s16 + $0x8c8] sm:$0xff] %v3618_v2  ;;  %v3619_v4 = vsel %vm1461_vm13, 1.0, %v4011_v7  ;;  %vm1462_vm15 = vmxor %vm950_vm10, %vm4010_vm3  ;;  %vm959_vm13 = vcmp.lt.f32.partialorder %v447_v12, 0.5  ;;  %v474_v2 = vld [vmem:[%s4127_s3 + $0x9f8] sm:$0xff] }
 0x163   : > { %2997 = vst [vmem:[%s4144_s16 + $0x8d0] sm:$0xff] %v3619_v4  ;;  %v3620_v6 = vsel %vm1462_vm15, 1.0, %v4011_v7  ;;  %vm1463_vm1 = vmxor %vm951_vm12, %vm4010_vm3  ;;  %vm960_vm15 = vcmp.lt.f32.partialorder %v448_v14, 0.5  ;;  %v475_v4 = vld [vmem:[%s4127_s3 + $0xa00] sm:$0xff] }
 0x164   : > { %2998 = vst [vmem:[%s4144_s16 + $0x8d8] sm:$0xff] %v3620_v6  ;;  %v3621_v9 = vsel %vm1463_vm1, 1.0, %v4011_v7  ;;  %vm1464_vm4 = vmxor %vm952_vm14, %vm4010_vm3  ;;  %vm961_vm1 = vcmp.lt.f32.partialorder %v449_v16, 0.5  ;;  %v476_v6 = vld [vmem:[%s4127_s3 + $0xa08] sm:$0xff] }
 0x165   : > { %2999 = vst [vmem:[%s4144_s16 + $0x8e0] sm:$0xff] %v3621_v9  ;;  %v3622_v11 = vsel %vm1464_vm4, 1.0, %v4011_v7  ;;  %vm1465_vm6 = vmxor %vm953_vm0, %vm4010_vm3  ;;  %vm962_vm4 = vcmp.lt.f32.partialorder %v450_v18, 0.5  ;;  %v477_v9 = vld [vmem:[%s4127_s3 + $0xa10] sm:$0xff] }
 0x166   : > { %3000 = vst [vmem:[%s4144_s16 + $0x8e8] sm:$0xff] %v3622_v11  ;;  %v3623_v13 = vsel %vm1465_vm6, 1.0, %v4011_v7  ;;  %vm1466_vm8 = vmxor %vm954_vm2, %vm4010_vm3  ;;  %vm963_vm6 = vcmp.lt.f32.partialorder %v451_v20, 0.5  ;;  %v478_v11 = vld [vmem:[%s4127_s3 + $0xa18] sm:$0xff] }
 0x167   : > { %3001 = vst [vmem:[%s4144_s16 + $0x8f0] sm:$0xff] %v3623_v13  ;;  %v3624_v15 = vsel %vm1466_vm8, 1.0, %v4011_v7  ;;  %vm1467_vm10 = vmxor %vm955_vm5, %vm4010_vm3  ;;  %vm964_vm8 = vcmp.lt.f32.partialorder %v452_v22, 0.5  ;;  %v479_v13 = vld [vmem:[%s4127_s3 + $0xa20] sm:$0xff] }
 0x168   : > { %3002 = vst [vmem:[%s4144_s16 + $0x8f8] sm:$0xff] %v3624_v15  ;;  %v3625_v17 = vsel %vm1467_vm10, 1.0, %v4011_v7  ;;  %vm1468_vm12 = vmxor %vm956_vm7, %vm4010_vm3  ;;  %vm965_vm10 = vcmp.lt.f32.partialorder %v453_v24, 0.5  ;;  %v480_v15 = vld [vmem:[%s4127_s3 + $0xa28] sm:$0xff] }
 0x169   : > { %3003 = vst [vmem:[%s4144_s16 + $0x900] sm:$0xff] %v3625_v17  ;;  %v3626_v19 = vsel %vm1468_vm12, 1.0, %v4011_v7  ;;  %vm1469_vm14 = vmxor %vm957_vm9, %vm4010_vm3  ;;  %vm966_vm12 = vcmp.lt.f32.partialorder %v454_v26, 0.5  ;;  %v481_v17 = vld [vmem:[%s4127_s3 + $0xa30] sm:$0xff] }
 0x16a   : > { %3004 = vst [vmem:[%s4144_s16 + $0x908] sm:$0xff] %v3626_v19  ;;  %v3627_v21 = vsel %vm1469_vm14, 1.0, %v4011_v7  ;;  %vm1470_vm0 = vmxor %vm958_vm11, %vm4010_vm3  ;;  %vm967_vm14 = vcmp.lt.f32.partialorder %v455_v28, 0.5  ;;  %v482_v19 = vld [vmem:[%s4127_s3 + $0xa38] sm:$0xff] }
 0x16b   : > { %3005 = vst [vmem:[%s4144_s16 + $0x910] sm:$0xff] %v3627_v21  ;;  %v3628_v23 = vsel %vm1470_vm0, 1.0, %v4011_v7  ;;  %vm1471_vm2 = vmxor %vm959_vm13, %vm4010_vm3  ;;  %vm968_vm0 = vcmp.lt.f32.partialorder %v456_v30, 0.5  ;;  %v483_v21 = vld [vmem:[%s4127_s3 + $0xa40] sm:$0xff] }
 0x16c   : > { %3006 = vst [vmem:[%s4144_s16 + $0x918] sm:$0xff] %v3628_v23  ;;  %v3629_v25 = vsel %vm1471_vm2, 1.0, %v4011_v7  ;;  %vm1472_vm5 = vmxor %vm960_vm15, %vm4010_vm3  ;;  %vm969_vm2 = vcmp.lt.f32.partialorder %v457_v32, 0.5  ;;  %v484_v23 = vld [vmem:[%s4127_s3 + $0xa48] sm:$0xff] }
 0x16d   : > { %3007 = vst [vmem:[%s4144_s16 + $0x920] sm:$0xff] %v3629_v25  ;;  %v3630_v27 = vsel %vm1472_vm5, 1.0, %v4011_v7  ;;  %vm1473_vm7 = vmxor %vm961_vm1, %vm4010_vm3  ;;  %vm970_vm5 = vcmp.lt.f32.partialorder %v458_v34, 0.5  ;;  %v485_v25 = vld [vmem:[%s4127_s3 + $0xa50] sm:$0xff] }
 0x16e   : > { %3008 = vst [vmem:[%s4144_s16 + $0x928] sm:$0xff] %v3630_v27  ;;  %v3631_v29 = vsel %vm1473_vm7, 1.0, %v4011_v7  ;;  %vm1474_vm9 = vmxor %vm962_vm4, %vm4010_vm3  ;;  %vm971_vm7 = vcmp.lt.f32.partialorder %v459_v36, 0.5  ;;  %v486_v27 = vld [vmem:[%s4127_s3 + $0xa58] sm:$0xff] }
 0x16f   : > { %3009 = vst [vmem:[%s4144_s16 + $0x930] sm:$0xff] %v3631_v29  ;;  %v3632_v31 = vsel %vm1474_vm9, 1.0, %v4011_v7  ;;  %vm1475_vm11 = vmxor %vm963_vm6, %vm4010_vm3  ;;  %vm972_vm9 = vcmp.lt.f32.partialorder %v460_v38, 0.5  ;;  %v487_v29 = vld [vmem:[%s4127_s3 + $0xa60] sm:$0xff] }
 0x170   : > { %3010 = vst [vmem:[%s4144_s16 + $0x938] sm:$0xff] %v3632_v31  ;;  %v3633_v33 = vsel %vm1475_vm11, 1.0, %v4011_v7  ;;  %vm1476_vm13 = vmxor %vm964_vm8, %vm4010_vm3  ;;  %vm973_vm11 = vcmp.lt.f32.partialorder %v461_v40, 0.5  ;;  %v488_v31 = vld [vmem:[%s4127_s3 + $0xa68] sm:$0xff] }
 0x171   : > { %3011 = vst [vmem:[%s4144_s16 + $0x940] sm:$0xff] %v3633_v33  ;;  %v3634_v35 = vsel %vm1476_vm13, 1.0, %v4011_v7  ;;  %vm1477_vm15 = vmxor %vm965_vm10, %vm4010_vm3  ;;  %vm974_vm13 = vcmp.lt.f32.partialorder %v462_v42, 0.5  ;;  %v489_v33 = vld [vmem:[%s4127_s3 + $0xa70] sm:$0xff] }
 0x172   : > { %3012 = vst [vmem:[%s4144_s16 + $0x948] sm:$0xff] %v3634_v35  ;;  %v3635_v37 = vsel %vm1477_vm15, 1.0, %v4011_v7  ;;  %vm1478_vm1 = vmxor %vm966_vm12, %vm4010_vm3  ;;  %vm975_vm15 = vcmp.lt.f32.partialorder %v463_v44, 0.5  ;;  %v490_v35 = vld [vmem:[%s4127_s3 + $0xa78] sm:$0xff] }
 0x173   : > { %3013 = vst [vmem:[%s4144_s16 + $0x950] sm:$0xff] %v3635_v37  ;;  %v3636_v39 = vsel %vm1478_vm1, 1.0, %v4011_v7  ;;  %vm1479_vm4 = vmxor %vm967_vm14, %vm4010_vm3  ;;  %vm976_vm1 = vcmp.lt.f32.partialorder %v464_v46, 0.5  ;;  %v491_v37 = vld [vmem:[%s4127_s3 + $0xa80] sm:$0xff] }
 0x174   : > { %3014 = vst [vmem:[%s4144_s16 + $0x958] sm:$0xff] %v3636_v39  ;;  %v3637_v41 = vsel %vm1479_vm4, 1.0, %v4011_v7  ;;  %vm1480_vm6 = vmxor %vm968_vm0, %vm4010_vm3  ;;  %vm977_vm4 = vcmp.lt.f32.partialorder %v465_v48, 0.5  ;;  %v492_v39 = vld [vmem:[%s4127_s3 + $0xa88] sm:$0xff] }
 0x175   : > { %3015 = vst [vmem:[%s4144_s16 + $0x960] sm:$0xff] %v3637_v41  ;;  %v3638_v43 = vsel %vm1480_vm6, 1.0, %v4011_v7  ;;  %vm1481_vm8 = vmxor %vm969_vm2, %vm4010_vm3  ;;  %vm978_vm6 = vcmp.lt.f32.partialorder %v466_v50, 0.5  ;;  %v493_v41 = vld [vmem:[%s4127_s3 + $0xa90] sm:$0xff] }
 0x176   : > { %3016 = vst [vmem:[%s4144_s16 + $0x968] sm:$0xff] %v3638_v43  ;;  %v3639_v45 = vsel %vm1481_vm8, 1.0, %v4011_v7  ;;  %vm1482_vm10 = vmxor %vm970_vm5, %vm4010_vm3  ;;  %vm979_vm8 = vcmp.lt.f32.partialorder %v467_v52, 0.5  ;;  %v494_v43 = vld [vmem:[%s4127_s3 + $0xa98] sm:$0xff] }
 0x177   : > { %3017 = vst [vmem:[%s4144_s16 + $0x970] sm:$0xff] %v3639_v45  ;;  %v3640_v47 = vsel %vm1482_vm10, 1.0, %v4011_v7  ;;  %vm1483_vm12 = vmxor %vm971_vm7, %vm4010_vm3  ;;  %vm980_vm10 = vcmp.lt.f32.partialorder %v468_v54, 0.5  ;;  %v495_v45 = vld [vmem:[%s4127_s3 + $0xaa0] sm:$0xff] }
 0x178   : > { %3018 = vst [vmem:[%s4144_s16 + $0x978] sm:$0xff] %v3640_v47  ;;  %v3641_v49 = vsel %vm1483_vm12, 1.0, %v4011_v7  ;;  %vm1484_vm14 = vmxor %vm972_vm9, %vm4010_vm3  ;;  %vm981_vm12 = vcmp.lt.f32.partialorder %v469_v56, 0.5  ;;  %v496_v47 = vld [vmem:[%s4127_s3 + $0xaa8] sm:$0xff] }
 0x179   : > { %3019 = vst [vmem:[%s4144_s16 + $0x980] sm:$0xff] %v3641_v49  ;;  %v3642_v51 = vsel %vm1484_vm14, 1.0, %v4011_v7  ;;  %vm1485_vm0 = vmxor %vm973_vm11, %vm4010_vm3  ;;  %vm982_vm14 = vcmp.lt.f32.partialorder %v470_v58, 0.5  ;;  %v497_v49 = vld [vmem:[%s4127_s3 + $0xab0] sm:$0xff] }
 0x17a   : > { %3020 = vst [vmem:[%s4144_s16 + $0x988] sm:$0xff] %v3642_v51  ;;  %v3643_v53 = vsel %vm1485_vm0, 1.0, %v4011_v7  ;;  %vm1486_vm2 = vmxor %vm974_vm13, %vm4010_vm3  ;;  %vm983_vm0 = vcmp.lt.f32.partialorder %v471_v60, 0.5  ;;  %v498_v51 = vld [vmem:[%s4127_s3 + $0xab8] sm:$0xff] }
 0x17b   : > { %3021 = vst [vmem:[%s4144_s16 + $0x990] sm:$0xff] %v3643_v53  ;;  %v3644_v55 = vsel %vm1486_vm2, 1.0, %v4011_v7  ;;  %vm1487_vm5 = vmxor %vm975_vm15, %vm4010_vm3  ;;  %vm984_vm2 = vcmp.lt.f32.partialorder %v472_v62, 0.5  ;;  %v499_v53 = vld [vmem:[%s4127_s3 + $0xac0] sm:$0xff] }
 0x17c   : > { %3022 = vst [vmem:[%s4144_s16 + $0x998] sm:$0xff] %v3644_v55  ;;  %v3645_v57 = vsel %vm1487_vm5, 1.0, %v4011_v7  ;;  %vm1488_vm7 = vmxor %vm976_vm1, %vm4010_vm3  ;;  %vm985_vm5 = vcmp.lt.f32.partialorder %v473_v0, 0.5  ;;  %v500_v55 = vld [vmem:[%s4127_s3 + $0xac8] sm:$0xff] }
 0x17d   : > { %3023 = vst [vmem:[%s4144_s16 + $0x9a0] sm:$0xff] %v3645_v57  ;;  %v3646_v59 = vsel %vm1488_vm7, 1.0, %v4011_v7  ;;  %vm1489_vm9 = vmxor %vm977_vm4, %vm4010_vm3  ;;  %vm986_vm7 = vcmp.lt.f32.partialorder %v474_v2, 0.5  ;;  %v501_v57 = vld [vmem:[%s4127_s3 + $0xad0] sm:$0xff] }
 0x17e   : > { %3024 = vst [vmem:[%s4144_s16 + $0x9a8] sm:$0xff] %v3646_v59  ;;  %v3647_v61 = vsel %vm1489_vm9, 1.0, %v4011_v7  ;;  %vm1490_vm11 = vmxor %vm978_vm6, %vm4010_vm3  ;;  %vm987_vm9 = vcmp.lt.f32.partialorder %v475_v4, 0.5  ;;  %v502_v59 = vld [vmem:[%s4127_s3 + $0xad8] sm:$0xff] }
 0x17f   : > { %3025 = vst [vmem:[%s4144_s16 + $0x9b0] sm:$0xff] %v3647_v61  ;;  %v3648_v63 = vsel %vm1490_vm11, 1.0, %v4011_v7  ;;  %vm1491_vm13 = vmxor %vm979_vm8, %vm4010_vm3  ;;  %vm988_vm11 = vcmp.lt.f32.partialorder %v476_v6, 0.5  ;;  %v503_v61 = vld [vmem:[%s4127_s3 + $0xae0] sm:$0xff] }
 0x180   : > { %3026 = vst [vmem:[%s4144_s16 + $0x9b8] sm:$0xff] %v3648_v63  ;;  %v3649_v1 = vsel %vm1491_vm13, 1.0, %v4011_v7  ;;  %vm1492_vm15 = vmxor %vm980_vm10, %vm4010_vm3  ;;  %vm989_vm13 = vcmp.lt.f32.partialorder %v477_v9, 0.5  ;;  %v504_v63 = vld [vmem:[%s4127_s3 + $0xae8] sm:$0xff] }
 0x181   : > { %3027 = vst [vmem:[%s4144_s16 + $0x9c0] sm:$0xff] %v3649_v1  ;;  %v3650_v3 = vsel %vm1492_vm15, 1.0, %v4011_v7  ;;  %vm1493_vm1 = vmxor %vm981_vm12, %vm4010_vm3  ;;  %vm990_vm15 = vcmp.lt.f32.partialorder %v478_v11, 0.5  ;;  %v505_v1 = vld [vmem:[%s4127_s3 + $0xaf0] sm:$0xff] }
 0x182   : > { %3028 = vst [vmem:[%s4144_s16 + $0x9c8] sm:$0xff] %v3650_v3  ;;  %v3651_v5 = vsel %vm1493_vm1, 1.0, %v4011_v7  ;;  %vm1494_vm4 = vmxor %vm982_vm14, %vm4010_vm3  ;;  %vm991_vm1 = vcmp.lt.f32.partialorder %v479_v13, 0.5  ;;  %v506_v3 = vld [vmem:[%s4127_s3 + $0xaf8] sm:$0xff] }
 0x183   : > { %3029 = vst [vmem:[%s4144_s16 + $0x9d0] sm:$0xff] %v3651_v5  ;;  %v3652_v8 = vsel %vm1494_vm4, 1.0, %v4011_v7  ;;  %vm1495_vm6 = vmxor %vm983_vm0, %vm4010_vm3  ;;  %vm992_vm4 = vcmp.lt.f32.partialorder %v480_v15, 0.5  ;;  %v507_v5 = vld [vmem:[%s4127_s3 + $0xb00] sm:$0xff] }
 0x184   : > { %3030 = vst [vmem:[%s4144_s16 + $0x9d8] sm:$0xff] %v3652_v8  ;;  %v3653_v10 = vsel %vm1495_vm6, 1.0, %v4011_v7  ;;  %vm1496_vm8 = vmxor %vm984_vm2, %vm4010_vm3  ;;  %vm993_vm6 = vcmp.lt.f32.partialorder %v481_v17, 0.5  ;;  %v508_v8 = vld [vmem:[%s4127_s3 + $0xb08] sm:$0xff] }
 0x185   : > { %3031 = vst [vmem:[%s4144_s16 + $0x9e0] sm:$0xff] %v3653_v10  ;;  %v3654_v12 = vsel %vm1496_vm8, 1.0, %v4011_v7  ;;  %vm1497_vm10 = vmxor %vm985_vm5, %vm4010_vm3  ;;  %vm994_vm8 = vcmp.lt.f32.partialorder %v482_v19, 0.5  ;;  %v509_v10 = vld [vmem:[%s4127_s3 + $0xb10] sm:$0xff] }
 0x186   : > { %3032 = vst [vmem:[%s4144_s16 + $0x9e8] sm:$0xff] %v3654_v12  ;;  %v3655_v14 = vsel %vm1497_vm10, 1.0, %v4011_v7  ;;  %vm1498_vm12 = vmxor %vm986_vm7, %vm4010_vm3  ;;  %vm995_vm10 = vcmp.lt.f32.partialorder %v483_v21, 0.5  ;;  %v510_v12 = vld [vmem:[%s4127_s3 + $0xb18] sm:$0xff] }
 0x187   : > { %3033 = vst [vmem:[%s4144_s16 + $0x9f0] sm:$0xff] %v3655_v14  ;;  %v3656_v16 = vsel %vm1498_vm12, 1.0, %v4011_v7  ;;  %vm1499_vm14 = vmxor %vm987_vm9, %vm4010_vm3  ;;  %vm996_vm12 = vcmp.lt.f32.partialorder %v484_v23, 0.5  ;;  %v511_v14 = vld [vmem:[%s4127_s3 + $0xb20] sm:$0xff] }
 0x188   : > { %3034 = vst [vmem:[%s4144_s16 + $0x9f8] sm:$0xff] %v3656_v16  ;;  %v3657_v18 = vsel %vm1499_vm14, 1.0, %v4011_v7  ;;  %vm1500_vm0 = vmxor %vm988_vm11, %vm4010_vm3  ;;  %vm997_vm14 = vcmp.lt.f32.partialorder %v485_v25, 0.5  ;;  %v512_v16 = vld [vmem:[%s4127_s3 + $0xb28] sm:$0xff] }
 0x189   : > { %3035 = vst [vmem:[%s4144_s16 + $0xa00] sm:$0xff] %v3657_v18  ;;  %v3658_v20 = vsel %vm1500_vm0, 1.0, %v4011_v7  ;;  %vm1501_vm2 = vmxor %vm989_vm13, %vm4010_vm3  ;;  %vm998_vm0 = vcmp.lt.f32.partialorder %v486_v27, 0.5  ;;  %v513_v18 = vld [vmem:[%s4127_s3 + $0xb30] sm:$0xff] }
 0x18a   : > { %3036 = vst [vmem:[%s4144_s16 + $0xa08] sm:$0xff] %v3658_v20  ;;  %v3659_v22 = vsel %vm1501_vm2, 1.0, %v4011_v7  ;;  %vm1502_vm5 = vmxor %vm990_vm15, %vm4010_vm3  ;;  %vm999_vm2 = vcmp.lt.f32.partialorder %v487_v29, 0.5  ;;  %v514_v20 = vld [vmem:[%s4127_s3 + $0xb38] sm:$0xff] }
 0x18b   : > { %3037 = vst [vmem:[%s4144_s16 + $0xa10] sm:$0xff] %v3659_v22  ;;  %v3660_v24 = vsel %vm1502_vm5, 1.0, %v4011_v7  ;;  %vm1503_vm7 = vmxor %vm991_vm1, %vm4010_vm3  ;;  %vm1000_vm5 = vcmp.lt.f32.partialorder %v488_v31, 0.5  ;;  %v515_v22 = vld [vmem:[%s4127_s3 + $0xb40] sm:$0xff] }
 0x18c   : > { %3038 = vst [vmem:[%s4144_s16 + $0xa18] sm:$0xff] %v3660_v24  ;;  %v3661_v26 = vsel %vm1503_vm7, 1.0, %v4011_v7  ;;  %vm1504_vm9 = vmxor %vm992_vm4, %vm4010_vm3  ;;  %vm1001_vm7 = vcmp.lt.f32.partialorder %v489_v33, 0.5  ;;  %v516_v24 = vld [vmem:[%s4127_s3 + $0xb48] sm:$0xff] }
 0x18d   : > { %3039 = vst [vmem:[%s4144_s16 + $0xa20] sm:$0xff] %v3661_v26  ;;  %v3662_v28 = vsel %vm1504_vm9, 1.0, %v4011_v7  ;;  %vm1505_vm11 = vmxor %vm993_vm6, %vm4010_vm3  ;;  %vm1002_vm9 = vcmp.lt.f32.partialorder %v490_v35, 0.5  ;;  %v517_v26 = vld [vmem:[%s4127_s3 + $0xb50] sm:$0xff] }
 0x18e   : > { %3040 = vst [vmem:[%s4144_s16 + $0xa28] sm:$0xff] %v3662_v28  ;;  %v3663_v30 = vsel %vm1505_vm11, 1.0, %v4011_v7  ;;  %vm1506_vm13 = vmxor %vm994_vm8, %vm4010_vm3  ;;  %vm1003_vm11 = vcmp.lt.f32.partialorder %v491_v37, 0.5  ;;  %v518_v28 = vld [vmem:[%s4127_s3 + $0xb58] sm:$0xff] }
 0x18f   : > { %3041 = vst [vmem:[%s4144_s16 + $0xa30] sm:$0xff] %v3663_v30  ;;  %v3664_v32 = vsel %vm1506_vm13, 1.0, %v4011_v7  ;;  %vm1507_vm15 = vmxor %vm995_vm10, %vm4010_vm3  ;;  %vm1004_vm13 = vcmp.lt.f32.partialorder %v492_v39, 0.5  ;;  %v519_v30 = vld [vmem:[%s4127_s3 + $0xb60] sm:$0xff] }
 0x190   : > { %3042 = vst [vmem:[%s4144_s16 + $0xa38] sm:$0xff] %v3664_v32  ;;  %v3665_v34 = vsel %vm1507_vm15, 1.0, %v4011_v7  ;;  %vm1508_vm1 = vmxor %vm996_vm12, %vm4010_vm3  ;;  %vm1005_vm15 = vcmp.lt.f32.partialorder %v493_v41, 0.5  ;;  %v520_v32 = vld [vmem:[%s4127_s3 + $0xb68] sm:$0xff] }
 0x191   : > { %3043 = vst [vmem:[%s4144_s16 + $0xa40] sm:$0xff] %v3665_v34  ;;  %v3666_v36 = vsel %vm1508_vm1, 1.0, %v4011_v7  ;;  %vm1509_vm4 = vmxor %vm997_vm14, %vm4010_vm3  ;;  %vm1006_vm1 = vcmp.lt.f32.partialorder %v494_v43, 0.5  ;;  %v521_v34 = vld [vmem:[%s4127_s3 + $0xb70] sm:$0xff] }
 0x192   : > { %3044 = vst [vmem:[%s4144_s16 + $0xa48] sm:$0xff] %v3666_v36  ;;  %v3667_v38 = vsel %vm1509_vm4, 1.0, %v4011_v7  ;;  %vm1510_vm6 = vmxor %vm998_vm0, %vm4010_vm3  ;;  %vm1007_vm4 = vcmp.lt.f32.partialorder %v495_v45, 0.5  ;;  %v522_v36 = vld [vmem:[%s4127_s3 + $0xb78] sm:$0xff] }
 0x193   : > { %3045 = vst [vmem:[%s4144_s16 + $0xa50] sm:$0xff] %v3667_v38  ;;  %v3668_v40 = vsel %vm1510_vm6, 1.0, %v4011_v7  ;;  %vm1511_vm8 = vmxor %vm999_vm2, %vm4010_vm3  ;;  %vm1008_vm6 = vcmp.lt.f32.partialorder %v496_v47, 0.5  ;;  %v523_v38 = vld [vmem:[%s4127_s3 + $0xb80] sm:$0xff] }
 0x194   : > { %3046 = vst [vmem:[%s4144_s16 + $0xa58] sm:$0xff] %v3668_v40  ;;  %v3669_v42 = vsel %vm1511_vm8, 1.0, %v4011_v7  ;;  %vm1512_vm10 = vmxor %vm1000_vm5, %vm4010_vm3  ;;  %vm1009_vm8 = vcmp.lt.f32.partialorder %v497_v49, 0.5  ;;  %v524_v40 = vld [vmem:[%s4127_s3 + $0xb88] sm:$0xff] }
 0x195   : > { %3047 = vst [vmem:[%s4144_s16 + $0xa60] sm:$0xff] %v3669_v42  ;;  %v3670_v44 = vsel %vm1512_vm10, 1.0, %v4011_v7  ;;  %vm1513_vm12 = vmxor %vm1001_vm7, %vm4010_vm3  ;;  %vm1010_vm10 = vcmp.lt.f32.partialorder %v498_v51, 0.5  ;;  %v525_v42 = vld [vmem:[%s4127_s3 + $0xb90] sm:$0xff] }
 0x196   : > { %3048 = vst [vmem:[%s4144_s16 + $0xa68] sm:$0xff] %v3670_v44  ;;  %v3671_v46 = vsel %vm1513_vm12, 1.0, %v4011_v7  ;;  %vm1514_vm14 = vmxor %vm1002_vm9, %vm4010_vm3  ;;  %vm1011_vm12 = vcmp.lt.f32.partialorder %v499_v53, 0.5  ;;  %v526_v44 = vld [vmem:[%s4127_s3 + $0xb98] sm:$0xff] }
 0x197   : > { %3049 = vst [vmem:[%s4144_s16 + $0xa70] sm:$0xff] %v3671_v46  ;;  %v3672_v48 = vsel %vm1514_vm14, 1.0, %v4011_v7  ;;  %vm1515_vm0 = vmxor %vm1003_vm11, %vm4010_vm3  ;;  %vm1012_vm14 = vcmp.lt.f32.partialorder %v500_v55, 0.5  ;;  %v527_v46 = vld [vmem:[%s4127_s3 + $0xba0] sm:$0xff] }
 0x198   : > { %3050 = vst [vmem:[%s4144_s16 + $0xa78] sm:$0xff] %v3672_v48  ;;  %v3673_v50 = vsel %vm1515_vm0, 1.0, %v4011_v7  ;;  %vm1516_vm2 = vmxor %vm1004_vm13, %vm4010_vm3  ;;  %vm1013_vm0 = vcmp.lt.f32.partialorder %v501_v57, 0.5  ;;  %v528_v48 = vld [vmem:[%s4127_s3 + $0xba8] sm:$0xff] }
 0x199   : > { %3051 = vst [vmem:[%s4144_s16 + $0xa80] sm:$0xff] %v3673_v50  ;;  %v3674_v52 = vsel %vm1516_vm2, 1.0, %v4011_v7  ;;  %vm1517_vm5 = vmxor %vm1005_vm15, %vm4010_vm3  ;;  %vm1014_vm2 = vcmp.lt.f32.partialorder %v502_v59, 0.5  ;;  %v529_v50 = vld [vmem:[%s4127_s3 + $0xbb0] sm:$0xff] }
 0x19a   : > { %3052 = vst [vmem:[%s4144_s16 + $0xa88] sm:$0xff] %v3674_v52  ;;  %v3675_v54 = vsel %vm1517_vm5, 1.0, %v4011_v7  ;;  %vm1518_vm7 = vmxor %vm1006_vm1, %vm4010_vm3  ;;  %vm1015_vm5 = vcmp.lt.f32.partialorder %v503_v61, 0.5  ;;  %v530_v52 = vld [vmem:[%s4127_s3 + $0xbb8] sm:$0xff] }
 0x19b   : > { %3053 = vst [vmem:[%s4144_s16 + $0xa90] sm:$0xff] %v3675_v54  ;;  %v3676_v56 = vsel %vm1518_vm7, 1.0, %v4011_v7  ;;  %vm1519_vm9 = vmxor %vm1007_vm4, %vm4010_vm3  ;;  %vm1016_vm7 = vcmp.lt.f32.partialorder %v504_v63, 0.5  ;;  %v531_v54 = vld [vmem:[%s4127_s3 + $0xbc0] sm:$0xff] }
 0x19c   : > { %3054 = vst [vmem:[%s4144_s16 + $0xa98] sm:$0xff] %v3676_v56  ;;  %v3677_v58 = vsel %vm1519_vm9, 1.0, %v4011_v7  ;;  %vm1520_vm11 = vmxor %vm1008_vm6, %vm4010_vm3  ;;  %vm1017_vm9 = vcmp.lt.f32.partialorder %v505_v1, 0.5  ;;  %v532_v56 = vld [vmem:[%s4127_s3 + $0xbc8] sm:$0xff] }
 0x19d   : > { %3055 = vst [vmem:[%s4144_s16 + $0xaa0] sm:$0xff] %v3677_v58  ;;  %v3678_v60 = vsel %vm1520_vm11, 1.0, %v4011_v7  ;;  %vm1521_vm13 = vmxor %vm1009_vm8, %vm4010_vm3  ;;  %vm1018_vm11 = vcmp.lt.f32.partialorder %v506_v3, 0.5  ;;  %v533_v58 = vld [vmem:[%s4127_s3 + $0xbd0] sm:$0xff] }
 0x19e   : > { %3056 = vst [vmem:[%s4144_s16 + $0xaa8] sm:$0xff] %v3678_v60  ;;  %v3679_v62 = vsel %vm1521_vm13, 1.0, %v4011_v7  ;;  %vm1522_vm15 = vmxor %vm1010_vm10, %vm4010_vm3  ;;  %vm1019_vm13 = vcmp.lt.f32.partialorder %v507_v5, 0.5  ;;  %v534_v60 = vld [vmem:[%s4127_s3 + $0xbd8] sm:$0xff] }
 0x19f   : > { %3057 = vst [vmem:[%s4144_s16 + $0xab0] sm:$0xff] %v3679_v62  ;;  %v3680_v0 = vsel %vm1522_vm15, 1.0, %v4011_v7  ;;  %vm1523_vm1 = vmxor %vm1011_vm12, %vm4010_vm3  ;;  %vm1020_vm15 = vcmp.lt.f32.partialorder %v508_v8, 0.5  ;;  %v535_v62 = vld [vmem:[%s4127_s3 + $0xbe0] sm:$0xff] }
 0x1a0   : > { %3058 = vst [vmem:[%s4144_s16 + $0xab8] sm:$0xff] %v3680_v0  ;;  %v3681_v2 = vsel %vm1523_vm1, 1.0, %v4011_v7  ;;  %vm1524_vm4 = vmxor %vm1012_vm14, %vm4010_vm3  ;;  %vm1021_vm1 = vcmp.lt.f32.partialorder %v509_v10, 0.5  ;;  %v536_v0 = vld [vmem:[%s4127_s3 + $0xbe8] sm:$0xff] }
 0x1a1   : > { %3059 = vst [vmem:[%s4144_s16 + $0xac0] sm:$0xff] %v3681_v2  ;;  %v3682_v4 = vsel %vm1524_vm4, 1.0, %v4011_v7  ;;  %vm1525_vm6 = vmxor %vm1013_vm0, %vm4010_vm3  ;;  %vm1022_vm4 = vcmp.lt.f32.partialorder %v510_v12, 0.5  ;;  %v537_v2 = vld [vmem:[%s4127_s3 + $0xbf0] sm:$0xff] }
 0x1a2   : > { %3060 = vst [vmem:[%s4144_s16 + $0xac8] sm:$0xff] %v3682_v4  ;;  %v3683_v6 = vsel %vm1525_vm6, 1.0, %v4011_v7  ;;  %vm1526_vm8 = vmxor %vm1014_vm2, %vm4010_vm3  ;;  %vm1023_vm6 = vcmp.lt.f32.partialorder %v511_v14, 0.5  ;;  %v538_v4 = vld [vmem:[%s4127_s3 + $0xbf8] sm:$0xff] }
 0x1a3   : > { %3061 = vst [vmem:[%s4144_s16 + $0xad0] sm:$0xff] %v3683_v6  ;;  %v3684_v9 = vsel %vm1526_vm8, 1.0, %v4011_v7  ;;  %vm1527_vm10 = vmxor %vm1015_vm5, %vm4010_vm3  ;;  %vm1024_vm8 = vcmp.lt.f32.partialorder %v512_v16, 0.5  ;;  %v539_v6 = vld [vmem:[%s4127_s3 + $0xc00] sm:$0xff] }
 0x1a4   : > { %3062 = vst [vmem:[%s4144_s16 + $0xad8] sm:$0xff] %v3684_v9  ;;  %v3685_v11 = vsel %vm1527_vm10, 1.0, %v4011_v7  ;;  %vm1528_vm12 = vmxor %vm1016_vm7, %vm4010_vm3  ;;  %vm1025_vm10 = vcmp.lt.f32.partialorder %v513_v18, 0.5  ;;  %v540_v9 = vld [vmem:[%s4127_s3 + $0xc08] sm:$0xff] }
 0x1a5   : > { %3063 = vst [vmem:[%s4144_s16 + $0xae0] sm:$0xff] %v3685_v11  ;;  %v3686_v13 = vsel %vm1528_vm12, 1.0, %v4011_v7  ;;  %vm1529_vm14 = vmxor %vm1017_vm9, %vm4010_vm3  ;;  %vm1026_vm12 = vcmp.lt.f32.partialorder %v514_v20, 0.5  ;;  %v541_v11 = vld [vmem:[%s4127_s3 + $0xc10] sm:$0xff] }
 0x1a6   : > { %3064 = vst [vmem:[%s4144_s16 + $0xae8] sm:$0xff] %v3686_v13  ;;  %v3687_v15 = vsel %vm1529_vm14, 1.0, %v4011_v7  ;;  %vm1530_vm0 = vmxor %vm1018_vm11, %vm4010_vm3  ;;  %vm1027_vm14 = vcmp.lt.f32.partialorder %v515_v22, 0.5  ;;  %v542_v13 = vld [vmem:[%s4127_s3 + $0xc18] sm:$0xff] }
 0x1a7   : > { %3065 = vst [vmem:[%s4144_s16 + $0xaf0] sm:$0xff] %v3687_v15  ;;  %v3688_v17 = vsel %vm1530_vm0, 1.0, %v4011_v7  ;;  %vm1531_vm2 = vmxor %vm1019_vm13, %vm4010_vm3  ;;  %vm1028_vm0 = vcmp.lt.f32.partialorder %v516_v24, 0.5  ;;  %v543_v15 = vld [vmem:[%s4127_s3 + $0xc20] sm:$0xff] }
 0x1a8   : > { %3066 = vst [vmem:[%s4144_s16 + $0xaf8] sm:$0xff] %v3688_v17  ;;  %v3689_v19 = vsel %vm1531_vm2, 1.0, %v4011_v7  ;;  %vm1532_vm5 = vmxor %vm1020_vm15, %vm4010_vm3  ;;  %vm1029_vm2 = vcmp.lt.f32.partialorder %v517_v26, 0.5  ;;  %v544_v17 = vld [vmem:[%s4127_s3 + $0xc28] sm:$0xff] }
 0x1a9   : > { %3067 = vst [vmem:[%s4144_s16 + $0xb00] sm:$0xff] %v3689_v19  ;;  %v3690_v21 = vsel %vm1532_vm5, 1.0, %v4011_v7  ;;  %vm1533_vm7 = vmxor %vm1021_vm1, %vm4010_vm3  ;;  %vm1030_vm5 = vcmp.lt.f32.partialorder %v518_v28, 0.5  ;;  %v545_v19 = vld [vmem:[%s4127_s3 + $0xc30] sm:$0xff] }
 0x1aa   : > { %3068 = vst [vmem:[%s4144_s16 + $0xb08] sm:$0xff] %v3690_v21  ;;  %v3691_v23 = vsel %vm1533_vm7, 1.0, %v4011_v7  ;;  %vm1534_vm9 = vmxor %vm1022_vm4, %vm4010_vm3  ;;  %vm1031_vm7 = vcmp.lt.f32.partialorder %v519_v30, 0.5  ;;  %v546_v21 = vld [vmem:[%s4127_s3 + $0xc38] sm:$0xff] }
 0x1ab   : > { %3069 = vst [vmem:[%s4144_s16 + $0xb10] sm:$0xff] %v3691_v23  ;;  %v3692_v25 = vsel %vm1534_vm9, 1.0, %v4011_v7  ;;  %vm1535_vm11 = vmxor %vm1023_vm6, %vm4010_vm3  ;;  %vm1032_vm9 = vcmp.lt.f32.partialorder %v520_v32, 0.5  ;;  %v547_v23 = vld [vmem:[%s4127_s3 + $0xc40] sm:$0xff] }
 0x1ac   : > { %3070 = vst [vmem:[%s4144_s16 + $0xb18] sm:$0xff] %v3692_v25  ;;  %v3693_v27 = vsel %vm1535_vm11, 1.0, %v4011_v7  ;;  %vm1536_vm13 = vmxor %vm1024_vm8, %vm4010_vm3  ;;  %vm1033_vm11 = vcmp.lt.f32.partialorder %v521_v34, 0.5  ;;  %v548_v25 = vld [vmem:[%s4127_s3 + $0xc48] sm:$0xff] }
 0x1ad   : > { %3071 = vst [vmem:[%s4144_s16 + $0xb20] sm:$0xff] %v3693_v27  ;;  %v3694_v29 = vsel %vm1536_vm13, 1.0, %v4011_v7  ;;  %vm1537_vm15 = vmxor %vm1025_vm10, %vm4010_vm3  ;;  %vm1034_vm13 = vcmp.lt.f32.partialorder %v522_v36, 0.5  ;;  %v549_v27 = vld [vmem:[%s4127_s3 + $0xc50] sm:$0xff] }
 0x1ae   : > { %3072 = vst [vmem:[%s4144_s16 + $0xb28] sm:$0xff] %v3694_v29  ;;  %v3695_v31 = vsel %vm1537_vm15, 1.0, %v4011_v7  ;;  %vm1538_vm1 = vmxor %vm1026_vm12, %vm4010_vm3  ;;  %vm1035_vm15 = vcmp.lt.f32.partialorder %v523_v38, 0.5  ;;  %v550_v29 = vld [vmem:[%s4127_s3 + $0xc58] sm:$0xff] }
 0x1af   : > { %3073 = vst [vmem:[%s4144_s16 + $0xb30] sm:$0xff] %v3695_v31  ;;  %v3696_v33 = vsel %vm1538_vm1, 1.0, %v4011_v7  ;;  %vm1539_vm4 = vmxor %vm1027_vm14, %vm4010_vm3  ;;  %vm1036_vm1 = vcmp.lt.f32.partialorder %v524_v40, 0.5  ;;  %v551_v31 = vld [vmem:[%s4127_s3 + $0xc60] sm:$0xff] }
 0x1b0   : > { %3074 = vst [vmem:[%s4144_s16 + $0xb38] sm:$0xff] %v3696_v33  ;;  %v3697_v35 = vsel %vm1539_vm4, 1.0, %v4011_v7  ;;  %vm1540_vm6 = vmxor %vm1028_vm0, %vm4010_vm3  ;;  %vm1037_vm4 = vcmp.lt.f32.partialorder %v525_v42, 0.5  ;;  %v552_v33 = vld [vmem:[%s4127_s3 + $0xc68] sm:$0xff] }
 0x1b1   : > { %3075 = vst [vmem:[%s4144_s16 + $0xb40] sm:$0xff] %v3697_v35  ;;  %v3698_v37 = vsel %vm1540_vm6, 1.0, %v4011_v7  ;;  %vm1541_vm8 = vmxor %vm1029_vm2, %vm4010_vm3  ;;  %vm1038_vm6 = vcmp.lt.f32.partialorder %v526_v44, 0.5  ;;  %v553_v35 = vld [vmem:[%s4127_s3 + $0xc70] sm:$0xff] }
 0x1b2   : > { %3076 = vst [vmem:[%s4144_s16 + $0xb48] sm:$0xff] %v3698_v37  ;;  %v3699_v39 = vsel %vm1541_vm8, 1.0, %v4011_v7  ;;  %vm1542_vm10 = vmxor %vm1030_vm5, %vm4010_vm3  ;;  %vm1039_vm8 = vcmp.lt.f32.partialorder %v527_v46, 0.5  ;;  %v554_v37 = vld [vmem:[%s4127_s3 + $0xc78] sm:$0xff] }
 0x1b3   : > { %3077 = vst [vmem:[%s4144_s16 + $0xb50] sm:$0xff] %v3699_v39  ;;  %v3700_v41 = vsel %vm1542_vm10, 1.0, %v4011_v7  ;;  %vm1543_vm12 = vmxor %vm1031_vm7, %vm4010_vm3  ;;  %vm1040_vm10 = vcmp.lt.f32.partialorder %v528_v48, 0.5  ;;  %v555_v39 = vld [vmem:[%s4127_s3 + $0xc80] sm:$0xff] }
 0x1b4   : > { %3078 = vst [vmem:[%s4144_s16 + $0xb58] sm:$0xff] %v3700_v41  ;;  %v3701_v43 = vsel %vm1543_vm12, 1.0, %v4011_v7  ;;  %vm1544_vm14 = vmxor %vm1032_vm9, %vm4010_vm3  ;;  %vm1041_vm12 = vcmp.lt.f32.partialorder %v529_v50, 0.5  ;;  %v556_v41 = vld [vmem:[%s4127_s3 + $0xc88] sm:$0xff] }
 0x1b5   : > { %3079 = vst [vmem:[%s4144_s16 + $0xb60] sm:$0xff] %v3701_v43  ;;  %v3702_v45 = vsel %vm1544_vm14, 1.0, %v4011_v7  ;;  %vm1545_vm0 = vmxor %vm1033_vm11, %vm4010_vm3  ;;  %vm1042_vm14 = vcmp.lt.f32.partialorder %v530_v52, 0.5  ;;  %v557_v43 = vld [vmem:[%s4127_s3 + $0xc90] sm:$0xff] }
 0x1b6   : > { %3080 = vst [vmem:[%s4144_s16 + $0xb68] sm:$0xff] %v3702_v45  ;;  %v3703_v47 = vsel %vm1545_vm0, 1.0, %v4011_v7  ;;  %vm1546_vm2 = vmxor %vm1034_vm13, %vm4010_vm3  ;;  %vm1043_vm0 = vcmp.lt.f32.partialorder %v531_v54, 0.5  ;;  %v558_v45 = vld [vmem:[%s4127_s3 + $0xc98] sm:$0xff] }
 0x1b7   : > { %3081 = vst [vmem:[%s4144_s16 + $0xb70] sm:$0xff] %v3703_v47  ;;  %v3704_v49 = vsel %vm1546_vm2, 1.0, %v4011_v7  ;;  %vm1547_vm5 = vmxor %vm1035_vm15, %vm4010_vm3  ;;  %vm1044_vm2 = vcmp.lt.f32.partialorder %v532_v56, 0.5  ;;  %v559_v47 = vld [vmem:[%s4127_s3 + $0xca0] sm:$0xff] }
 0x1b8   : > { %3082 = vst [vmem:[%s4144_s16 + $0xb78] sm:$0xff] %v3704_v49  ;;  %v3705_v51 = vsel %vm1547_vm5, 1.0, %v4011_v7  ;;  %vm1548_vm7 = vmxor %vm1036_vm1, %vm4010_vm3  ;;  %vm1045_vm5 = vcmp.lt.f32.partialorder %v533_v58, 0.5  ;;  %v560_v49 = vld [vmem:[%s4127_s3 + $0xca8] sm:$0xff] }
 0x1b9   : > { %3083 = vst [vmem:[%s4144_s16 + $0xb80] sm:$0xff] %v3705_v51  ;;  %v3706_v53 = vsel %vm1548_vm7, 1.0, %v4011_v7  ;;  %vm1549_vm9 = vmxor %vm1037_vm4, %vm4010_vm3  ;;  %vm1046_vm7 = vcmp.lt.f32.partialorder %v534_v60, 0.5  ;;  %v561_v51 = vld [vmem:[%s4127_s3 + $0xcb0] sm:$0xff] }
 0x1ba   : > { %3084 = vst [vmem:[%s4144_s16 + $0xb88] sm:$0xff] %v3706_v53  ;;  %v3707_v55 = vsel %vm1549_vm9, 1.0, %v4011_v7  ;;  %vm1550_vm11 = vmxor %vm1038_vm6, %vm4010_vm3  ;;  %vm1047_vm9 = vcmp.lt.f32.partialorder %v535_v62, 0.5  ;;  %v562_v53 = vld [vmem:[%s4127_s3 + $0xcb8] sm:$0xff] }
 0x1bb   : > { %3085 = vst [vmem:[%s4144_s16 + $0xb90] sm:$0xff] %v3707_v55  ;;  %v3708_v57 = vsel %vm1550_vm11, 1.0, %v4011_v7  ;;  %vm1551_vm13 = vmxor %vm1039_vm8, %vm4010_vm3  ;;  %vm1048_vm11 = vcmp.lt.f32.partialorder %v536_v0, 0.5  ;;  %v563_v55 = vld [vmem:[%s4127_s3 + $0xcc0] sm:$0xff] }
 0x1bc   : > { %3086 = vst [vmem:[%s4144_s16 + $0xb98] sm:$0xff] %v3708_v57  ;;  %v3709_v59 = vsel %vm1551_vm13, 1.0, %v4011_v7  ;;  %vm1552_vm15 = vmxor %vm1040_vm10, %vm4010_vm3  ;;  %vm1049_vm13 = vcmp.lt.f32.partialorder %v537_v2, 0.5  ;;  %v564_v57 = vld [vmem:[%s4127_s3 + $0xcc8] sm:$0xff] }
 0x1bd   : > { %3087 = vst [vmem:[%s4144_s16 + $0xba0] sm:$0xff] %v3709_v59  ;;  %v3710_v61 = vsel %vm1552_vm15, 1.0, %v4011_v7  ;;  %vm1553_vm1 = vmxor %vm1041_vm12, %vm4010_vm3  ;;  %vm1050_vm15 = vcmp.lt.f32.partialorder %v538_v4, 0.5  ;;  %v565_v59 = vld [vmem:[%s4127_s3 + $0xcd0] sm:$0xff] }
 0x1be   : > { %3088 = vst [vmem:[%s4144_s16 + $0xba8] sm:$0xff] %v3710_v61  ;;  %v3711_v63 = vsel %vm1553_vm1, 1.0, %v4011_v7  ;;  %vm1554_vm4 = vmxor %vm1042_vm14, %vm4010_vm3  ;;  %vm1051_vm1 = vcmp.lt.f32.partialorder %v539_v6, 0.5  ;;  %v566_v61 = vld [vmem:[%s4127_s3 + $0xcd8] sm:$0xff] }
 0x1bf   : > { %3089 = vst [vmem:[%s4144_s16 + $0xbb0] sm:$0xff] %v3711_v63  ;;  %v3712_v1 = vsel %vm1554_vm4, 1.0, %v4011_v7  ;;  %vm1555_vm6 = vmxor %vm1043_vm0, %vm4010_vm3  ;;  %vm1052_vm4 = vcmp.lt.f32.partialorder %v540_v9, 0.5  ;;  %v567_v63 = vld [vmem:[%s4127_s3 + $0xce0] sm:$0xff] }
 0x1c0   : > { %3090 = vst [vmem:[%s4144_s16 + $0xbb8] sm:$0xff] %v3712_v1  ;;  %v3713_v3 = vsel %vm1555_vm6, 1.0, %v4011_v7  ;;  %vm1556_vm8 = vmxor %vm1044_vm2, %vm4010_vm3  ;;  %vm1053_vm6 = vcmp.lt.f32.partialorder %v541_v11, 0.5  ;;  %v568_v1 = vld [vmem:[%s4127_s3 + $0xce8] sm:$0xff] }
 0x1c1   : > { %3091 = vst [vmem:[%s4144_s16 + $0xbc0] sm:$0xff] %v3713_v3  ;;  %v3714_v5 = vsel %vm1556_vm8, 1.0, %v4011_v7  ;;  %vm1557_vm10 = vmxor %vm1045_vm5, %vm4010_vm3  ;;  %vm1054_vm8 = vcmp.lt.f32.partialorder %v542_v13, 0.5  ;;  %v569_v3 = vld [vmem:[%s4127_s3 + $0xcf0] sm:$0xff] }
 0x1c2   : > { %3092 = vst [vmem:[%s4144_s16 + $0xbc8] sm:$0xff] %v3714_v5  ;;  %v3715_v8 = vsel %vm1557_vm10, 1.0, %v4011_v7  ;;  %vm1558_vm12 = vmxor %vm1046_vm7, %vm4010_vm3  ;;  %vm1055_vm10 = vcmp.lt.f32.partialorder %v543_v15, 0.5  ;;  %v570_v5 = vld [vmem:[%s4127_s3 + $0xcf8] sm:$0xff] }
 0x1c3   : > { %3093 = vst [vmem:[%s4144_s16 + $0xbd0] sm:$0xff] %v3715_v8  ;;  %v3716_v10 = vsel %vm1558_vm12, 1.0, %v4011_v7  ;;  %vm1559_vm14 = vmxor %vm1047_vm9, %vm4010_vm3  ;;  %vm1056_vm12 = vcmp.lt.f32.partialorder %v544_v17, 0.5  ;;  %v571_v8 = vld [vmem:[%s4127_s3 + $0xd00] sm:$0xff] }
 0x1c4   : > { %3094 = vst [vmem:[%s4144_s16 + $0xbd8] sm:$0xff] %v3716_v10  ;;  %v3717_v12 = vsel %vm1559_vm14, 1.0, %v4011_v7  ;;  %vm1560_vm0 = vmxor %vm1048_vm11, %vm4010_vm3  ;;  %vm1057_vm14 = vcmp.lt.f32.partialorder %v545_v19, 0.5  ;;  %v572_v10 = vld [vmem:[%s4127_s3 + $0xd08] sm:$0xff] }
 0x1c5   : > { %3095 = vst [vmem:[%s4144_s16 + $0xbe0] sm:$0xff] %v3717_v12  ;;  %v3718_v14 = vsel %vm1560_vm0, 1.0, %v4011_v7  ;;  %vm1561_vm2 = vmxor %vm1049_vm13, %vm4010_vm3  ;;  %vm1058_vm0 = vcmp.lt.f32.partialorder %v546_v21, 0.5  ;;  %v573_v12 = vld [vmem:[%s4127_s3 + $0xd10] sm:$0xff] }
 0x1c6   : > { %3096 = vst [vmem:[%s4144_s16 + $0xbe8] sm:$0xff] %v3718_v14  ;;  %v3719_v16 = vsel %vm1561_vm2, 1.0, %v4011_v7  ;;  %vm1562_vm5 = vmxor %vm1050_vm15, %vm4010_vm3  ;;  %vm1059_vm2 = vcmp.lt.f32.partialorder %v547_v23, 0.5  ;;  %v574_v14 = vld [vmem:[%s4127_s3 + $0xd18] sm:$0xff] }
 0x1c7   : > { %3097 = vst [vmem:[%s4144_s16 + $0xbf0] sm:$0xff] %v3719_v16  ;;  %v3720_v18 = vsel %vm1562_vm5, 1.0, %v4011_v7  ;;  %vm1563_vm7 = vmxor %vm1051_vm1, %vm4010_vm3  ;;  %vm1060_vm5 = vcmp.lt.f32.partialorder %v548_v25, 0.5  ;;  %v575_v16 = vld [vmem:[%s4127_s3 + $0xd20] sm:$0xff] }
 0x1c8   : > { %3098 = vst [vmem:[%s4144_s16 + $0xbf8] sm:$0xff] %v3720_v18  ;;  %v3721_v20 = vsel %vm1563_vm7, 1.0, %v4011_v7  ;;  %vm1564_vm9 = vmxor %vm1052_vm4, %vm4010_vm3  ;;  %vm1061_vm7 = vcmp.lt.f32.partialorder %v549_v27, 0.5  ;;  %v576_v18 = vld [vmem:[%s4127_s3 + $0xd28] sm:$0xff] }
 0x1c9   : > { %3099 = vst [vmem:[%s4144_s16 + $0xc00] sm:$0xff] %v3721_v20  ;;  %v3722_v22 = vsel %vm1564_vm9, 1.0, %v4011_v7  ;;  %vm1565_vm11 = vmxor %vm1053_vm6, %vm4010_vm3  ;;  %vm1062_vm9 = vcmp.lt.f32.partialorder %v550_v29, 0.5  ;;  %v577_v20 = vld [vmem:[%s4127_s3 + $0xd30] sm:$0xff] }
 0x1ca   : > { %3100 = vst [vmem:[%s4144_s16 + $0xc08] sm:$0xff] %v3722_v22  ;;  %v3723_v24 = vsel %vm1565_vm11, 1.0, %v4011_v7  ;;  %vm1566_vm13 = vmxor %vm1054_vm8, %vm4010_vm3  ;;  %vm1063_vm11 = vcmp.lt.f32.partialorder %v551_v31, 0.5  ;;  %v578_v22 = vld [vmem:[%s4127_s3 + $0xd38] sm:$0xff] }
 0x1cb   : > { %3101 = vst [vmem:[%s4144_s16 + $0xc10] sm:$0xff] %v3723_v24  ;;  %v3724_v26 = vsel %vm1566_vm13, 1.0, %v4011_v7  ;;  %vm1567_vm15 = vmxor %vm1055_vm10, %vm4010_vm3  ;;  %vm1064_vm13 = vcmp.lt.f32.partialorder %v552_v33, 0.5  ;;  %v579_v24 = vld [vmem:[%s4127_s3 + $0xd40] sm:$0xff] }
 0x1cc   : > { %3102 = vst [vmem:[%s4144_s16 + $0xc18] sm:$0xff] %v3724_v26  ;;  %v3725_v28 = vsel %vm1567_vm15, 1.0, %v4011_v7  ;;  %vm1568_vm1 = vmxor %vm1056_vm12, %vm4010_vm3  ;;  %vm1065_vm15 = vcmp.lt.f32.partialorder %v553_v35, 0.5  ;;  %v580_v26 = vld [vmem:[%s4127_s3 + $0xd48] sm:$0xff] }
 0x1cd   : > { %3103 = vst [vmem:[%s4144_s16 + $0xc20] sm:$0xff] %v3725_v28  ;;  %v3726_v30 = vsel %vm1568_vm1, 1.0, %v4011_v7  ;;  %vm1569_vm4 = vmxor %vm1057_vm14, %vm4010_vm3  ;;  %vm1066_vm1 = vcmp.lt.f32.partialorder %v554_v37, 0.5  ;;  %v581_v28 = vld [vmem:[%s4127_s3 + $0xd50] sm:$0xff] }
 0x1ce   : > { %3104 = vst [vmem:[%s4144_s16 + $0xc28] sm:$0xff] %v3726_v30  ;;  %v3727_v32 = vsel %vm1569_vm4, 1.0, %v4011_v7  ;;  %vm1570_vm6 = vmxor %vm1058_vm0, %vm4010_vm3  ;;  %vm1067_vm4 = vcmp.lt.f32.partialorder %v555_v39, 0.5  ;;  %v582_v30 = vld [vmem:[%s4127_s3 + $0xd58] sm:$0xff] }
 0x1cf   : > { %3105 = vst [vmem:[%s4144_s16 + $0xc30] sm:$0xff] %v3727_v32  ;;  %v3728_v34 = vsel %vm1570_vm6, 1.0, %v4011_v7  ;;  %vm1571_vm8 = vmxor %vm1059_vm2, %vm4010_vm3  ;;  %vm1068_vm6 = vcmp.lt.f32.partialorder %v556_v41, 0.5  ;;  %v583_v32 = vld [vmem:[%s4127_s3 + $0xd60] sm:$0xff] }
 0x1d0   : > { %3106 = vst [vmem:[%s4144_s16 + $0xc38] sm:$0xff] %v3728_v34  ;;  %v3729_v36 = vsel %vm1571_vm8, 1.0, %v4011_v7  ;;  %vm1572_vm10 = vmxor %vm1060_vm5, %vm4010_vm3  ;;  %vm1069_vm8 = vcmp.lt.f32.partialorder %v557_v43, 0.5  ;;  %v584_v34 = vld [vmem:[%s4127_s3 + $0xd68] sm:$0xff] }
 0x1d1   : > { %3107 = vst [vmem:[%s4144_s16 + $0xc40] sm:$0xff] %v3729_v36  ;;  %v3730_v38 = vsel %vm1572_vm10, 1.0, %v4011_v7  ;;  %vm1573_vm12 = vmxor %vm1061_vm7, %vm4010_vm3  ;;  %vm1070_vm10 = vcmp.lt.f32.partialorder %v558_v45, 0.5  ;;  %v585_v36 = vld [vmem:[%s4127_s3 + $0xd70] sm:$0xff] }
 0x1d2   : > { %3108 = vst [vmem:[%s4144_s16 + $0xc48] sm:$0xff] %v3730_v38  ;;  %v3731_v40 = vsel %vm1573_vm12, 1.0, %v4011_v7  ;;  %vm1574_vm14 = vmxor %vm1062_vm9, %vm4010_vm3  ;;  %vm1071_vm12 = vcmp.lt.f32.partialorder %v559_v47, 0.5  ;;  %v586_v38 = vld [vmem:[%s4127_s3 + $0xd78] sm:$0xff] }
 0x1d3   : > { %3109 = vst [vmem:[%s4144_s16 + $0xc50] sm:$0xff] %v3731_v40  ;;  %v3732_v42 = vsel %vm1574_vm14, 1.0, %v4011_v7  ;;  %vm1575_vm0 = vmxor %vm1063_vm11, %vm4010_vm3  ;;  %vm1072_vm14 = vcmp.lt.f32.partialorder %v560_v49, 0.5  ;;  %v587_v40 = vld [vmem:[%s4127_s3 + $0xd80] sm:$0xff] }
 0x1d4   : > { %3110 = vst [vmem:[%s4144_s16 + $0xc58] sm:$0xff] %v3732_v42  ;;  %v3733_v44 = vsel %vm1575_vm0, 1.0, %v4011_v7  ;;  %vm1576_vm2 = vmxor %vm1064_vm13, %vm4010_vm3  ;;  %vm1073_vm0 = vcmp.lt.f32.partialorder %v561_v51, 0.5  ;;  %v588_v42 = vld [vmem:[%s4127_s3 + $0xd88] sm:$0xff] }
 0x1d5   : > { %3111 = vst [vmem:[%s4144_s16 + $0xc60] sm:$0xff] %v3733_v44  ;;  %v3734_v46 = vsel %vm1576_vm2, 1.0, %v4011_v7  ;;  %vm1577_vm5 = vmxor %vm1065_vm15, %vm4010_vm3  ;;  %vm1074_vm2 = vcmp.lt.f32.partialorder %v562_v53, 0.5  ;;  %v589_v44 = vld [vmem:[%s4127_s3 + $0xd90] sm:$0xff] }
 0x1d6   : > { %3112 = vst [vmem:[%s4144_s16 + $0xc68] sm:$0xff] %v3734_v46  ;;  %v3735_v48 = vsel %vm1577_vm5, 1.0, %v4011_v7  ;;  %vm1578_vm7 = vmxor %vm1066_vm1, %vm4010_vm3  ;;  %vm1075_vm5 = vcmp.lt.f32.partialorder %v563_v55, 0.5  ;;  %v590_v46 = vld [vmem:[%s4127_s3 + $0xd98] sm:$0xff] }
 0x1d7   : > { %3113 = vst [vmem:[%s4144_s16 + $0xc70] sm:$0xff] %v3735_v48  ;;  %v3736_v50 = vsel %vm1578_vm7, 1.0, %v4011_v7  ;;  %vm1579_vm9 = vmxor %vm1067_vm4, %vm4010_vm3  ;;  %vm1076_vm7 = vcmp.lt.f32.partialorder %v564_v57, 0.5  ;;  %v591_v48 = vld [vmem:[%s4127_s3 + $0xda0] sm:$0xff] }
 0x1d8   : > { %3114 = vst [vmem:[%s4144_s16 + $0xc78] sm:$0xff] %v3736_v50  ;;  %v3737_v52 = vsel %vm1579_vm9, 1.0, %v4011_v7  ;;  %vm1580_vm11 = vmxor %vm1068_vm6, %vm4010_vm3  ;;  %vm1077_vm9 = vcmp.lt.f32.partialorder %v565_v59, 0.5  ;;  %v592_v50 = vld [vmem:[%s4127_s3 + $0xda8] sm:$0xff] }
 0x1d9   : > { %3115 = vst [vmem:[%s4144_s16 + $0xc80] sm:$0xff] %v3737_v52  ;;  %v3738_v54 = vsel %vm1580_vm11, 1.0, %v4011_v7  ;;  %vm1581_vm13 = vmxor %vm1069_vm8, %vm4010_vm3  ;;  %vm1078_vm11 = vcmp.lt.f32.partialorder %v566_v61, 0.5  ;;  %v593_v52 = vld [vmem:[%s4127_s3 + $0xdb0] sm:$0xff] }
 0x1da   : > { %3116 = vst [vmem:[%s4144_s16 + $0xc88] sm:$0xff] %v3738_v54  ;;  %v3739_v56 = vsel %vm1581_vm13, 1.0, %v4011_v7  ;;  %vm1582_vm15 = vmxor %vm1070_vm10, %vm4010_vm3  ;;  %vm1079_vm13 = vcmp.lt.f32.partialorder %v567_v63, 0.5  ;;  %v594_v54 = vld [vmem:[%s4127_s3 + $0xdb8] sm:$0xff] }
 0x1db   : > { %3117 = vst [vmem:[%s4144_s16 + $0xc90] sm:$0xff] %v3739_v56  ;;  %v3740_v58 = vsel %vm1582_vm15, 1.0, %v4011_v7  ;;  %vm1583_vm1 = vmxor %vm1071_vm12, %vm4010_vm3  ;;  %vm1080_vm15 = vcmp.lt.f32.partialorder %v568_v1, 0.5  ;;  %v595_v56 = vld [vmem:[%s4127_s3 + $0xdc0] sm:$0xff] }
 0x1dc   : > { %3118 = vst [vmem:[%s4144_s16 + $0xc98] sm:$0xff] %v3740_v58  ;;  %v3741_v60 = vsel %vm1583_vm1, 1.0, %v4011_v7  ;;  %vm1584_vm4 = vmxor %vm1072_vm14, %vm4010_vm3  ;;  %vm1081_vm1 = vcmp.lt.f32.partialorder %v569_v3, 0.5  ;;  %v596_v58 = vld [vmem:[%s4127_s3 + $0xdc8] sm:$0xff] }
 0x1dd   : > { %3119 = vst [vmem:[%s4144_s16 + $0xca0] sm:$0xff] %v3741_v60  ;;  %v3742_v62 = vsel %vm1584_vm4, 1.0, %v4011_v7  ;;  %vm1585_vm6 = vmxor %vm1073_vm0, %vm4010_vm3  ;;  %vm1082_vm4 = vcmp.lt.f32.partialorder %v570_v5, 0.5  ;;  %v597_v60 = vld [vmem:[%s4127_s3 + $0xdd0] sm:$0xff] }
 0x1de   : > { %3120 = vst [vmem:[%s4144_s16 + $0xca8] sm:$0xff] %v3742_v62  ;;  %v3743_v0 = vsel %vm1585_vm6, 1.0, %v4011_v7  ;;  %vm1586_vm8 = vmxor %vm1074_vm2, %vm4010_vm3  ;;  %vm1083_vm6 = vcmp.lt.f32.partialorder %v571_v8, 0.5  ;;  %v598_v62 = vld [vmem:[%s4127_s3 + $0xdd8] sm:$0xff] }
 0x1df   : > { %3121 = vst [vmem:[%s4144_s16 + $0xcb0] sm:$0xff] %v3743_v0  ;;  %v3744_v2 = vsel %vm1586_vm8, 1.0, %v4011_v7  ;;  %vm1587_vm10 = vmxor %vm1075_vm5, %vm4010_vm3  ;;  %vm1084_vm8 = vcmp.lt.f32.partialorder %v572_v10, 0.5  ;;  %v599_v0 = vld [vmem:[%s4127_s3 + $0xde0] sm:$0xff] }
 0x1e0   : > { %3122 = vst [vmem:[%s4144_s16 + $0xcb8] sm:$0xff] %v3744_v2  ;;  %v3745_v4 = vsel %vm1587_vm10, 1.0, %v4011_v7  ;;  %vm1588_vm12 = vmxor %vm1076_vm7, %vm4010_vm3  ;;  %vm1085_vm10 = vcmp.lt.f32.partialorder %v573_v12, 0.5  ;;  %v600_v2 = vld [vmem:[%s4127_s3 + $0xde8] sm:$0xff] }
 0x1e1   : > { %3123 = vst [vmem:[%s4144_s16 + $0xcc0] sm:$0xff] %v3745_v4  ;;  %v3746_v6 = vsel %vm1588_vm12, 1.0, %v4011_v7  ;;  %vm1589_vm14 = vmxor %vm1077_vm9, %vm4010_vm3  ;;  %vm1086_vm12 = vcmp.lt.f32.partialorder %v574_v14, 0.5  ;;  %v601_v4 = vld [vmem:[%s4127_s3 + $0xdf0] sm:$0xff] }
 0x1e2   : > { %3124 = vst [vmem:[%s4144_s16 + $0xcc8] sm:$0xff] %v3746_v6  ;;  %v3747_v9 = vsel %vm1589_vm14, 1.0, %v4011_v7  ;;  %vm1590_vm0 = vmxor %vm1078_vm11, %vm4010_vm3  ;;  %vm1087_vm14 = vcmp.lt.f32.partialorder %v575_v16, 0.5  ;;  %v602_v6 = vld [vmem:[%s4127_s3 + $0xdf8] sm:$0xff] }
 0x1e3   : > { %3125 = vst [vmem:[%s4144_s16 + $0xcd0] sm:$0xff] %v3747_v9  ;;  %v3748_v11 = vsel %vm1590_vm0, 1.0, %v4011_v7  ;;  %vm1591_vm2 = vmxor %vm1079_vm13, %vm4010_vm3  ;;  %vm1088_vm0 = vcmp.lt.f32.partialorder %v576_v18, 0.5  ;;  %v603_v9 = vld [vmem:[%s4127_s3 + $0xe00] sm:$0xff] }
 0x1e4   : > { %3126 = vst [vmem:[%s4144_s16 + $0xcd8] sm:$0xff] %v3748_v11  ;;  %v3749_v13 = vsel %vm1591_vm2, 1.0, %v4011_v7  ;;  %vm1592_vm5 = vmxor %vm1080_vm15, %vm4010_vm3  ;;  %vm1089_vm2 = vcmp.lt.f32.partialorder %v577_v20, 0.5  ;;  %v604_v11 = vld [vmem:[%s4127_s3 + $0xe08] sm:$0xff] }
 0x1e5   : > { %3127 = vst [vmem:[%s4144_s16 + $0xce0] sm:$0xff] %v3749_v13  ;;  %v3750_v15 = vsel %vm1592_vm5, 1.0, %v4011_v7  ;;  %vm1593_vm7 = vmxor %vm1081_vm1, %vm4010_vm3  ;;  %vm1090_vm5 = vcmp.lt.f32.partialorder %v578_v22, 0.5  ;;  %v605_v13 = vld [vmem:[%s4127_s3 + $0xe10] sm:$0xff] }
 0x1e6   : > { %3128 = vst [vmem:[%s4144_s16 + $0xce8] sm:$0xff] %v3750_v15  ;;  %v3751_v17 = vsel %vm1593_vm7, 1.0, %v4011_v7  ;;  %vm1594_vm9 = vmxor %vm1082_vm4, %vm4010_vm3  ;;  %vm1091_vm7 = vcmp.lt.f32.partialorder %v579_v24, 0.5  ;;  %v606_v15 = vld [vmem:[%s4127_s3 + $0xe18] sm:$0xff] }
 0x1e7   : > { %3129 = vst [vmem:[%s4144_s16 + $0xcf0] sm:$0xff] %v3751_v17  ;;  %v3752_v19 = vsel %vm1594_vm9, 1.0, %v4011_v7  ;;  %vm1595_vm11 = vmxor %vm1083_vm6, %vm4010_vm3  ;;  %vm1092_vm9 = vcmp.lt.f32.partialorder %v580_v26, 0.5  ;;  %v607_v17 = vld [vmem:[%s4127_s3 + $0xe20] sm:$0xff] }
 0x1e8   : > { %3130 = vst [vmem:[%s4144_s16 + $0xcf8] sm:$0xff] %v3752_v19  ;;  %v3753_v21 = vsel %vm1595_vm11, 1.0, %v4011_v7  ;;  %vm1596_vm13 = vmxor %vm1084_vm8, %vm4010_vm3  ;;  %vm1093_vm11 = vcmp.lt.f32.partialorder %v581_v28, 0.5  ;;  %v608_v19 = vld [vmem:[%s4127_s3 + $0xe28] sm:$0xff] }
 0x1e9   : > { %3131 = vst [vmem:[%s4144_s16 + $0xd00] sm:$0xff] %v3753_v21  ;;  %v3754_v23 = vsel %vm1596_vm13, 1.0, %v4011_v7  ;;  %vm1597_vm15 = vmxor %vm1085_vm10, %vm4010_vm3  ;;  %vm1094_vm13 = vcmp.lt.f32.partialorder %v582_v30, 0.5  ;;  %v609_v21 = vld [vmem:[%s4127_s3 + $0xe30] sm:$0xff] }
 0x1ea   : > { %3132 = vst [vmem:[%s4144_s16 + $0xd08] sm:$0xff] %v3754_v23  ;;  %v3755_v25 = vsel %vm1597_vm15, 1.0, %v4011_v7  ;;  %vm1598_vm1 = vmxor %vm1086_vm12, %vm4010_vm3  ;;  %vm1095_vm15 = vcmp.lt.f32.partialorder %v583_v32, 0.5  ;;  %v610_v23 = vld [vmem:[%s4127_s3 + $0xe38] sm:$0xff] }
 0x1eb   : > { %3133 = vst [vmem:[%s4144_s16 + $0xd10] sm:$0xff] %v3755_v25  ;;  %v3756_v27 = vsel %vm1598_vm1, 1.0, %v4011_v7  ;;  %vm1599_vm4 = vmxor %vm1087_vm14, %vm4010_vm3  ;;  %vm1096_vm1 = vcmp.lt.f32.partialorder %v584_v34, 0.5  ;;  %v611_v25 = vld [vmem:[%s4127_s3 + $0xe40] sm:$0xff] }
 0x1ec   : > { %3134 = vst [vmem:[%s4144_s16 + $0xd18] sm:$0xff] %v3756_v27  ;;  %v3757_v29 = vsel %vm1599_vm4, 1.0, %v4011_v7  ;;  %vm1600_vm6 = vmxor %vm1088_vm0, %vm4010_vm3  ;;  %vm1097_vm4 = vcmp.lt.f32.partialorder %v585_v36, 0.5  ;;  %v612_v27 = vld [vmem:[%s4127_s3 + $0xe48] sm:$0xff] }
 0x1ed   : > { %3135 = vst [vmem:[%s4144_s16 + $0xd20] sm:$0xff] %v3757_v29  ;;  %v3758_v31 = vsel %vm1600_vm6, 1.0, %v4011_v7  ;;  %vm1601_vm8 = vmxor %vm1089_vm2, %vm4010_vm3  ;;  %vm1098_vm6 = vcmp.lt.f32.partialorder %v586_v38, 0.5  ;;  %v613_v29 = vld [vmem:[%s4127_s3 + $0xe50] sm:$0xff] }
 0x1ee   : > { %3136 = vst [vmem:[%s4144_s16 + $0xd28] sm:$0xff] %v3758_v31  ;;  %v3759_v33 = vsel %vm1601_vm8, 1.0, %v4011_v7  ;;  %vm1602_vm10 = vmxor %vm1090_vm5, %vm4010_vm3  ;;  %vm1099_vm8 = vcmp.lt.f32.partialorder %v587_v40, 0.5  ;;  %v614_v31 = vld [vmem:[%s4127_s3 + $0xe58] sm:$0xff] }
 0x1ef   : > { %3137 = vst [vmem:[%s4144_s16 + $0xd30] sm:$0xff] %v3759_v33  ;;  %v3760_v35 = vsel %vm1602_vm10, 1.0, %v4011_v7  ;;  %vm1603_vm12 = vmxor %vm1091_vm7, %vm4010_vm3  ;;  %vm1100_vm10 = vcmp.lt.f32.partialorder %v588_v42, 0.5  ;;  %v615_v33 = vld [vmem:[%s4127_s3 + $0xe60] sm:$0xff] }
 0x1f0   : > { %3138 = vst [vmem:[%s4144_s16 + $0xd38] sm:$0xff] %v3760_v35  ;;  %v3761_v37 = vsel %vm1603_vm12, 1.0, %v4011_v7  ;;  %vm1604_vm14 = vmxor %vm1092_vm9, %vm4010_vm3  ;;  %vm1101_vm12 = vcmp.lt.f32.partialorder %v589_v44, 0.5  ;;  %v616_v35 = vld [vmem:[%s4127_s3 + $0xe68] sm:$0xff] }
 0x1f1   : > { %3139 = vst [vmem:[%s4144_s16 + $0xd40] sm:$0xff] %v3761_v37  ;;  %v3762_v39 = vsel %vm1604_vm14, 1.0, %v4011_v7  ;;  %vm1605_vm0 = vmxor %vm1093_vm11, %vm4010_vm3  ;;  %vm1102_vm14 = vcmp.lt.f32.partialorder %v590_v46, 0.5  ;;  %v617_v37 = vld [vmem:[%s4127_s3 + $0xe70] sm:$0xff] }
 0x1f2   : > { %3140 = vst [vmem:[%s4144_s16 + $0xd48] sm:$0xff] %v3762_v39  ;;  %v3763_v41 = vsel %vm1605_vm0, 1.0, %v4011_v7  ;;  %vm1606_vm2 = vmxor %vm1094_vm13, %vm4010_vm3  ;;  %vm1103_vm0 = vcmp.lt.f32.partialorder %v591_v48, 0.5  ;;  %v618_v39 = vld [vmem:[%s4127_s3 + $0xe78] sm:$0xff] }
 0x1f3   : > { %3141 = vst [vmem:[%s4144_s16 + $0xd50] sm:$0xff] %v3763_v41  ;;  %v3764_v43 = vsel %vm1606_vm2, 1.0, %v4011_v7  ;;  %vm1607_vm5 = vmxor %vm1095_vm15, %vm4010_vm3  ;;  %vm1104_vm2 = vcmp.lt.f32.partialorder %v592_v50, 0.5  ;;  %v619_v41 = vld [vmem:[%s4127_s3 + $0xe80] sm:$0xff] }
 0x1f4   : > { %3142 = vst [vmem:[%s4144_s16 + $0xd58] sm:$0xff] %v3764_v43  ;;  %v3765_v45 = vsel %vm1607_vm5, 1.0, %v4011_v7  ;;  %vm1608_vm7 = vmxor %vm1096_vm1, %vm4010_vm3  ;;  %vm1105_vm5 = vcmp.lt.f32.partialorder %v593_v52, 0.5  ;;  %v620_v43 = vld [vmem:[%s4127_s3 + $0xe88] sm:$0xff] }
 0x1f5   : > { %3143 = vst [vmem:[%s4144_s16 + $0xd60] sm:$0xff] %v3765_v45  ;;  %v3766_v47 = vsel %vm1608_vm7, 1.0, %v4011_v7  ;;  %vm1609_vm9 = vmxor %vm1097_vm4, %vm4010_vm3  ;;  %vm1106_vm7 = vcmp.lt.f32.partialorder %v594_v54, 0.5  ;;  %v621_v45 = vld [vmem:[%s4127_s3 + $0xe90] sm:$0xff] }
 0x1f6   : > { %3144 = vst [vmem:[%s4144_s16 + $0xd68] sm:$0xff] %v3766_v47  ;;  %v3767_v49 = vsel %vm1609_vm9, 1.0, %v4011_v7  ;;  %vm1610_vm11 = vmxor %vm1098_vm6, %vm4010_vm3  ;;  %vm1107_vm9 = vcmp.lt.f32.partialorder %v595_v56, 0.5  ;;  %v622_v47 = vld [vmem:[%s4127_s3 + $0xe98] sm:$0xff] }
 0x1f7   : > { %3145 = vst [vmem:[%s4144_s16 + $0xd70] sm:$0xff] %v3767_v49  ;;  %v3768_v51 = vsel %vm1610_vm11, 1.0, %v4011_v7  ;;  %vm1611_vm13 = vmxor %vm1099_vm8, %vm4010_vm3  ;;  %vm1108_vm11 = vcmp.lt.f32.partialorder %v596_v58, 0.5  ;;  %v623_v49 = vld [vmem:[%s4127_s3 + $0xea0] sm:$0xff] }
 0x1f8   : > { %3146 = vst [vmem:[%s4144_s16 + $0xd78] sm:$0xff] %v3768_v51  ;;  %v3769_v53 = vsel %vm1611_vm13, 1.0, %v4011_v7  ;;  %vm1612_vm15 = vmxor %vm1100_vm10, %vm4010_vm3  ;;  %vm1109_vm13 = vcmp.lt.f32.partialorder %v597_v60, 0.5  ;;  %v624_v51 = vld [vmem:[%s4127_s3 + $0xea8] sm:$0xff] }
 0x1f9   : > { %3147 = vst [vmem:[%s4144_s16 + $0xd80] sm:$0xff] %v3769_v53  ;;  %v3770_v55 = vsel %vm1612_vm15, 1.0, %v4011_v7  ;;  %vm1613_vm1 = vmxor %vm1101_vm12, %vm4010_vm3  ;;  %vm1110_vm15 = vcmp.lt.f32.partialorder %v598_v62, 0.5  ;;  %v625_v53 = vld [vmem:[%s4127_s3 + $0xeb0] sm:$0xff] }
 0x1fa   : > { %3148 = vst [vmem:[%s4144_s16 + $0xd88] sm:$0xff] %v3770_v55  ;;  %v3771_v57 = vsel %vm1613_vm1, 1.0, %v4011_v7  ;;  %vm1614_vm4 = vmxor %vm1102_vm14, %vm4010_vm3  ;;  %vm1111_vm1 = vcmp.lt.f32.partialorder %v599_v0, 0.5  ;;  %v626_v55 = vld [vmem:[%s4127_s3 + $0xeb8] sm:$0xff] }
 0x1fb   : > { %3149 = vst [vmem:[%s4144_s16 + $0xd90] sm:$0xff] %v3771_v57  ;;  %v3772_v59 = vsel %vm1614_vm4, 1.0, %v4011_v7  ;;  %vm1615_vm6 = vmxor %vm1103_vm0, %vm4010_vm3  ;;  %vm1112_vm4 = vcmp.lt.f32.partialorder %v600_v2, 0.5  ;;  %v627_v57 = vld [vmem:[%s4127_s3 + $0xec0] sm:$0xff] }
 0x1fc   : > { %3150 = vst [vmem:[%s4144_s16 + $0xd98] sm:$0xff] %v3772_v59  ;;  %v3773_v61 = vsel %vm1615_vm6, 1.0, %v4011_v7  ;;  %vm1616_vm8 = vmxor %vm1104_vm2, %vm4010_vm3  ;;  %vm1113_vm6 = vcmp.lt.f32.partialorder %v601_v4, 0.5  ;;  %v628_v59 = vld [vmem:[%s4127_s3 + $0xec8] sm:$0xff] }
 0x1fd   : > { %3151 = vst [vmem:[%s4144_s16 + $0xda0] sm:$0xff] %v3773_v61  ;;  %v3774_v63 = vsel %vm1616_vm8, 1.0, %v4011_v7  ;;  %vm1617_vm10 = vmxor %vm1105_vm5, %vm4010_vm3  ;;  %vm1114_vm8 = vcmp.lt.f32.partialorder %v602_v6, 0.5  ;;  %v629_v61 = vld [vmem:[%s4127_s3 + $0xed0] sm:$0xff] }
 0x1fe   : > { %3152 = vst [vmem:[%s4144_s16 + $0xda8] sm:$0xff] %v3774_v63  ;;  %v3775_v1 = vsel %vm1617_vm10, 1.0, %v4011_v7  ;;  %vm1618_vm12 = vmxor %vm1106_vm7, %vm4010_vm3  ;;  %vm1115_vm10 = vcmp.lt.f32.partialorder %v603_v9, 0.5  ;;  %v630_v63 = vld [vmem:[%s4127_s3 + $0xed8] sm:$0xff] }
 0x1ff   : > { %3153 = vst [vmem:[%s4144_s16 + $0xdb0] sm:$0xff] %v3775_v1  ;;  %v3776_v3 = vsel %vm1618_vm12, 1.0, %v4011_v7  ;;  %vm1619_vm14 = vmxor %vm1107_vm9, %vm4010_vm3  ;;  %vm1116_vm12 = vcmp.lt.f32.partialorder %v604_v11, 0.5  ;;  %v631_v1 = vld [vmem:[%s4127_s3 + $0xee0] sm:$0xff] }
 0x200   : > { %3154 = vst [vmem:[%s4144_s16 + $0xdb8] sm:$0xff] %v3776_v3  ;;  %v3777_v5 = vsel %vm1619_vm14, 1.0, %v4011_v7  ;;  %vm1620_vm0 = vmxor %vm1108_vm11, %vm4010_vm3  ;;  %vm1117_vm14 = vcmp.lt.f32.partialorder %v605_v13, 0.5  ;;  %v632_v3 = vld [vmem:[%s4127_s3 + $0xee8] sm:$0xff] }
 0x201   : > { %3155 = vst [vmem:[%s4144_s16 + $0xdc0] sm:$0xff] %v3777_v5  ;;  %v3778_v8 = vsel %vm1620_vm0, 1.0, %v4011_v7  ;;  %vm1621_vm2 = vmxor %vm1109_vm13, %vm4010_vm3  ;;  %vm1118_vm0 = vcmp.lt.f32.partialorder %v606_v15, 0.5  ;;  %v633_v5 = vld [vmem:[%s4127_s3 + $0xef0] sm:$0xff] }
 0x202   : > { %3156 = vst [vmem:[%s4144_s16 + $0xdc8] sm:$0xff] %v3778_v8  ;;  %v3779_v10 = vsel %vm1621_vm2, 1.0, %v4011_v7  ;;  %vm1622_vm5 = vmxor %vm1110_vm15, %vm4010_vm3  ;;  %vm1119_vm2 = vcmp.lt.f32.partialorder %v607_v17, 0.5  ;;  %v634_v8 = vld [vmem:[%s4127_s3 + $0xef8] sm:$0xff] }
 0x203   : > { %3157 = vst [vmem:[%s4144_s16 + $0xdd0] sm:$0xff] %v3779_v10  ;;  %v3780_v12 = vsel %vm1622_vm5, 1.0, %v4011_v7  ;;  %vm1623_vm7 = vmxor %vm1111_vm1, %vm4010_vm3  ;;  %vm1120_vm5 = vcmp.lt.f32.partialorder %v608_v19, 0.5  ;;  %v635_v10 = vld [vmem:[%s4127_s3 + $0xf00] sm:$0xff] }
 0x204   : > { %3158 = vst [vmem:[%s4144_s16 + $0xdd8] sm:$0xff] %v3780_v12  ;;  %v3781_v14 = vsel %vm1623_vm7, 1.0, %v4011_v7  ;;  %vm1624_vm9 = vmxor %vm1112_vm4, %vm4010_vm3  ;;  %vm1121_vm7 = vcmp.lt.f32.partialorder %v609_v21, 0.5  ;;  %v636_v12 = vld [vmem:[%s4127_s3 + $0xf08] sm:$0xff] }
 0x205   : > { %3159 = vst [vmem:[%s4144_s16 + $0xde0] sm:$0xff] %v3781_v14  ;;  %v3782_v16 = vsel %vm1624_vm9, 1.0, %v4011_v7  ;;  %vm1625_vm11 = vmxor %vm1113_vm6, %vm4010_vm3  ;;  %vm1122_vm9 = vcmp.lt.f32.partialorder %v610_v23, 0.5  ;;  %v637_v14 = vld [vmem:[%s4127_s3 + $0xf10] sm:$0xff] }
 0x206   : > { %3160 = vst [vmem:[%s4144_s16 + $0xde8] sm:$0xff] %v3782_v16  ;;  %v3783_v18 = vsel %vm1625_vm11, 1.0, %v4011_v7  ;;  %vm1626_vm13 = vmxor %vm1114_vm8, %vm4010_vm3  ;;  %vm1123_vm11 = vcmp.lt.f32.partialorder %v611_v25, 0.5  ;;  %v638_v16 = vld [vmem:[%s4127_s3 + $0xf18] sm:$0xff] }
 0x207   : > { %3161 = vst [vmem:[%s4144_s16 + $0xdf0] sm:$0xff] %v3783_v18  ;;  %v3784_v20 = vsel %vm1626_vm13, 1.0, %v4011_v7  ;;  %vm1627_vm15 = vmxor %vm1115_vm10, %vm4010_vm3  ;;  %vm1124_vm13 = vcmp.lt.f32.partialorder %v612_v27, 0.5  ;;  %v639_v18 = vld [vmem:[%s4127_s3 + $0xf20] sm:$0xff] }
 0x208   : > { %3162 = vst [vmem:[%s4144_s16 + $0xdf8] sm:$0xff] %v3784_v20  ;;  %v3785_v22 = vsel %vm1627_vm15, 1.0, %v4011_v7  ;;  %vm1628_vm1 = vmxor %vm1116_vm12, %vm4010_vm3  ;;  %vm1125_vm15 = vcmp.lt.f32.partialorder %v613_v29, 0.5  ;;  %v640_v20 = vld [vmem:[%s4127_s3 + $0xf28] sm:$0xff] }
 0x209   : > { %3163 = vst [vmem:[%s4144_s16 + $0xe00] sm:$0xff] %v3785_v22  ;;  %v3786_v24 = vsel %vm1628_vm1, 1.0, %v4011_v7  ;;  %vm1629_vm4 = vmxor %vm1117_vm14, %vm4010_vm3  ;;  %vm1126_vm1 = vcmp.lt.f32.partialorder %v614_v31, 0.5  ;;  %v641_v22 = vld [vmem:[%s4127_s3 + $0xf30] sm:$0xff] }
 0x20a   : > { %3164 = vst [vmem:[%s4144_s16 + $0xe08] sm:$0xff] %v3786_v24  ;;  %v3787_v26 = vsel %vm1629_vm4, 1.0, %v4011_v7  ;;  %vm1630_vm6 = vmxor %vm1118_vm0, %vm4010_vm3  ;;  %vm1127_vm4 = vcmp.lt.f32.partialorder %v615_v33, 0.5  ;;  %v642_v24 = vld [vmem:[%s4127_s3 + $0xf38] sm:$0xff] }
 0x20b   : > { %3165 = vst [vmem:[%s4144_s16 + $0xe10] sm:$0xff] %v3787_v26  ;;  %v3788_v28 = vsel %vm1630_vm6, 1.0, %v4011_v7  ;;  %vm1631_vm8 = vmxor %vm1119_vm2, %vm4010_vm3  ;;  %vm1128_vm6 = vcmp.lt.f32.partialorder %v616_v35, 0.5  ;;  %v643_v26 = vld [vmem:[%s4127_s3 + $0xf40] sm:$0xff] }
 0x20c   : > { %3166 = vst [vmem:[%s4144_s16 + $0xe18] sm:$0xff] %v3788_v28  ;;  %v3789_v30 = vsel %vm1631_vm8, 1.0, %v4011_v7  ;;  %vm1632_vm10 = vmxor %vm1120_vm5, %vm4010_vm3  ;;  %vm1129_vm8 = vcmp.lt.f32.partialorder %v617_v37, 0.5  ;;  %v644_v28 = vld [vmem:[%s4127_s3 + $0xf48] sm:$0xff] }
 0x20d   : > { %3167 = vst [vmem:[%s4144_s16 + $0xe20] sm:$0xff] %v3789_v30  ;;  %v3790_v32 = vsel %vm1632_vm10, 1.0, %v4011_v7  ;;  %vm1633_vm12 = vmxor %vm1121_vm7, %vm4010_vm3  ;;  %vm1130_vm10 = vcmp.lt.f32.partialorder %v618_v39, 0.5  ;;  %v645_v30 = vld [vmem:[%s4127_s3 + $0xf50] sm:$0xff] }
 0x20e   : > { %3168 = vst [vmem:[%s4144_s16 + $0xe28] sm:$0xff] %v3790_v32  ;;  %v3791_v34 = vsel %vm1633_vm12, 1.0, %v4011_v7  ;;  %vm1634_vm14 = vmxor %vm1122_vm9, %vm4010_vm3  ;;  %vm1131_vm12 = vcmp.lt.f32.partialorder %v619_v41, 0.5  ;;  %v646_v32 = vld [vmem:[%s4127_s3 + $0xf58] sm:$0xff] }
 0x20f   : > { %3169 = vst [vmem:[%s4144_s16 + $0xe30] sm:$0xff] %v3791_v34  ;;  %v3792_v36 = vsel %vm1634_vm14, 1.0, %v4011_v7  ;;  %vm1635_vm0 = vmxor %vm1123_vm11, %vm4010_vm3  ;;  %vm1132_vm14 = vcmp.lt.f32.partialorder %v620_v43, 0.5  ;;  %v647_v34 = vld [vmem:[%s4127_s3 + $0xf60] sm:$0xff] }
 0x210   : > { %3170 = vst [vmem:[%s4144_s16 + $0xe38] sm:$0xff] %v3792_v36  ;;  %v3793_v38 = vsel %vm1635_vm0, 1.0, %v4011_v7  ;;  %vm1636_vm2 = vmxor %vm1124_vm13, %vm4010_vm3  ;;  %vm1133_vm0 = vcmp.lt.f32.partialorder %v621_v45, 0.5  ;;  %v648_v36 = vld [vmem:[%s4127_s3 + $0xf68] sm:$0xff] }
 0x211   : > { %3171 = vst [vmem:[%s4144_s16 + $0xe40] sm:$0xff] %v3793_v38  ;;  %v3794_v40 = vsel %vm1636_vm2, 1.0, %v4011_v7  ;;  %vm1637_vm5 = vmxor %vm1125_vm15, %vm4010_vm3  ;;  %vm1134_vm2 = vcmp.lt.f32.partialorder %v622_v47, 0.5  ;;  %v649_v38 = vld [vmem:[%s4127_s3 + $0xf70] sm:$0xff] }
 0x212   : > { %3172 = vst [vmem:[%s4144_s16 + $0xe48] sm:$0xff] %v3794_v40  ;;  %v3795_v42 = vsel %vm1637_vm5, 1.0, %v4011_v7  ;;  %vm1638_vm7 = vmxor %vm1126_vm1, %vm4010_vm3  ;;  %vm1135_vm5 = vcmp.lt.f32.partialorder %v623_v49, 0.5  ;;  %v650_v40 = vld [vmem:[%s4127_s3 + $0xf78] sm:$0xff] }
 0x213   : > { %3173 = vst [vmem:[%s4144_s16 + $0xe50] sm:$0xff] %v3795_v42  ;;  %v3796_v44 = vsel %vm1638_vm7, 1.0, %v4011_v7  ;;  %vm1639_vm9 = vmxor %vm1127_vm4, %vm4010_vm3  ;;  %vm1136_vm7 = vcmp.lt.f32.partialorder %v624_v51, 0.5  ;;  %v651_v42 = vld [vmem:[%s4127_s3 + $0xf80] sm:$0xff] }
 0x214   : > { %3174 = vst [vmem:[%s4144_s16 + $0xe58] sm:$0xff] %v3796_v44  ;;  %v3797_v46 = vsel %vm1639_vm9, 1.0, %v4011_v7  ;;  %vm1640_vm11 = vmxor %vm1128_vm6, %vm4010_vm3  ;;  %vm1137_vm9 = vcmp.lt.f32.partialorder %v625_v53, 0.5  ;;  %v652_v44 = vld [vmem:[%s4127_s3 + $0xf88] sm:$0xff] }
 0x215   : > { %3175 = vst [vmem:[%s4144_s16 + $0xe60] sm:$0xff] %v3797_v46  ;;  %v3798_v48 = vsel %vm1640_vm11, 1.0, %v4011_v7  ;;  %vm1641_vm13 = vmxor %vm1129_vm8, %vm4010_vm3  ;;  %vm1138_vm11 = vcmp.lt.f32.partialorder %v626_v55, 0.5  ;;  %v653_v46 = vld [vmem:[%s4127_s3 + $0xf90] sm:$0xff] }
 0x216   : > { %3176 = vst [vmem:[%s4144_s16 + $0xe68] sm:$0xff] %v3798_v48  ;;  %v3799_v50 = vsel %vm1641_vm13, 1.0, %v4011_v7  ;;  %vm1642_vm15 = vmxor %vm1130_vm10, %vm4010_vm3  ;;  %vm1139_vm13 = vcmp.lt.f32.partialorder %v627_v57, 0.5  ;;  %v654_v48 = vld [vmem:[%s4127_s3 + $0xf98] sm:$0xff] }
 0x217   : > { %3177 = vst [vmem:[%s4144_s16 + $0xe70] sm:$0xff] %v3799_v50  ;;  %v3800_v52 = vsel %vm1642_vm15, 1.0, %v4011_v7  ;;  %vm1643_vm1 = vmxor %vm1131_vm12, %vm4010_vm3  ;;  %vm1140_vm15 = vcmp.lt.f32.partialorder %v628_v59, 0.5  ;;  %v655_v50 = vld [vmem:[%s4127_s3 + $0xfa0] sm:$0xff] }
 0x218   : > { %3178 = vst [vmem:[%s4144_s16 + $0xe78] sm:$0xff] %v3800_v52  ;;  %v3801_v54 = vsel %vm1643_vm1, 1.0, %v4011_v7  ;;  %vm1644_vm4 = vmxor %vm1132_vm14, %vm4010_vm3  ;;  %vm1141_vm1 = vcmp.lt.f32.partialorder %v629_v61, 0.5  ;;  %v656_v52 = vld [vmem:[%s4127_s3 + $0xfa8] sm:$0xff] }
 0x219   : > { %3179 = vst [vmem:[%s4144_s16 + $0xe80] sm:$0xff] %v3801_v54  ;;  %v3802_v56 = vsel %vm1644_vm4, 1.0, %v4011_v7  ;;  %vm1645_vm6 = vmxor %vm1133_vm0, %vm4010_vm3  ;;  %vm1142_vm4 = vcmp.lt.f32.partialorder %v630_v63, 0.5  ;;  %v657_v54 = vld [vmem:[%s4127_s3 + $0xfb0] sm:$0xff] }
 0x21a   : > { %3180 = vst [vmem:[%s4144_s16 + $0xe88] sm:$0xff] %v3802_v56  ;;  %v3803_v58 = vsel %vm1645_vm6, 1.0, %v4011_v7  ;;  %vm1646_vm8 = vmxor %vm1134_vm2, %vm4010_vm3  ;;  %vm1143_vm6 = vcmp.lt.f32.partialorder %v631_v1, 0.5  ;;  %v658_v56 = vld [vmem:[%s4127_s3 + $0xfb8] sm:$0xff] }
 0x21b   : > { %3181 = vst [vmem:[%s4144_s16 + $0xe90] sm:$0xff] %v3803_v58  ;;  %v3804_v60 = vsel %vm1646_vm8, 1.0, %v4011_v7  ;;  %vm1647_vm10 = vmxor %vm1135_vm5, %vm4010_vm3  ;;  %vm1144_vm8 = vcmp.lt.f32.partialorder %v632_v3, 0.5  ;;  %v659_v58 = vld [vmem:[%s4127_s3 + $0xfc0] sm:$0xff] }
 0x21c   : > { %3182 = vst [vmem:[%s4144_s16 + $0xe98] sm:$0xff] %v3804_v60  ;;  %v3805_v62 = vsel %vm1647_vm10, 1.0, %v4011_v7  ;;  %vm1648_vm12 = vmxor %vm1136_vm7, %vm4010_vm3  ;;  %vm1145_vm10 = vcmp.lt.f32.partialorder %v633_v5, 0.5  ;;  %v660_v60 = vld [vmem:[%s4127_s3 + $0xfc8] sm:$0xff] }
 0x21d   : > { %3183 = vst [vmem:[%s4144_s16 + $0xea0] sm:$0xff] %v3805_v62  ;;  %v3806_v0 = vsel %vm1648_vm12, 1.0, %v4011_v7  ;;  %vm1649_vm14 = vmxor %vm1137_vm9, %vm4010_vm3  ;;  %vm1146_vm12 = vcmp.lt.f32.partialorder %v634_v8, 0.5  ;;  %v661_v62 = vld [vmem:[%s4127_s3 + $0xfd0] sm:$0xff] }
 0x21e   : > { %3184 = vst [vmem:[%s4144_s16 + $0xea8] sm:$0xff] %v3806_v0  ;;  %v3807_v2 = vsel %vm1649_vm14, 1.0, %v4011_v7  ;;  %vm1650_vm0 = vmxor %vm1138_vm11, %vm4010_vm3  ;;  %vm1147_vm14 = vcmp.lt.f32.partialorder %v635_v10, 0.5  ;;  %v662_v0 = vld [vmem:[%s4127_s3 + $0xfd8] sm:$0xff] }
 0x21f   : > { %3185 = vst [vmem:[%s4144_s16 + $0xeb0] sm:$0xff] %v3807_v2  ;;  %v3808_v4 = vsel %vm1650_vm0, 1.0, %v4011_v7  ;;  %vm1651_vm2 = vmxor %vm1139_vm13, %vm4010_vm3  ;;  %vm1148_vm0 = vcmp.lt.f32.partialorder %v636_v12, 0.5  ;;  %v663_v2 = vld [vmem:[%s4127_s3 + $0xfe0] sm:$0xff] }
 0x220   : > { %3186 = vst [vmem:[%s4144_s16 + $0xeb8] sm:$0xff] %v3808_v4  ;;  %v3809_v6 = vsel %vm1651_vm2, 1.0, %v4011_v7  ;;  %vm1652_vm5 = vmxor %vm1140_vm15, %vm4010_vm3  ;;  %vm1149_vm2 = vcmp.lt.f32.partialorder %v637_v14, 0.5  ;;  %v664_v4 = vld [vmem:[%s4127_s3 + $0xfe8] sm:$0xff] }
 0x221   : > { %3187 = vst [vmem:[%s4144_s16 + $0xec0] sm:$0xff] %v3809_v6  ;;  %v3810_v9 = vsel %vm1652_vm5, 1.0, %v4011_v7  ;;  %vm1653_vm7 = vmxor %vm1141_vm1, %vm4010_vm3  ;;  %vm1150_vm5 = vcmp.lt.f32.partialorder %v638_v16, 0.5  ;;  %v665_v6 = vld [vmem:[%s4127_s3 + $0xff0] sm:$0xff] }
 0x222   : > { %3188 = vst [vmem:[%s4144_s16 + $0xec8] sm:$0xff] %v3810_v9  ;;  %v3811_v11 = vsel %vm1653_vm7, 1.0, %v4011_v7  ;;  %vm1654_vm9 = vmxor %vm1142_vm4, %vm4010_vm3  ;;  %vm1151_vm7 = vcmp.lt.f32.partialorder %v639_v18, 0.5  ;;  %v666_v9 = vld [vmem:[%s4127_s3 + $0xff8] sm:$0xff] }
 0x223   : > { %3189 = vst [vmem:[%s4144_s16 + $0xed0] sm:$0xff] %v3811_v11  ;;  %v3812_v13 = vsel %vm1654_vm9, 1.0, %v4011_v7  ;;  %vm1655_vm11 = vmxor %vm1143_vm6, %vm4010_vm3  ;;  %vm1152_vm9 = vcmp.lt.f32.partialorder %v640_v20, 0.5 }
 0x224   : > { %3190 = vst [vmem:[%s4144_s16 + $0xed8] sm:$0xff] %v3812_v13  ;;  %v3813_v15 = vsel %vm1655_vm11, 1.0, %v4011_v7  ;;  %vm1656_vm13 = vmxor %vm1144_vm8, %vm4010_vm3  ;;  %vm1153_vm11 = vcmp.lt.f32.partialorder %v641_v22, 0.5 }
 0x225   : > { %3191 = vst [vmem:[%s4144_s16 + $0xee0] sm:$0xff] %v3813_v15  ;;  %v3814_v17 = vsel %vm1656_vm13, 1.0, %v4011_v7  ;;  %vm1657_vm15 = vmxor %vm1145_vm10, %vm4010_vm3  ;;  %vm1154_vm13 = vcmp.lt.f32.partialorder %v642_v24, 0.5 }
 0x226   : > { %3192 = vst [vmem:[%s4144_s16 + $0xee8] sm:$0xff] %v3814_v17  ;;  %v3815_v19 = vsel %vm1657_vm15, 1.0, %v4011_v7  ;;  %vm1658_vm1 = vmxor %vm1146_vm12, %vm4010_vm3  ;;  %vm1155_vm15 = vcmp.lt.f32.partialorder %v643_v26, 0.5 }
 0x227   : > { %3193 = vst [vmem:[%s4144_s16 + $0xef0] sm:$0xff] %v3815_v19  ;;  %v3816_v21 = vsel %vm1658_vm1, 1.0, %v4011_v7  ;;  %vm1659_vm4 = vmxor %vm1147_vm14, %vm4010_vm3  ;;  %vm1156_vm1 = vcmp.lt.f32.partialorder %v644_v28, 0.5 }
 0x228   : > { %3194 = vst [vmem:[%s4144_s16 + $0xef8] sm:$0xff] %v3816_v21  ;;  %v3817_v23 = vsel %vm1659_vm4, 1.0, %v4011_v7  ;;  %vm1660_vm6 = vmxor %vm1148_vm0, %vm4010_vm3  ;;  %vm1157_vm4 = vcmp.lt.f32.partialorder %v645_v30, 0.5 }
 0x229   : > { %3195 = vst [vmem:[%s4144_s16 + $0xf00] sm:$0xff] %v3817_v23  ;;  %v3818_v25 = vsel %vm1660_vm6, 1.0, %v4011_v7  ;;  %vm1661_vm8 = vmxor %vm1149_vm2, %vm4010_vm3  ;;  %vm1158_vm6 = vcmp.lt.f32.partialorder %v646_v32, 0.5 }
 0x22a   : > { %3196 = vst [vmem:[%s4144_s16 + $0xf08] sm:$0xff] %v3818_v25  ;;  %v3819_v27 = vsel %vm1661_vm8, 1.0, %v4011_v7  ;;  %vm1662_vm10 = vmxor %vm1150_vm5, %vm4010_vm3  ;;  %vm1159_vm8 = vcmp.lt.f32.partialorder %v647_v34, 0.5 }
 0x22b   : > { %3197 = vst [vmem:[%s4144_s16 + $0xf10] sm:$0xff] %v3819_v27  ;;  %v3820_v29 = vsel %vm1662_vm10, 1.0, %v4011_v7  ;;  %vm1663_vm12 = vmxor %vm1151_vm7, %vm4010_vm3  ;;  %vm1160_vm10 = vcmp.lt.f32.partialorder %v648_v36, 0.5 }
 0x22c   : > { %3198 = vst [vmem:[%s4144_s16 + $0xf18] sm:$0xff] %v3820_v29  ;;  %v3821_v31 = vsel %vm1663_vm12, 1.0, %v4011_v7  ;;  %vm1664_vm14 = vmxor %vm1152_vm9, %vm4010_vm3  ;;  %vm1161_vm12 = vcmp.lt.f32.partialorder %v649_v38, 0.5 }
 0x22d   : > { %3199 = vst [vmem:[%s4144_s16 + $0xf20] sm:$0xff] %v3821_v31  ;;  %v3822_v33 = vsel %vm1664_vm14, 1.0, %v4011_v7  ;;  %vm1665_vm0 = vmxor %vm1153_vm11, %vm4010_vm3  ;;  %vm1162_vm14 = vcmp.lt.f32.partialorder %v650_v40, 0.5 }
 0x22e   : > { %3200 = vst [vmem:[%s4144_s16 + $0xf28] sm:$0xff] %v3822_v33  ;;  %v3823_v35 = vsel %vm1665_vm0, 1.0, %v4011_v7  ;;  %vm1666_vm2 = vmxor %vm1154_vm13, %vm4010_vm3  ;;  %vm1163_vm0 = vcmp.lt.f32.partialorder %v651_v42, 0.5 }
 0x22f   : > { %3201 = vst [vmem:[%s4144_s16 + $0xf30] sm:$0xff] %v3823_v35  ;;  %v3824_v37 = vsel %vm1666_vm2, 1.0, %v4011_v7  ;;  %vm1667_vm5 = vmxor %vm1155_vm15, %vm4010_vm3  ;;  %vm1164_vm2 = vcmp.lt.f32.partialorder %v652_v44, 0.5 }
 0x230   : > { %3202 = vst [vmem:[%s4144_s16 + $0xf38] sm:$0xff] %v3824_v37  ;;  %v3825_v39 = vsel %vm1667_vm5, 1.0, %v4011_v7  ;;  %vm1668_vm7 = vmxor %vm1156_vm1, %vm4010_vm3  ;;  %vm1165_vm5 = vcmp.lt.f32.partialorder %v653_v46, 0.5 }
 0x231   : > { %3203 = vst [vmem:[%s4144_s16 + $0xf40] sm:$0xff] %v3825_v39  ;;  %v3826_v41 = vsel %vm1668_vm7, 1.0, %v4011_v7  ;;  %vm1669_vm9 = vmxor %vm1157_vm4, %vm4010_vm3  ;;  %vm1166_vm7 = vcmp.lt.f32.partialorder %v654_v48, 0.5 }
 0x232   : > { %3204 = vst [vmem:[%s4144_s16 + $0xf48] sm:$0xff] %v3826_v41  ;;  %v3827_v43 = vsel %vm1669_vm9, 1.0, %v4011_v7  ;;  %vm1670_vm11 = vmxor %vm1158_vm6, %vm4010_vm3  ;;  %vm1167_vm9 = vcmp.lt.f32.partialorder %v655_v50, 0.5 }
 0x233   : > { %3205 = vst [vmem:[%s4144_s16 + $0xf50] sm:$0xff] %v3827_v43  ;;  %v3828_v45 = vsel %vm1670_vm11, 1.0, %v4011_v7  ;;  %vm1671_vm13 = vmxor %vm1159_vm8, %vm4010_vm3  ;;  %vm1168_vm11 = vcmp.lt.f32.partialorder %v656_v52, 0.5 }
 0x234   : > { %3206 = vst [vmem:[%s4144_s16 + $0xf58] sm:$0xff] %v3828_v45  ;;  %v3829_v47 = vsel %vm1671_vm13, 1.0, %v4011_v7  ;;  %vm1672_vm15 = vmxor %vm1160_vm10, %vm4010_vm3  ;;  %vm1169_vm13 = vcmp.lt.f32.partialorder %v657_v54, 0.5 }
 0x235   : > { %3207 = vst [vmem:[%s4144_s16 + $0xf60] sm:$0xff] %v3829_v47  ;;  %v3830_v49 = vsel %vm1672_vm15, 1.0, %v4011_v7  ;;  %vm1673_vm1 = vmxor %vm1161_vm12, %vm4010_vm3  ;;  %vm1170_vm15 = vcmp.lt.f32.partialorder %v658_v56, 0.5 }
 0x236   : > { %3208 = vst [vmem:[%s4144_s16 + $0xf68] sm:$0xff] %v3830_v49  ;;  %v3831_v51 = vsel %vm1673_vm1, 1.0, %v4011_v7  ;;  %vm1674_vm4 = vmxor %vm1162_vm14, %vm4010_vm3  ;;  %vm1171_vm1 = vcmp.lt.f32.partialorder %v659_v58, 0.5 }
 0x237   : > { %3209 = vst [vmem:[%s4144_s16 + $0xf70] sm:$0xff] %v3831_v51  ;;  %v3832_v53 = vsel %vm1674_vm4, 1.0, %v4011_v7  ;;  %vm1675_vm6 = vmxor %vm1163_vm0, %vm4010_vm3  ;;  %vm1172_vm4 = vcmp.lt.f32.partialorder %v660_v60, 0.5 }
 0x238   : > { %3210 = vst [vmem:[%s4144_s16 + $0xf78] sm:$0xff] %v3832_v53  ;;  %v3833_v55 = vsel %vm1675_vm6, 1.0, %v4011_v7  ;;  %vm1676_vm8 = vmxor %vm1164_vm2, %vm4010_vm3  ;;  %vm1173_vm6 = vcmp.lt.f32.partialorder %v661_v62, 0.5 }
 0x239   : > { %3211 = vst [vmem:[%s4144_s16 + $0xf80] sm:$0xff] %v3833_v55  ;;  %v3834_v57 = vsel %vm1676_vm8, 1.0, %v4011_v7  ;;  %vm1677_vm10 = vmxor %vm1165_vm5, %vm4010_vm3  ;;  %vm1174_vm8 = vcmp.lt.f32.partialorder %v662_v0, 0.5 }
 0x23a   : > { %3212 = vst [vmem:[%s4144_s16 + $0xf88] sm:$0xff] %v3834_v57  ;;  %v3835_v59 = vsel %vm1677_vm10, 1.0, %v4011_v7  ;;  %vm1678_vm12 = vmxor %vm1166_vm7, %vm4010_vm3  ;;  %vm1175_vm10 = vcmp.lt.f32.partialorder %v663_v2, 0.5 }
 0x23b   : > { %3213 = vst [vmem:[%s4144_s16 + $0xf90] sm:$0xff] %v3835_v59  ;;  %v3836_v61 = vsel %vm1678_vm12, 1.0, %v4011_v7  ;;  %vm1679_vm14 = vmxor %vm1167_vm9, %vm4010_vm3  ;;  %vm1176_vm12 = vcmp.lt.f32.partialorder %v664_v4, 0.5 }
 0x23c   : > { %3214 = vst [vmem:[%s4144_s16 + $0xf98] sm:$0xff] %v3836_v61  ;;  %v3837_v63 = vsel %vm1679_vm14, 1.0, %v4011_v7  ;;  %vm1680_vm0 = vmxor %vm1168_vm11, %vm4010_vm3  ;;  %vm1177_vm14 = vcmp.lt.f32.partialorder %v665_v6, 0.5 }
 0x23d   : > { %3215 = vst [vmem:[%s4144_s16 + $0xfa0] sm:$0xff] %v3837_v63  ;;  %v3838_v1 = vsel %vm1680_vm0, 1.0, %v4011_v7  ;;  %vm1681_vm2 = vmxor %vm1169_vm13, %vm4010_vm3  ;;  %vm1178_vm0 = vcmp.lt.f32.partialorder %v666_v9, 0.5 }
 0x23e   : > { %3216 = vst [vmem:[%s4144_s16 + $0xfa8] sm:$0xff] %v3838_v1  ;;  %v3839_v3 = vsel %vm1681_vm2, 1.0, %v4011_v7  ;;  %vm1682_vm5 = vmxor %vm1170_vm15, %vm4010_vm3 }
 0x23f   : > { %3217 = vst [vmem:[%s4144_s16 + $0xfb0] sm:$0xff] %v3839_v3  ;;  %v3840_v5 = vsel %vm1682_vm5, 1.0, %v4011_v7  ;;  %vm1683_vm7 = vmxor %vm1171_vm1, %vm4010_vm3 }
 0x240   : > { %3218 = vst [vmem:[%s4144_s16 + $0xfb8] sm:$0xff] %v3840_v5  ;;  %v3841_v8 = vsel %vm1683_vm7, 1.0, %v4011_v7  ;;  %vm1684_vm9 = vmxor %vm1172_vm4, %vm4010_vm3 }
 0x241   : > { %3219 = vst [vmem:[%s4144_s16 + $0xfc0] sm:$0xff] %v3841_v8  ;;  %v3842_v10 = vsel %vm1684_vm9, 1.0, %v4011_v7  ;;  %vm1685_vm11 = vmxor %vm1173_vm6, %vm4010_vm3 }
 0x242   : > { %3220 = vst [vmem:[%s4144_s16 + $0xfc8] sm:$0xff] %v3842_v10  ;;  %v3843_v11 = vsel %vm1685_vm11, 1.0, %v4011_v7  ;;  %vm1686_vm13 = vmxor %vm1174_vm8, %vm4010_vm3  ;;  %3234 = sbr.rel (!%p4069_p9) target bundleno = 613 (0x265), region = 32 }
 0x243   : > { %3221 = vst [vmem:[%s4144_s16 + $0xfd0] sm:$0xff] %v3843_v11  ;;  %v3844_v12 = vsel %vm1686_vm13, 1.0, %v4011_v7  ;;  %vm1687_vm15 = vmxor %vm1175_vm10, %vm4010_vm3 }
 0x244   : > { %3222 = vst [vmem:[%s4144_s16 + $0xfd8] sm:$0xff] %v3844_v12  ;;  %v3845_v13 = vsel %vm1687_vm15, 1.0, %v4011_v7  ;;  %vm1688_vm1 = vmxor %vm1176_vm12, %vm4010_vm3 }
 0x245   : > { %3223 = vst [vmem:[%s4144_s16 + $0xfe0] sm:$0xff] %v3845_v13  ;;  %v3846_v14 = vsel %vm1688_vm1, 1.0, %v4011_v7  ;;  %vm1689_vm2 = vmxor %vm1177_vm14, %vm4010_vm3 }
 0x246   : > { %3224 = vst [vmem:[%s4144_s16 + $0xfe8] sm:$0xff] %v3846_v14  ;;  %v3847_v15 = vsel %vm1689_vm2, 1.0, %v4011_v7  ;;  %vm1690_vm4 = vmxor %vm1178_vm0, %vm4010_vm3 }
 0x247   : > { %3225 = vst [vmem:[%s4144_s16 + $0xff0] sm:$0xff] %v3847_v15  ;;  %v3848_v16 = vsel %vm1690_vm4, 1.0, %v4011_v7 }
 0x248   : > { %3226 = vst [vmem:[%s4144_s16 + $0xff8] sm:$0xff] %v3848_v16 }
 0x249   : > { %s6261_s30 = smov (!%p3237_p6, %s3236_s30), 64 }
 0x24a   : > { %s6190_s2 = sshll.u32 %s6261_s30, 10 }
 0x24b   : > { %s3242_s4 = ssub.s32 65536, %s6190_s2 }
 0x24c   : > { %3243 = vsyncadd %s3228_s23, %s3242_s4  ;;  %p3853_p10 = scmp.ne.s32.totalorder %s6190_s2, 0  ;;  %s3865_s17 = sshll.u32 %s4046_s10, 16 }
 0x24d   : > { %s6200_s13 = scalar_lea.hbm %s6249_s1, %s3865_s17  ;;  %s3249_s14 = sshll.u32 %s4144_s16, 4  ;;  %s6203_s14 = int_to_ptr.vmem [resolvable:$true] %s3249_s14 }
 0x24e   : > { %s3939_s19 = scalar_lea.vmem %s6203_s14, %s6190_s2  ;;  %s4012_s20 = smov [#allocation5]  }
 0x24f   : > { %p3940_p9 = scmp.ne.s32.totalorder %s6203_s14, %s3939_s19  ;;  %s3943_s21 = sshll.u32 %s4012_s20, 4  ;;  %s3944_s21 = int_to_ptr.vmem [resolvable:$false] %s3943_s21 }
 0x250   : > { %s3945_s10 = scalar_lea.vmem %s3944_s21, 131072  ;;  %p3946_p12 = scmp.lt.s32.totalorder %s6203_s14, %s3944_s21 }
 0x251   : > { %p3941_p13 = pnand %p3940_p9, %p3853_p10  ;;  %p3947_p0 = scmp.lt.s32.totalorder %s3945_s10, %s3939_s19 }
 0x253   : > { %p3942_p11 = pneg %p3941_p13  ;;  %p3948_p1 = por %p3947_p0, %p3946_p12 }
 0x255   : > { %p3949_p3 = pnand %p3948_p1, %p3942_p11 }
 0x257   : > { %3952 = shalt.err (!%p3949_p3)
}
 0x258   : > { %s3953_s22 = scalar_lea.hbm %s6200_s13, %s6190_s2  ;;  %s3957_s28 = scalar_lea.hbm %s6249_s1, 133120 }
 0x259   : > { %p3954_p4 = scmp.ne.s32.totalorder %s6200_s13, %s3953_s22  ;;  %p3958_p7 = scmp.lt.u32.totalorder %s6200_s13, %s6249_s1 }
 0x25a   : > { %p3959_p8 = scmp.lt.u32.totalorder %s3957_s28, %s3953_s22  ;;  %p3961_p9 = scmp.lt.u32.totalorder %s3953_s22, %s6200_s13 }
 0x25b   : > { %p3955_p5 = pnand %p3954_p4, %p3853_p10 }
 0x25c   : > { %p3960_p6 = por %p3959_p8, %p3958_p7 }
 0x25d   : > { %p3956_p2 = pneg %p3955_p5 }
 0x25e   : > { %p3962_p13 = por %p3961_p9, %p3960_p6 }
 0x260   : > { %p3963_p11 = pnand %p3962_p13, %p3956_p2 }
 0x262   : > { %3966 = shalt.err (!%p3963_p11)
}
 0x263   : > { %s4013_s16 = smov 1024   ;;  %s4014_s25 = smov 64  }
 0x264   : > { %3255 = dma.vmem_to_hbm [thread:$0]  (%p3853_p10), %s6203_s14, %s6190_s2, %s6200_s13, %s3228_s23, %s4013_s16, %s4013_s16, %s4014_s25  }
 0x265 PF: > { %p3872_p12 = scmp.ge.s32.totalorder %s4005_s9, 2  ;;  %s3264_s30 = sand.u32 1, %s3993_s6  }
 0x266   : > { %p6253_p0 = scmp.ne.s32.totalorder %s6252_s18, 0  ;;  %s3265_s4 = scalar_lea.sflag [#allocation4], %s3264_s30 }
 0x268   : > { %p3869_p1 = pnand %p3872_p12, %p6253_p0 }
 0x26a   : > { %3988 = dma.done.wait (!%p3869_p1), %s3265_s4, 65536  }
 0x26b   : > { %3990 = vsyncadd (!%p3869_p1), %s3265_s4, 4294901760  ;;  %p14_p3 = scmp.ge.s32.totalorder %s4050_s12, 5   ;;  %s6254_s6 = smov %s3997_s7 }
 0x26c   : > { %s6255_s7 = smov %s4001_s8  ;;  %s6256_s8 = smov %s4062_s15 }
 0x26d   : > { %s6257_s9 = smov %s4050_s12  ;;  %16 = sbr.rel (!%p14_p3) target bundleno = 5 (0x5), region = 69 }
 0x274   :  { %3270 = vsyncpa [#allocation3], 1 }
 0x275   :  { %3272 = vsyncpa [#allocation3 + $0x1], 1 }
 0x276   :  { %3273 = vsyncpa [#allocation4], 1 }
 0x277   :  { %3275 = vsyncpa [#allocation4 + $0x1], 1 }

</bundles_post_ra>
